<compile_context>
chip_gen: v7x
topology: tpu7x:2x2x1
jax: 0.10.0
libtpu: 0.0.40
codegen_flags: <defaults>
</compile_context>

<pallas_src>
import jax
import jax.numpy as jnp
import numpy as np
from jax.experimental import pallas as pl
from jax.experimental.pallas import tpu as pltpu


# Tile pairs whose minimum *spatial* squared feature distance exceeds this
# contribute at most exp(-20) ~ 2e-9 per element to the sums -> safe to skip.
_SKIP_D2_THRESHOLD = 40.0


def _round_up(x, m):
    return (x + m - 1) // m * m


def _pad_last(x, n_padded):
    n = x.shape[-1]
    if n_padded == n:
        return x
    pad = [(0, 0)] * (x.ndim - 1) + [(0, n_padded - n)]
    return jnp.pad(x, pad)


def _device_info():
    """(vmem_capacity_bytes, device_kind lowercase), with safe fallbacks."""
    kind = ""
    try:
        kind = jax.devices()[0].device_kind.lower()
    except Exception:
        pass
    vmem = 64 * 1024 * 1024 if "v7" in kind else 128 * 1024 * 1024
    try:
        vmem = int(pltpu.get_tpu_info().vmem_capacity_bytes)
    except Exception:
        pass
    return vmem, kind


def _use_bf16_exp(kind):
    # bf16 EUP only exists on v6e / v7x; v5e (and older) keep the exp in f32.
    return ("v6" in kind) or ("v7" in kind)


def _pick_tile(N, B):
    # 1024-wide tiles: the (tj, ti) f32 exp tile is 4 MiB -> fits every
    # generation (incl. v7x's 64 MiB VMEM) while amortizing the ~0.35us/step
    # pipeline overhead ~16x better than 256-wide tiles.
    n_padded = _round_up(N, 128)
    t = min(1024, n_padded)
    # keep >= 2 "parallel" grid steps so a 2-TC chip (v7x) / megacore is busy
    while t > 128 and B * (_round_up(N, t) // t) < 2:
        t //= 2
    return t, _round_up(N, t)


def _compiler_params(ti, tj, vmem_capacity):
    # Dominant live temporaries per step: the (tj, ti) f32 exp argument plus a
    # bf16 copy (~6 B/elem); the double-buffered block inputs/outputs are tiny.
    need = 32 * 1024 * 1024 + 8 * ti * tj
    limit = max(32 * 1024 * 1024, min(need, int(0.75 * vmem_capacity)))
    return pltpu.CompilerParams(
        dimension_semantics=("parallel", "parallel", "arbitrary"),
        vmem_limit_bytes=limit,
    )


def _tile_pair_needed(lo_ref, hi_ref, i, j, thr_int):
    """Scalar-unit lower bound (integer voxel units) on the squared spatial
    distance between the bounding boxes of i-tile and j-tile."""
    d2 = jnp.int32(0)
    for a in range(3):
        gap = jnp.maximum(
            jnp.int32(0),
            jnp.maximum(lo_ref[a, i] - hi_ref[a, j],
                        lo_ref[a, j] - hi_ref[a, i]))
        d2 = d2 + gap * gap
    return d2 <= thr_int


# ----------------------------------------------------------------------------
# Pallas kernels.
#
# Both kernels consume "augmented" feature maps:
#   fa[:, :, i] = [ f_i , -0.5*||f_i||^2 , 1 ]      (i / output side)
#   fb[:, :, j] = [ f_j , 1 , -0.5*||f_j||^2 ]      (j / reduction side)
# so a single f32 contraction over the channel axis yields the full exp arg
#   fb^T fa = f_i.f_j - 0.5||f_i||^2 - 0.5||f_j||^2 = -0.5*||f_i - f_j||^2 .
#
# grid = (B, N//t, N//t); the last axis (j tiles) is the reduction axis and
# the f32 output block stays resident across it (accumulate in place).  The
# two scalar-prefetched SMEM arrays hold per-tile integer spatial bounding
# boxes used to skip far-apart tile pairs (exp < ~2e-9).
# ----------------------------------------------------------------------------
def _make_norm_kernel(bf16_exp, thr_int):
    def kernel(lo_ref, hi_ref, fa_ref, fb_ref, o_ref):
        i = pl.program_id(1)
        j = pl.program_id(2)

        @pl.when(j == 0)                       # init OUTSIDE the skip guard
        def _():
            o_ref[...] = jnp.zeros_like(o_ref)

        @pl.when(_tile_pair_needed(lo_ref, hi_ref, i, j, thr_int))
        def _():
            arg = jax.lax.dot_general(
                fb_ref[...], fa_ref[...], (((0,), (0,)), ((), ())),
                preferred_element_type=jnp.float32)            # (tj, ti)
            if bf16_exp:
                k = jnp.exp(arg.astype(jnp.bfloat16))          # bf16 EUP (v6e/v7x)
            else:
                k = jnp.exp(arg).astype(jnp.bfloat16)          # f32 EUP (v5e)
            # Row-sum over j on the (otherwise idle) MXU instead of VPU/XLU.
            ones_row = jnp.ones((1, k.shape[0]), jnp.bfloat16)
            o_ref[...] += jax.lax.dot_general(
                ones_row, k, (((1,), (0,)), ((), ())),
                preferred_element_type=jnp.float32)            # (1, ti)

    return kernel


def _make_filter_kernel(bf16_exp, thr_int):
    def kernel(lo_ref, hi_ref, fa_ref, fb_ref, v_ref, o_ref):
        i = pl.program_id(1)
        j = pl.program_id(2)

        @pl.when(j == 0)                       # init OUTSIDE the skip guard
        def _():
            o_ref[...] = jnp.zeros_like(o_ref)

        @pl.when(_tile_pair_needed(lo_ref, hi_ref, i, j, thr_int))
        def _():
            arg = jax.lax.dot_general(
                fb_ref[...], fa_ref[...], (((0,), (0,)), ((), ())),
                preferred_element_type=jnp.float32)            # (tj, ti)
            if bf16_exp:
                k = jnp.exp(arg.astype(jnp.bfloat16))
            else:
                k = jnp.exp(arg).astype(jnp.bfloat16)
            # vals are streamed as bf16; f32 MXU accumulation.
            o_ref[...] += jax.lax.dot_general(
                v_ref[...], k, (((1,), (0,)), ((), ())),
                preferred_element_type=jnp.float32)            # (C, ti)

    return kernel


def gaussian_norm(lo, hi, fa, fb, *, tile, thr_int, bf16_exp, vmem_capacity):
    """fa, fb: (B, D2, Np) f32 -> (B, 1, Np) f32 row sums of the Gaussian kernel."""
    B, D2, Np = fa.shape
    n_t = Np // tile
    return pl.pallas_call(
        _make_norm_kernel(bf16_exp, thr_int),
        out_shape=jax.ShapeDtypeStruct((B, 1, Np), jnp.float32),
        grid_spec=pltpu.PrefetchScalarGridSpec(
            num_scalar_prefetch=2,
            grid=(B, n_t, n_t),
            in_specs=[
                pl.BlockSpec((None, D2, tile), lambda b, i, j, lo, hi: (b, 0, i)),
                pl.BlockSpec((None, D2, tile), lambda b, i, j, lo, hi: (b, 0, j)),
            ],
            out_specs=pl.BlockSpec((None, 1, tile),
                                   lambda b, i, j, lo, hi: (b, 0, i)),
        ),
        compiler_params=_compiler_params(tile, tile, vmem_capacity),
    )(lo, hi, fa, fb)


def gaussian_filter(lo, hi, fa, fb, vals, *, tile, thr_int, bf16_exp,
                    vmem_capacity):
    """fa, fb: (B, D2, Np) f32, vals: (B, C, Np) bf16 -> (B, C, Np) f32 filtered."""
    B, D2, Np = fa.shape
    C = vals.shape[1]
    n_t = Np // tile
    return pl.pallas_call(
        _make_filter_kernel(bf16_exp, thr_int),
        out_shape=jax.ShapeDtypeStruct((B, C, Np), jnp.float32),
        grid_spec=pltpu.PrefetchScalarGridSpec(
            num_scalar_prefetch=2,
            grid=(B, n_t, n_t),
            in_specs=[
                pl.BlockSpec((None, D2, tile), lambda b, i, j, lo, hi: (b, 0, i)),
                pl.BlockSpec((None, D2, tile), lambda b, i, j, lo, hi: (b, 0, j)),
                pl.BlockSpec((None, C, tile), lambda b, i, j, lo, hi: (b, 0, j)),
            ],
            out_specs=pl.BlockSpec((None, C, tile),
                                   lambda b, i, j, lo, hi: (b, 0, i)),
        ),
        compiler_params=_compiler_params(tile, tile, vmem_capacity),
    )(lo, hi, fa, fb, vals)


# ----------------------------------------------------------------------------
# CRFLoss.forward  (is_da=False, alpha > 0 path; gamma / w are unused there)
# ----------------------------------------------------------------------------
def crf_loss(I, U, alpha=5.0, beta=5.0, tile=None):
    """I: (B, n_feat, X, Y, Z) f32, U: (B, n_ch, X, Y, Z) f32 -> scalar f32."""
    assert alpha > 0, "only the alpha > 0 (bilateral) path is implemented"
    I = I.astype(jnp.float32)
    U = U.astype(jnp.float32)
    B, n_feat, X, Y, Z = I.shape
    n_ch = U.shape[1]
    N = X * Y * Z

    vmem_capacity, kind = _device_info()
    bf16_exp = _use_bf16_exp(kind)
    if tile is None:
        tile, Np = _pick_tile(N, B)
    else:
        tile = min(tile, _round_up(N, 128))
        Np = _round_up(N, tile)
    n_t = Np // tile

    # spatial coordinates (torch.meshgrid default == 'ij' indexing)
    sx, sy, sz = jnp.meshgrid(jnp.arange(X), jnp.arange(Y), jnp.arange(Z),
                              indexing="ij")
    coords_int = jnp.stack([sx, sy, sz], 0).reshape(3, N).astype(jnp.int32)
    coords = jnp.broadcast_to(coords_int.astype(jnp.float32)[None], (B, 3, N))

    # channel-first bilateral features, voxels on the lane axis: (B, D, N)
    feat = jnp.concatenate(
        [coords / alpha, (I / beta).reshape(B, n_feat, N)], axis=1)

    # pad the voxel axis to a tile multiple; pads contribute exactly zero
    feat_p = _pad_last(feat, Np)                                   # zeros at pads
    sq_p = jnp.sum(feat_p * feat_p, axis=1, keepdims=True)         # (B, 1, Np)
    valid = _pad_last(jnp.ones((B, 1, N), jnp.float32), Np)        # 1 real / 0 pad

    # augmentation channels (D -> D + 2) so one MXU pass gives the exp argument;
    # padded j columns are poisoned to arg = -1e9 so exp(arg) == 0 exactly.
    fa = jnp.concatenate([feat_p, -0.5 * sq_p, jnp.ones_like(valid)], axis=1)
    fb = jnp.concatenate([feat_p, valid,
                          jnp.where(valid > 0, -0.5 * sq_p, -1e9)], axis=1)

    # per-tile integer spatial bounding boxes for block skipping (SMEM prefetch);
    # pads repeat the last real coordinate so they never widen a box.
    if Np > N:
        coords_pad = jnp.concatenate(
            [coords_int, jnp.broadcast_to(coords_int[:, -1:], (3, Np - N))],
            axis=1)
    else:
        coords_pad = coords_int
    ctile = coords_pad.reshape(3, n_t, tile)
    lo = jnp.min(ctile, axis=2)                                    # (3, n_t) int32
    hi = jnp.max(ctile, axis=2)                                    # (3, n_t) int32
    # spatial distance is a lower bound of the full bilateral metric; compare
    # in integer voxel units: skip if d2_vox > threshold * alpha^2.
    thr_int = int(np.ceil(_SKIP_D2_THRESHOLD * float(alpha) * float(alpha)))

    H1 = jax.nn.softmax(U.reshape(B, n_ch, N), axis=1)             # (B, C, N)

    # spatial_norm = pl(feat, ones) computed as the kernel row sums (no ones
    # array is streamed); norm = 1/sqrt(spatial_norm + 1e-20)
    norm_raw = gaussian_norm(lo, hi, fa, fb, tile=tile, thr_int=thr_int,
                             bf16_exp=bf16_exp, vmem_capacity=vmem_capacity)
    norm = 1.0 / jnp.sqrt(norm_raw[:, :, :N] + 1e-20)              # (B, 1, N)

    # Q = pl(feat, H1 * norm); Q1 = Q * norm.  Values streamed as bf16.
    vals = _pad_last(H1 * norm, Np).astype(jnp.bfloat16)           # (B, C, Np)
    Q = gaussian_filter(lo, hi, fa, fb, vals, tile=tile, thr_int=thr_int,
                        bf16_exp=bf16_exp, vmem_capacity=vmem_capacity)
    Q1 = Q[:, :, :N] * norm                                        # (B, C, N)

    # loss = trace(Q1^T @ (1 - softmax(U))) == Frobenius inner product
    return jnp.sum(Q1 * (1.0 - H1))


# ----------------------------------------------------------------------------
# Pure-JAX reference (dense, un-tiled) for a sanity check.
# ----------------------------------------------------------------------------
def crf_loss_ref(I, U, alpha=5.0, beta=5.0):
    I = I.astype(jnp.float32)
    U = U.astype(jnp.float32)
    B, n_feat, X, Y, Z = I.shape
    n_ch = U.shape[1]
    N = X * Y * Z
    sx, sy, sz = jnp.meshgrid(jnp.arange(X), jnp.arange(Y), jnp.arange(Z),
                              indexing="ij")
    coords = jnp.stack([sx, sy, sz], 0).astype(jnp.float32)
    coords = jnp.broadcast_to(coords[None], (B, 3, X, Y, Z))
    feat = jnp.concatenate([coords / alpha, I / beta], 1).reshape(B, 3 + n_feat, N)
    sq = jnp.sum(feat * feat, axis=1)                              # (B, N)
    d2 = (sq[:, :, None] + sq[:, None, :]
          - 2.0 * jnp.einsum("bdi,bdj->bij", feat, feat))
    K = jnp.exp(-0.5 * d2)                                         # (B, N, N)
    H1 = jax.nn.softmax(U.reshape(B, n_ch, N), axis=1)             # (B, C, N)
    norm = 1.0 / jnp.sqrt(jnp.sum(K, axis=2)[:, None, :] + 1e-20)  # (B, 1, N)
    Q1 = jnp.einsum("bij,bcj->bci", K, H1 * norm) * norm
    return jnp.sum(Q1 * (1.0 - H1))


if __name__ == "__main__":
    key = jax.random.PRNGKey(0)
    k1, k2 = jax.random.split(key)

    B, n_feat, n_ch = 2, 4, 3
    X = Y = Z = 8                                  # N = 512 voxels
    I = jax.random.normal(k1, (B, n_feat, X, Y, Z), jnp.float32)
    U = jax.random.normal(k2, (B, n_ch, X, Y, Z), jnp.float32)

    loss = jax.jit(crf_loss)(I, U)
    loss = jax.block_until_ready(loss)

    ref = jax.block_until_ready(crf_loss_ref(I, U))
    np.testing.assert_allclose(np.asarray(loss), np.asarray(ref),
                               rtol=5e-2, atol=5e-2)

    print("KERNEL_OK")
</pallas_src>

<mosaic_0001>
module attributes {stable_mosaic.version = 11 : i64} {
  func.func @kernel(%arg0: i32, %arg1: i32, %arg2: i32, %arg3: memref<3x1xi32, #tpu.memory_space<smem>>, %arg4: memref<3x1xi32, #tpu.memory_space<smem>>, %arg5: memref<1x9x512xf32, #tpu.memory_space<vmem>>, %arg6: memref<1x9x512xf32, #tpu.memory_space<vmem>>, %arg7: memref<1x1x512xf32, #tpu.memory_space<vmem>>) attributes {dimension_semantics = [#tpu.dimension_semantics<parallel>, #tpu.dimension_semantics<parallel>, #tpu.dimension_semantics<arbitrary>], iteration_bounds = array<i64: 2, 1, 1>, scalar_prefetch = 2 : i64, scratch_operands = 0 : i64, tpu.core_type = #tpu.core_type<tc>, window_params = [{transform_indices = @transform_0, window_bounds = array<i64: 1, 9, 512>}, {transform_indices = @transform_1, window_bounds = array<i64: 1, 9, 512>}, {transform_indices = @transform_2, window_bounds = array<i64: 1, 1, 512>}]} {
    %c0_i32 = arith.constant 0 : i32
    %0 = arith.cmpi eq, %arg2, %c0_i32 : i32
    %1 = arith.extui %0 : i1 to i32
    %c0_i32_0 = arith.constant 0 : i32
    %2 = arith.cmpi ne, %1, %c0_i32_0 : i32
    scf.if %2 {
      %cst = arith.constant 0.000000e+00 : f32
      %48 = vector.broadcast %cst : f32 to vector<1x512xf32>
      %c0_15 = arith.constant 0 : index
      %c0_16 = arith.constant 0 : index
      %c0_17 = arith.constant 0 : index
      %49 = vector.load %arg7[%c0_15, %c0_16, %c0_17] : memref<1x1x512xf32, #tpu.memory_space<vmem>>, vector<1x1x512xf32>
      %50 = vector.shape_cast %49 : vector<1x1x512xf32> to vector<1x512xf32>
      %51 = vector.shape_cast %48 : vector<1x512xf32> to vector<1x1x512xf32>
      tpu.vector_store %arg7[%c0_15, %c0_16, %c0_17], %51 {strides = array<i32>} : memref<1x1x512xf32, #tpu.memory_space<vmem>>, vector<1x1x512xf32>,
    } else {
    }
    %c0 = arith.constant 0 : index
    %3 = arith.index_cast %arg1 : i32 to index
    %4 = memref.load %arg3[%c0, %3] : memref<3x1xi32, #tpu.memory_space<smem>>
    %c0_1 = arith.constant 0 : index
    %5 = arith.index_cast %arg2 : i32 to index
    %6 = memref.load %arg4[%c0_1, %5] : memref<3x1xi32, #tpu.memory_space<smem>>
    %7 = arith.subi %4, %6 : i32
    %c0_2 = arith.constant 0 : index
    %8 = arith.index_cast %arg2 : i32 to index
    %9 = memref.load %arg3[%c0_2, %8] : memref<3x1xi32, #tpu.memory_space<smem>>
    %c0_3 = arith.constant 0 : index
    %10 = arith.index_cast %arg1 : i32 to index
    %11 = memref.load %arg4[%c0_3, %10] : memref<3x1xi32, #tpu.memory_space<smem>>
    %12 = arith.subi %9, %11 : i32
    %13 = arith.maxsi %7, %12 : i32
    %c0_i32_4 = arith.constant 0 : i32
    %14 = arith.maxsi %c0_i32_4, %13 : i32
    %15 = arith.muli %14, %14 : i32
    %c0_i32_5 = arith.constant 0 : i32
    %16 = arith.addi %c0_i32_5, %15 : i32
    %c1 = arith.constant 1 : index
    %17 = arith.index_cast %arg1 : i32 to index
    %18 = memref.load %arg3[%c1, %17] : memref<3x1xi32, #tpu.memory_space<smem>>
    %c1_6 = arith.constant 1 : index
    %19 = arith.index_cast %arg2 : i32 to index
    %20 = memref.load %arg4[%c1_6, %19] : memref<3x1xi32, #tpu.memory_space<smem>>
    %21 = arith.subi %18, %20 : i32
    %c1_7 = arith.constant 1 : index
    %22 = arith.index_cast %arg2 : i32 to index
    %23 = memref.load %arg3[%c1_7, %22] : memref<3x1xi32, #tpu.memory_space<smem>>
    %c1_8 = arith.constant 1 : index
    %24 = arith.index_cast %arg1 : i32 to index
    %25 = memref.load %arg4[%c1_8, %24] : memref<3x1xi32, #tpu.memory_space<smem>>
    %26 = arith.subi %23, %25 : i32
    %27 = arith.maxsi %21, %26 : i32
    %c0_i32_9 = arith.constant 0 : i32
    %28 = arith.maxsi %c0_i32_9, %27 : i32
    %29 = arith.muli %28, %28 : i32
    %30 = arith.addi %16, %29 : i32
    %c2 = arith.constant 2 : index
    %31 = arith.index_cast %arg1 : i32 to index
    %32 = memref.load %arg3[%c2, %31] : memref<3x1xi32, #tpu.memory_space<smem>>
    %c2_10 = arith.constant 2 : index
    %33 = arith.index_cast %arg2 : i32 to index
    %34 = memref.load %arg4[%c2_10, %33] : memref<3x1xi32, #tpu.memory_space<smem>>
    %35 = arith.subi %32, %34 : i32
    %c2_11 = arith.constant 2 : index
    %36 = arith.index_cast %arg2 : i32 to index
    %37 = memref.load %arg3[%c2_11, %36] : memref<3x1xi32, #tpu.memory_space<smem>>
    %c2_12 = arith.constant 2 : index
    %38 = arith.index_cast %arg1 : i32 to index
    %39 = memref.load %arg4[%c2_12, %38] : memref<3x1xi32, #tpu.memory_space<smem>>
    %40 = arith.subi %37, %39 : i32
    %41 = arith.maxsi %35, %40 : i32
    %c0_i32_13 = arith.constant 0 : i32
    %42 = arith.maxsi %c0_i32_13, %41 : i32
    %43 = arith.muli %42, %42 : i32
    %44 = arith.addi %30, %43 : i32
    %c1000_i32 = arith.constant 1000 : i32
    %45 = arith.cmpi sle, %44, %c1000_i32 : i32
    %46 = arith.extui %45 : i1 to i32
    %c0_i32_14 = arith.constant 0 : i32
    %47 = arith.cmpi ne, %46, %c0_i32_14 : i32
    scf.if %47 {
      %c0_15 = arith.constant 0 : index
      %c0_16 = arith.constant 0 : index
      %c0_17 = arith.constant 0 : index
      %48 = vector.load %arg6[%c0_15, %c0_16, %c0_17] : memref<1x9x512xf32, #tpu.memory_space<vmem>>, vector<1x9x512xf32>
      %49 = vector.shape_cast %48 : vector<1x9x512xf32> to vector<9x512xf32>
      %c0_18 = arith.constant 0 : index
      %c0_19 = arith.constant 0 : index
      %c0_20 = arith.constant 0 : index
      %50 = vector.load %arg5[%c0_18, %c0_19, %c0_20] : memref<1x9x512xf32, #tpu.memory_space<vmem>>, vector<1x9x512xf32>
      %51 = vector.shape_cast %50 : vector<1x9x512xf32> to vector<9x512xf32>
      %cst = arith.constant dense<0.000000e+00> : vector<512x512xf32>
      %52 = tpu.matmul %49, %51, %cst {dimension_numbers = #tpu.dot_dimension_numbers<[0], [0], [1], [1], [0, 1, 1, 1], [], []>} : vector<9x512xf32>, vector<9x512xf32>, vector<512x512xf32> -> vector<512x512xf32>
      %53 = math.exp %52 : vector<512x512xf32>
      %54 = arith.truncf %53 : vector<512x512xf32> to vector<512x512xbf16>
      %cst_21 = arith.constant 1.000000e+00 : bf16
      %55 = vector.broadcast %cst_21 : bf16 to vector<1x512xbf16>
      %c0_22 = arith.constant 0 : index
      %c0_23 = arith.constant 0 : index
      %c0_24 = arith.constant 0 : index
      %56 = vector.load %arg7[%c0_22, %c0_23, %c0_24] : memref<1x1x512xf32, #tpu.memory_space<vmem>>, vector<1x1x512xf32>
      %57 = vector.shape_cast %56 : vector<1x1x512xf32> to vector<1x512xf32>
      %cst_25 = arith.constant dense<0.000000e+00> : vector<1x512xf32>
      %58 = tpu.matmul %55, %54, %cst_25 {dimension_numbers = #tpu.dot_dimension_numbers<[1], [0], [0], [1], [0, 0, 1, 1], [], []>} : vector<1x512xbf16>, vector<512x512xbf16>, vector<1x512xf32> -> vector<1x512xf32>
      %59 = arith.addf %57, %58 : vector<1x512xf32>
      %c0_26 = arith.constant 0 : index
      %c0_27 = arith.constant 0 : index
      %c0_28 = arith.constant 0 : index
      %60 = vector.load %arg7[%c0_26, %c0_27, %c0_28] : memref<1x1x512xf32, #tpu.memory_space<vmem>>, vector<1x1x512xf32>
      %61 = vector.shape_cast %60 : vector<1x1x512xf32> to vector<1x512xf32>
      %62 = vector.shape_cast %59 : vector<1x512xf32> to vector<1x1x512xf32>
      tpu.vector_store %arg7[%c0_26, %c0_27, %c0_28], %62 {strides = array<i32>} : memref<1x1x512xf32, #tpu.memory_space<vmem>>, vector<1x1x512xf32>,
    } else {
    }
    return
  }
  func.func @transform_0(%arg0: i32, %arg1: i32, %arg2: i32, %arg3: memref<3x1xi32, #tpu.memory_space<smem>>, %arg4: memref<3x1xi32, #tpu.memory_space<smem>>) -> (i32, i32, i32) {
    %c0_i32 = arith.constant 0 : i32
    %c0_i32_0 = arith.constant 0 : i32
    return %arg0, %c0_i32, %arg1 : i32, i32, i32
  }
  func.func @transform_1(%arg0: i32, %arg1: i32, %arg2: i32, %arg3: memref<3x1xi32, #tpu.memory_space<smem>>, %arg4: memref<3x1xi32, #tpu.memory_space<smem>>) -> (i32, i32, i32) {
    %c0_i32 = arith.constant 0 : i32
    %c0_i32_0 = arith.constant 0 : i32
    return %arg0, %c0_i32, %arg2 : i32, i32, i32
  }
  func.func @transform_2(%arg0: i32, %arg1: i32, %arg2: i32, %arg3: memref<3x1xi32, #tpu.memory_space<smem>>, %arg4: memref<3x1xi32, #tpu.memory_space<smem>>) -> (i32, i32, i32) {
    %c0_i32 = arith.constant 0 : i32
    %c0_i32_0 = arith.constant 0 : i32
    return %arg0, %c0_i32, %arg1 : i32, i32, i32
  }
}

module attributes {stable_mosaic.version = 11 : i64} {
  func.func @kernel(%arg0: i32, %arg1: i32, %arg2: i32, %arg3: memref<3x1xi32, #tpu.memory_space<smem>>, %arg4: memref<3x1xi32, #tpu.memory_space<smem>>, %arg5: memref<1x9x512xf32, #tpu.memory_space<vmem>>, %arg6: memref<1x9x512xf32, #tpu.memory_space<vmem>>, %arg7: memref<1x3x512xbf16, #tpu.memory_space<vmem>>, %arg8: memref<1x3x512xf32, #tpu.memory_space<vmem>>) attributes {dimension_semantics = [#tpu.dimension_semantics<parallel>, #tpu.dimension_semantics<parallel>, #tpu.dimension_semantics<arbitrary>], iteration_bounds = array<i64: 2, 1, 1>, scalar_prefetch = 2 : i64, scratch_operands = 0 : i64, tpu.core_type = #tpu.core_type<tc>, window_params = [{transform_indices = @transform_0, window_bounds = array<i64: 1, 9, 512>}, {transform_indices = @transform_1, window_bounds = array<i64: 1, 9, 512>}, {transform_indices = @transform_2, window_bounds = array<i64: 1, 3, 512>}, {transform_indices = @transform_3, window_bounds = array<i64: 1, 3, 512>}]} {
    %c0_i32 = arith.constant 0 : i32
    %0 = arith.cmpi eq, %arg2, %c0_i32 : i32
    %1 = arith.extui %0 : i1 to i32
    %c0_i32_0 = arith.constant 0 : i32
    %2 = arith.cmpi ne, %1, %c0_i32_0 : i32
    scf.if %2 {
      %cst = arith.constant 0.000000e+00 : f32
      %48 = vector.broadcast %cst : f32 to vector<3x512xf32>
      %c0_15 = arith.constant 0 : index
      %c0_16 = arith.constant 0 : index
      %c0_17 = arith.constant 0 : index
      %49 = vector.load %arg8[%c0_15, %c0_16, %c0_17] : memref<1x3x512xf32, #tpu.memory_space<vmem>>, vector<1x3x512xf32>
      %50 = vector.shape_cast %49 : vector<1x3x512xf32> to vector<3x512xf32>
      %51 = vector.shape_cast %48 : vector<3x512xf32> to vector<1x3x512xf32>
      tpu.vector_store %arg8[%c0_15, %c0_16, %c0_17], %51 {strides = array<i32>} : memref<1x3x512xf32, #tpu.memory_space<vmem>>, vector<1x3x512xf32>,
    } else {
    }
    %c0 = arith.constant 0 : index
    %3 = arith.index_cast %arg1 : i32 to index
    %4 = memref.load %arg3[%c0, %3] : memref<3x1xi32, #tpu.memory_space<smem>>
    %c0_1 = arith.constant 0 : index
    %5 = arith.index_cast %arg2 : i32 to index
    %6 = memref.load %arg4[%c0_1, %5] : memref<3x1xi32, #tpu.memory_space<smem>>
    %7 = arith.subi %4, %6 : i32
    %c0_2 = arith.constant 0 : index
    %8 = arith.index_cast %arg2 : i32 to index
    %9 = memref.load %arg3[%c0_2, %8] : memref<3x1xi32, #tpu.memory_space<smem>>
    %c0_3 = arith.constant 0 : index
    %10 = arith.index_cast %arg1 : i32 to index
    %11 = memref.load %arg4[%c0_3, %10] : memref<3x1xi32, #tpu.memory_space<smem>>
    %12 = arith.subi %9, %11 : i32
    %13 = arith.maxsi %7, %12 : i32
    %c0_i32_4 = arith.constant 0 : i32
    %14 = arith.maxsi %c0_i32_4, %13 : i32
    %15 = arith.muli %14, %14 : i32
    %c0_i32_5 = arith.constant 0 : i32
    %16 = arith.addi %c0_i32_5, %15 : i32
    %c1 = arith.constant 1 : index
    %17 = arith.index_cast %arg1 : i32 to index
    %18 = memref.load %arg3[%c1, %17] : memref<3x1xi32, #tpu.memory_space<smem>>
    %c1_6 = arith.constant 1 : index
    %19 = arith.index_cast %arg2 : i32 to index
    %20 = memref.load %arg4[%c1_6, %19] : memref<3x1xi32, #tpu.memory_space<smem>>
    %21 = arith.subi %18, %20 : i32
    %c1_7 = arith.constant 1 : index
    %22 = arith.index_cast %arg2 : i32 to index
    %23 = memref.load %arg3[%c1_7, %22] : memref<3x1xi32, #tpu.memory_space<smem>>
    %c1_8 = arith.constant 1 : index
    %24 = arith.index_cast %arg1 : i32 to index
    %25 = memref.load %arg4[%c1_8, %24] : memref<3x1xi32, #tpu.memory_space<smem>>
    %26 = arith.subi %23, %25 : i32
    %27 = arith.maxsi %21, %26 : i32
    %c0_i32_9 = arith.constant 0 : i32
    %28 = arith.maxsi %c0_i32_9, %27 : i32
    %29 = arith.muli %28, %28 : i32
    %30 = arith.addi %16, %29 : i32
    %c2 = arith.constant 2 : index
    %31 = arith.index_cast %arg1 : i32 to index
    %32 = memref.load %arg3[%c2, %31] : memref<3x1xi32, #tpu.memory_space<smem>>
    %c2_10 = arith.constant 2 : index
    %33 = arith.index_cast %arg2 : i32 to index
    %34 = memref.load %arg4[%c2_10, %33] : memref<3x1xi32, #tpu.memory_space<smem>>
    %35 = arith.subi %32, %34 : i32
    %c2_11 = arith.constant 2 : index
    %36 = arith.index_cast %arg2 : i32 to index
    %37 = memref.load %arg3[%c2_11, %36] : memref<3x1xi32, #tpu.memory_space<smem>>
    %c2_12 = arith.constant 2 : index
    %38 = arith.index_cast %arg1 : i32 to index
    %39 = memref.load %arg4[%c2_12, %38] : memref<3x1xi32, #tpu.memory_space<smem>>
    %40 = arith.subi %37, %39 : i32
    %41 = arith.maxsi %35, %40 : i32
    %c0_i32_13 = arith.constant 0 : i32
    %42 = arith.maxsi %c0_i32_13, %41 : i32
    %43 = arith.muli %42, %42 : i32
    %44 = arith.addi %30, %43 : i32
    %c1000_i32 = arith.constant 1000 : i32
    %45 = arith.cmpi sle, %44, %c1000_i32 : i32
    %46 = arith.extui %45 : i1 to i32
    %c0_i32_14 = arith.constant 0 : i32
    %47 = arith.cmpi ne, %46, %c0_i32_14 : i32
    scf.if %47 {
      %c0_15 = arith.constant 0 : index
      %c0_16 = arith.constant 0 : index
      %c0_17 = arith.constant 0 : index
      %48 = vector.load %arg6[%c0_15, %c0_16, %c0_17] : memref<1x9x512xf32, #tpu.memory_space<vmem>>, vector<1x9x512xf32>
      %49 = vector.shape_cast %48 : vector<1x9x512xf32> to vector<9x512xf32>
      %c0_18 = arith.constant 0 : index
      %c0_19 = arith.constant 0 : index
      %c0_20 = arith.constant 0 : index
      %50 = vector.load %arg5[%c0_18, %c0_19, %c0_20] : memref<1x9x512xf32, #tpu.memory_space<vmem>>, vector<1x9x512xf32>
      %51 = vector.shape_cast %50 : vector<1x9x512xf32> to vector<9x512xf32>
      %cst = arith.constant dense<0.000000e+00> : vector<512x512xf32>
      %52 = tpu.matmul %49, %51, %cst {dimension_numbers = #tpu.dot_dimension_numbers<[0], [0], [1], [1], [0, 1, 1, 1], [], []>} : vector<9x512xf32>, vector<9x512xf32>, vector<512x512xf32> -> vector<512x512xf32>
      %53 = math.exp %52 : vector<512x512xf32>
      %54 = arith.truncf %53 : vector<512x512xf32> to vector<512x512xbf16>
      %c0_21 = arith.constant 0 : index
      %c0_22 = arith.constant 0 : index
      %c0_23 = arith.constant 0 : index
      %55 = vector.load %arg8[%c0_21, %c0_22, %c0_23] : memref<1x3x512xf32, #tpu.memory_space<vmem>>, vector<1x3x512xf32>
      %56 = vector.shape_cast %55 : vector<1x3x512xf32> to vector<3x512xf32>
      %c0_24 = arith.constant 0 : index
      %c0_25 = arith.constant 0 : index
      %c0_26 = arith.constant 0 : index
      %57 = vector.load %arg7[%c0_24, %c0_25, %c0_26] : memref<1x3x512xbf16, #tpu.memory_space<vmem>>, vector<1x3x512xbf16>
      %58 = vector.shape_cast %57 : vector<1x3x512xbf16> to vector<3x512xbf16>
      %cst_27 = arith.constant dense<0.000000e+00> : vector<3x512xf32>
      %59 = tpu.matmul %58, %54, %cst_27 {dimension_numbers = #tpu.dot_dimension_numbers<[1], [0], [0], [1], [0, 0, 1, 1], [], []>} : vector<3x512xbf16>, vector<512x512xbf16>, vector<3x512xf32> -> vector<3x512xf32>
      %60 = arith.addf %56, %59 : vector<3x512xf32>
      %c0_28 = arith.constant 0 : index
      %c0_29 = arith.constant 0 : index
      %c0_30 = arith.constant 0 : index
      %61 = vector.load %arg8[%c0_28, %c0_29, %c0_30] : memref<1x3x512xf32, #tpu.memory_space<vmem>>, vector<1x3x512xf32>
      %62 = vector.shape_cast %61 : vector<1x3x512xf32> to vector<3x512xf32>
      %63 = vector.shape_cast %60 : vector<3x512xf32> to vector<1x3x512xf32>
      tpu.vector_store %arg8[%c0_28, %c0_29, %c0_30], %63 {strides = array<i32>} : memref<1x3x512xf32, #tpu.memory_space<vmem>>, vector<1x3x512xf32>,
    } else {
    }
    return
  }
  func.func @transform_0(%arg0: i32, %arg1: i32, %arg2: i32, %arg3: memref<3x1xi32, #tpu.memory_space<smem>>, %arg4: memref<3x1xi32, #tpu.memory_space<smem>>) -> (i32, i32, i32) {
    %c0_i32 = arith.constant 0 : i32
    %c0_i32_0 = arith.constant 0 : i32
    return %arg0, %c0_i32, %arg1 : i32, i32, i32
  }
  func.func @transform_1(%arg0: i32, %arg1: i32, %arg2: i32, %arg3: memref<3x1xi32, #tpu.memory_space<smem>>, %arg4: memref<3x1xi32, #tpu.memory_space<smem>>) -> (i32, i32, i32) {
    %c0_i32 = arith.constant 0 : i32
    %c0_i32_0 = arith.constant 0 : i32
    return %arg0, %c0_i32, %arg2 : i32, i32, i32
  }
  func.func @transform_2(%arg0: i32, %arg1: i32, %arg2: i32, %arg3: memref<3x1xi32, #tpu.memory_space<smem>>, %arg4: memref<3x1xi32, #tpu.memory_space<smem>>) -> (i32, i32, i32) {
    %c0_i32 = arith.constant 0 : i32
    %c0_i32_0 = arith.constant 0 : i32
    return %arg0, %c0_i32, %arg2 : i32, i32, i32
  }
  func.func @transform_3(%arg0: i32, %arg1: i32, %arg2: i32, %arg3: memref<3x1xi32, #tpu.memory_space<smem>>, %arg4: memref<3x1xi32, #tpu.memory_space<smem>>) -> (i32, i32, i32) {
    %c0_i32 = arith.constant 0 : i32
    %c0_i32_0 = arith.constant 0 : i32
    return %arg0, %c0_i32, %arg1 : i32, i32, i32
  }
}

</mosaic_0001>

<bundles_post_ra>
// kernel: sub.8
= control target key start
LH: loop header
LB: loop body
LE: loop exit
PB: predicated region body
PF: predicated region fallthrough
CT: control target
= control target key end

     0   :  { %s23_s8 = smov 6  ;;  %vm25_vm0 = vcmask 1042433   ;;  %s28_s9 = smov 24  ;;  %vm30_vm1 = vcmask 1044483   ;;  %vm35_vm2 = vcmask 1046533   ;;  %vm39_vm3 = vcmask 1047559   ;;  %s937_s0 = inlined_call_operand.vmem [shape: f32[2,8,8,8], index: 0, kind: input, shape index: {}]   ;;  %s938_s1 = inlined_call_operand.vmem [shape: f32[2,512], index: 1, kind: output, shape index: {}]  }
   0x1   :  { %v510_v0 = vld [vmem:[%s937_s0 + $0xf] sm:$0x1]   ;;  %s33_s14 = smov 96  ;;  %v514_v5 = vld [vmem:[%s937_s0 + $0x78] sm:$0x80]   ;;  %s85_s21 = smov 6 }
   0x2   :  { %v511_v1 = vld [vmem:[%s937_s0 + $0x7f] ss:$-48 sm:%s23_s8]   ;;  %v520_v7 = vld [vmem:[%s937_s0 + $0xd] sm:$0x1]   ;;  %s90_s22 = smov 24  ;;  %s95_s29 = smov 96 }
   0x3   :  { %v512_v2 = vld [vmem:[%s937_s0 + $0xef] ss:$-48 sm:%s28_s9]   ;;  %v26_v3 = vsel %vm25_vm0, %v511_v1, %v510_v0  ;;  %v524_v8 = vld [vmem:[%s937_s0 + $0x76] sm:$0x80]   ;;  %v515_v15 = vld [vmem:[%s937_s0 + $0xe] sm:$0x1]  }
   0x4   :  { %v513_v4 = vld [vmem:[%s937_s0 + $0x15f] ss:$-48 sm:%s33_s14]   ;;  %v31_v6 = vsel %vm30_vm1, %v512_v2, %v26_v3  ;;  %v521_v10 = vld [vmem:[%s937_s0 + $0x7d] ss:$-48 sm:%s85_s21]   ;;  %s54_s5 = smov 6  ;;  %s59_s6 = smov 24 }
   0x5   :  { %v36_v9 = vsel %vm35_vm2, %v513_v4, %v31_v6  ;;  %v522_v11 = vld [vmem:[%s937_s0 + $0xed] ss:$-48 sm:%s90_s22]   ;;  %v88_v13 = vsel %vm25_vm0, %v521_v10, %v520_v7  ;;  %s603_s7 = smov 120   ;;  %v516_v17 = vld [vmem:[%s937_s0 + $0x7e] ss:$-48 sm:%s54_s5]   ;;  %s64_s10 = smov 96 }
   0x6   :  { %v40_v12 = vsel %vm39_vm3, %v514_v5, %v36_v9  ;;  %v523_v14 = vld [vmem:[%s937_s0 + $0x15d] ss:$-48 sm:%s95_s29]   ;;  %v93_v16 = vsel %vm30_vm1, %v522_v11, %v88_v13  ;;  %v519_v18 = vld [vmem:[%s937_s0 + $0x77] sm:$0x80]   ;;  %v57_v20 = vsel %vm25_vm0, %v516_v17, %v515_v15  ;;  %s116_s17 = smov 6  ;;  %s121_s18 = smov 24 }
   0x7   :  { %41 = vrot.lane.b32.xlu0 %v40_v12, %s603_s7  ;;  %v98_v19 = vsel %vm35_vm2, %v523_v14, %v93_v16  ;;  %v517_v21 = vld [vmem:[%s937_s0 + $0xee] ss:$-48 sm:%s59_s6]   ;;  %v525_v25 = vld [vmem:[%s937_s0 + $0xc] sm:$0x1]   ;;  %s126_s23 = smov 96  ;;  %s604_s24 = smov 104  }
   0x8   :  { %v518_v22 = vld [vmem:[%s937_s0 + $0x15e] ss:$-48 sm:%s64_s10]   ;;  %v102_v23 = vsel %vm39_vm3, %v524_v8, %v98_v19  ;;  %v62_v24 = vsel %vm30_vm1, %v517_v21, %v57_v20  ;;  %v526_v26 = vld [vmem:[%s937_s0 + $0x7c] ss:$-48 sm:%s116_s17]   ;;  %s147_s29 = smov 6  ;;  %s152_s30 = smov 24 }
   0x9   :  { %103 = vrot.lane.b32.xlu1 %v102_v23, %s604_s24  ;;  %v67_v27 = vsel %vm35_vm2, %v518_v22, %v62_v24  ;;  %v119_v28 = vsel %vm25_vm0, %v526_v26, %v525_v25  ;;  %v527_v29 = vld [vmem:[%s937_s0 + $0xec] ss:$-48 sm:%s121_s18]   ;;  %v530_v34 = vld [vmem:[%s937_s0 + $0xb] sm:$0x1]   ;;  %s157_s6 = smov 96  ;;  %s605_s7 = smov 112  }
   0xa   :  { %v529_v30 = vld [vmem:[%s937_s0 + $0x75] sm:$0x80]   ;;  %v71_v31 = vsel %vm39_vm3, %v519_v18, %v67_v27  ;;  %v124_v32 = vsel %vm30_vm1, %v527_v29, %v119_v28  ;;  %v531_v36 = vld [vmem:[%s937_s0 + $0x7b] ss:$-48 sm:%s147_s29]   ;;  %s178_s12 = smov 6  ;;  %s183_s13 = smov 24 }
   0xb   :  { %v528_v33 = vld [vmem:[%s937_s0 + $0x15c] ss:$-48 sm:%s126_s23]   ;;  %72 = vrot.lane.b32.xlu0 %v71_v31, %s605_s7  ;;  %v534_v37 = vld [vmem:[%s937_s0 + $0x74] sm:$0x80]   ;;  %v150_v39 = vsel %vm25_vm0, %v531_v36, %v530_v34  ;;  %s188_s18 = smov 96  ;;  %s606_s19 = smov 96  }
   0xc   :  { %v129_v35 = vsel %vm35_vm2, %v528_v33, %v124_v32  ;;  %v532_v40 = vld [vmem:[%s937_s0 + $0xeb] ss:$-48 sm:%s152_s30]   ;;  %v535_v43 = vld [vmem:[%s937_s0 + $0xa] sm:$0x1]   ;;  %s209_s24 = smov 6  ;;  %s214_s25 = smov 24 }
   0xd   :  { %v133_v38 = vsel %vm39_vm3, %v529_v30, %v129_v35  ;;  %v533_v41 = vld [vmem:[%s937_s0 + $0x15b] ss:$-48 sm:%s157_s6]   ;;  %v155_v42 = vsel %vm30_vm1, %v532_v40, %v150_v39  ;;  %v536_v44 = vld [vmem:[%s937_s0 + $0x7a] ss:$-48 sm:%s178_s12]   ;;  %s219_s30 = smov 96  ;;  %s607_s8 = smov 88  }
   0xe   :  { %134 = vrot.lane.b32.xlu1 %v133_v38, %s606_s19  ;;  %v160_v45 = vsel %vm35_vm2, %v533_v41, %v155_v42  ;;  %v181_v46 = vsel %vm25_vm0, %v536_v44, %v535_v43  ;;  %v537_v47 = vld [vmem:[%s937_s0 + $0xea] ss:$-48 sm:%s183_s13]   ;;  %v540_v52 = vld [vmem:[%s937_s0 + $0x9] sm:$0x1]   ;;  %s240_s13 = smov 6  ;;  %s245_s14 = smov 24 }
   0xf   :  { %v538_v48 = vld [vmem:[%s937_s0 + $0x15a] ss:$-48 sm:%s188_s18]   ;;  %v164_v49 = vsel %vm39_vm3, %v534_v37, %v160_v45  ;;  %v186_v50 = vsel %vm30_vm1, %v537_v47, %v181_v46  ;;  %v541_v53 = vld [vmem:[%s937_s0 + $0x79] ss:$-48 sm:%s209_s24]   ;;  %s250_s19 = smov 96  ;;  %s608_s20 = smov 80  }
  0x10   :  { %v539_v51 = vld [vmem:[%s937_s0 + $0x73] sm:$0x80]   ;;  %165 = vrot.lane.b32.xlu0 %v164_v49, %s607_s8  ;;  %v191_v54 = vsel %vm35_vm2, %v538_v48, %v186_v50  ;;  %v212_v55 = vsel %vm25_vm0, %v541_v53, %v540_v52  ;;  %v542_v56 = vld [vmem:[%s937_s0 + $0xe9] ss:$-48 sm:%s214_s25]   ;;  %s271_s25 = smov 6  ;;  %s276_s26 = smov 24 }
  0x11   :  { %v544_v57 = vld [vmem:[%s937_s0 + $0x72] sm:$0x80]   ;;  %v195_v58 = vsel %vm39_vm3, %v539_v51, %v191_v54  ;;  %v217_v59 = vsel %vm30_vm1, %v542_v56, %v212_v55  ;;  %v545_v61 = vld [vmem:[%s937_s0 + $0x8] sm:$0x1]   ;;  %v549_v0 = vld [vmem:[%s937_s0 + $0x71] sm:$0x80]  }
  0x12   :  { %v543_v60 = vld [vmem:[%s937_s0 + $0x159] ss:$-48 sm:%s219_s30]   ;;  %196 = vrot.lane.b32.xlu1 %v195_v58, %s608_s20  ;;  %s281_s2 = smov 96  ;;  %s609_s3 = smov 72   ;;  %v550_v6 = vld [vmem:[%s937_s0 + $0x7] sm:$0x1]  }
  0x13   :  { %v222_v62 = vsel %vm35_vm2, %v543_v60, %v217_v59  ;;  %v546_v63 = vld [vmem:[%s937_s0 + $0x78] ss:$-48 sm:%s240_s13]   ;;  %v551_v7 = vld [vmem:[%s937_s0 + $0x77] ss:$-48 sm:%s271_s25]   ;;  %s302_s8 = smov 6  ;;  %s307_s9 = smov 24 }
  0x14   :  { %v226_v1 = vsel %vm39_vm3, %v544_v57, %v222_v62  ;;  %v243_v2 = vsel %vm25_vm0, %v546_v63, %v545_v61  ;;  %v547_v3 = vld [vmem:[%s937_s0 + $0xe8] ss:$-48 sm:%s245_s14]   ;;  %v274_v9 = vsel %vm25_vm0, %v551_v7, %v550_v6  ;;  %v552_v10 = vld [vmem:[%s937_s0 + $0xe7] ss:$-48 sm:%s276_s26]   ;;  %s312_s14 = smov 96  ;;  %s610_s21 = smov 64  }
  0x15   :  { %v548_v4 = vld [vmem:[%s937_s0 + $0x158] ss:$-48 sm:%s250_s19]   ;;  %227 = vrot.lane.b32.xlu0 %v226_v1, %s609_s3  ;;  %v248_v5 = vsel %vm30_vm1, %v547_v3, %v243_v2  ;;  %v279_v13 = vsel %vm30_vm1, %v552_v10, %v274_v9  ;;  %v554_v14 = vld [vmem:[%s937_s0 + $0x70] sm:$0x80]   ;;  %s333_s26 = smov 6  ;;  %s338_s27 = smov 24 }
  0x16   :  { %v253_v8 = vsel %vm35_vm2, %v548_v4, %v248_v5  ;;  %v553_v11 = vld [vmem:[%s937_s0 + $0x157] ss:$-48 sm:%s281_s2]   ;;  %v555_v15 = vld [vmem:[%s937_s0 + $0x6] sm:$0x1]   ;;  %v559_v20 = vld [vmem:[%s937_s0 + $0x6f] sm:$0x80]  }
  0x17   :  { %v257_v12 = vsel %vm39_vm3, %v549_v0, %v253_v8  ;;  %v556_v16 = vld [vmem:[%s937_s0 + $0x76] ss:$-48 sm:%s302_s8]   ;;  %v284_v17 = vsel %vm35_vm2, %v553_v11, %v279_v13  ;;  %v560_v24 = vld [vmem:[%s937_s0 + $0x5] sm:$0x1]   ;;  %s343_s3 = smov 96  ;;  %s611_s4 = smov 56  }
  0x18   :  { %258 = vrot.lane.b32.xlu1 %v257_v12, %s610_s21  ;;  %v305_v18 = vsel %vm25_vm0, %v556_v16, %v555_v15  ;;  %v557_v19 = vld [vmem:[%s937_s0 + $0xe6] ss:$-48 sm:%s307_s9]   ;;  %v288_v21 = vsel %vm39_vm3, %v554_v14, %v284_v17  ;;  %v564_v27 = vld [vmem:[%s937_s0 + $0x6e] sm:$0x80]   ;;  %s364_s9 = smov 6  ;;  %s369_s10 = smov 24 }
  0x19   :  { %v310_v22 = vsel %vm30_vm1, %v557_v19, %v305_v18  ;;  %v558_v23 = vld [vmem:[%s937_s0 + $0x156] ss:$-48 sm:%s312_s14]   ;;  %289 = vrot.lane.b32.xlu0 %v288_v21, %s611_s4  ;;  %s374_s15 = smov 96  ;;  %s612_s16 = smov 48   ;;  %v565_v33 = vld [vmem:[%s937_s0 + $0x4] sm:$0x1]  }
  0x1a   :  { %v315_v25 = vsel %vm35_vm2, %v558_v23, %v310_v22  ;;  %v561_v26 = vld [vmem:[%s937_s0 + $0x75] ss:$-48 sm:%s333_s26]   ;;  %v566_v34 = vld [vmem:[%s937_s0 + $0x74] ss:$-48 sm:%s364_s9]   ;;  %s395_s21 = smov 6  ;;  %s400_s22 = smov 24 }
  0x1b   :  { %v319_v28 = vsel %vm39_vm3, %v559_v20, %v315_v25  ;;  %v336_v29 = vsel %vm25_vm0, %v561_v26, %v560_v24  ;;  %v562_v30 = vld [vmem:[%s937_s0 + $0xe5] ss:$-48 sm:%s338_s27]   ;;  %v367_v36 = vsel %vm25_vm0, %v566_v34, %v565_v33  ;;  %v567_v37 = vld [vmem:[%s937_s0 + $0xe4] ss:$-48 sm:%s369_s10]   ;;  %s405_s27 = smov 96  ;;  %s613_s5 = smov 40  }
  0x1c   :  { %v563_v31 = vld [vmem:[%s937_s0 + $0x155] ss:$-48 sm:%s343_s3]   ;;  %320 = vrot.lane.b32.xlu1 %v319_v28, %s612_s16  ;;  %v341_v32 = vsel %vm30_vm1, %v562_v30, %v336_v29  ;;  %v372_v40 = vsel %vm30_vm1, %v567_v37, %v367_v36  ;;  %v569_v41 = vld [vmem:[%s937_s0 + $0x6d] sm:$0x80]   ;;  %s426_s10 = smov 6  ;;  %s431_s11 = smov 24 }
  0x1d   :  { %v346_v35 = vsel %vm35_vm2, %v563_v31, %v341_v32  ;;  %v568_v38 = vld [vmem:[%s937_s0 + $0x154] ss:$-48 sm:%s374_s15]   ;;  %v570_v42 = vld [vmem:[%s937_s0 + $0x3] sm:$0x1]   ;;  %v574_v47 = vld [vmem:[%s937_s0 + $0x6c] sm:$0x80]  }
  0x1e   :  { %v350_v39 = vsel %vm39_vm3, %v564_v27, %v346_v35  ;;  %v571_v43 = vld [vmem:[%s937_s0 + $0x73] ss:$-48 sm:%s395_s21]   ;;  %v377_v44 = vsel %vm35_vm2, %v568_v38, %v372_v40  ;;  %v575_v51 = vld [vmem:[%s937_s0 + $0x2] sm:$0x1]   ;;  %s436_s16 = smov 96  ;;  %s614_s17 = smov 32  }
  0x1f   :  { %351 = vrot.lane.b32.xlu0 %v350_v39, %s613_s5  ;;  %v398_v45 = vsel %vm25_vm0, %v571_v43, %v570_v42  ;;  %v572_v46 = vld [vmem:[%s937_s0 + $0xe3] ss:$-48 sm:%s400_s22]   ;;  %v381_v48 = vsel %vm39_vm3, %v569_v41, %v377_v44  ;;  %v579_v54 = vld [vmem:[%s937_s0 + $0x6b] sm:$0x80]   ;;  %s457_s22 = smov 6  ;;  %s462_s23 = smov 24 }
  0x20   :  { %v403_v49 = vsel %vm30_vm1, %v572_v46, %v398_v45  ;;  %v573_v50 = vld [vmem:[%s937_s0 + $0x153] ss:$-48 sm:%s405_s27]   ;;  %382 = vrot.lane.b32.xlu1 %v381_v48, %s614_s17  ;;  %s467_s28 = smov 96  ;;  %s615_s29 = smov 24   ;;  %v580_v60 = vld [vmem:[%s937_s0 + $0x1] sm:$0x1]  }
  0x21   :  { %v408_v52 = vsel %vm35_vm2, %v573_v50, %v403_v49  ;;  %v576_v53 = vld [vmem:[%s937_s0 + $0x72] ss:$-48 sm:%s426_s10]   ;;  %v581_v61 = vld [vmem:[%s937_s0 + $0x71] ss:$-48 sm:%s457_s22]   ;;  %s2_s5 = smov 3  ;;  %s4_s10 = smov 12 }
  0x22   :  { %v412_v55 = vsel %vm39_vm3, %v574_v47, %v408_v52  ;;  %v429_v56 = vsel %vm25_vm0, %v576_v53, %v575_v51  ;;  %v577_v57 = vld [vmem:[%s937_s0 + $0xe2] ss:$-48 sm:%s431_s11]   ;;  %v460_v63 = vsel %vm25_vm0, %v581_v61, %v580_v60  ;;  %v582_v0 = vld [vmem:[%s937_s0 + $0xe1] ss:$-48 sm:%s462_s23]   ;;  %vm6_vm4 = vcmask 1043458   ;;  %s8_s15 = smov 48 }
  0x23   :  { %v578_v58 = vld [vmem:[%s937_s0 + $0x152] ss:$-48 sm:%s436_s16]   ;;  %413 = vrot.lane.b32.xlu0 %v412_v55, %s615_s29  ;;  %v434_v59 = vsel %vm30_vm1, %v577_v57, %v429_v56  ;;  %v465_v3 = vsel %vm30_vm1, %v582_v0, %v460_v63  ;;  %v584_v4 = vld [vmem:[%s937_s0 + $0x6a] sm:$0x80]   ;;  %vm10_vm5 = vcmask 1045508   ;;  %s616_s16 = smov 16  }
  0x24   :  { %v439_v62 = vsel %vm35_vm2, %v578_v58, %v434_v59  ;;  %v583_v1 = vld [vmem:[%s937_s0 + $0x151] ss:$-48 sm:%s467_s28]   ;;  %v3_v5 = vld [vmem:[%s937_s0] ss:$16 sm:%s2_s5]   ;;  %s12_s19 = smov 192  ;;  %vm14_vm6 = vcmask 1047558  }
  0x25   :  { %v443_v2 = vsel %vm39_vm3, %v579_v54, %v439_v62  ;;  %v470_v6 = vsel %vm35_vm2, %v583_v1, %v465_v3  ;;  %v5_v7 = vld [vmem:[%s937_s0] ss:$16 sm:%s4_s10]   ;;  %vm16_vm7 = vcmask 64512   ;;  %vm43_vm8 = vcmask 1048512  }
  0x26   :  { %444 = vrot.lane.b32.xlu1 %v443_v2, %s616_s16  ;;  %v474_v8 = vsel %vm39_vm3, %v584_v4, %v470_v6  ;;  %v7_v9 = vsel %vm6_vm4, %v5_v7, %v3_v5  ;;  %v9_v10 = vld [vmem:[%s937_s0] ss:$16 sm:%s8_s15]   ;;  %vm74_vm9 = vcmask 982912   ;;  %vm105_vm10 = vcmask 917312  }
  0x27   :  { %v13_v11 = vld [vmem:[%s937_s0] ss:$16 sm:%s12_s19]   ;;  %s617_s0 = smov 8   ;;  %v11_v12 = vsel %vm10_vm5, %v9_v10, %v7_v9  ;;  %vm136_vm11 = vcmask 851712   ;;  %vm167_vm12 = vcmask 786112   ;;  %vm198_vm13 = vcmask 720512  }
  0x28   :  { %475 = vrot.lane.b32.xlu0 %v474_v8, %s617_s0  ;;  %v15_v13 = vsel %vm14_vm6, %v13_v11, %v11_v12  ;;  %vm229_vm14 = vcmask 654912   ;;  %vm260_vm15 = vcmask 589312   ;;  %vm291_vm0 = vcmask 523712  }
  0x29   :  { %17 = vst.msk [vmem:[#allocation0] ss:$8 sm:$0xf] %vm16_vm7, %v15_v13   ;;  %19 = vst.msk [vmem:[#allocation0 - $0x1f] ss:$8 sm:$0xf0] %vm16_vm7, %v15_v13  }
  0x2a   :  { %vm322_vm1 = vcmask 458112   ;;  %vm353_vm2 = vcmask 392512   ;;  %vm384_vm3 = vcmask 326912   ;;  %vm415_vm4 = vcmask 261312  }
  0x2b   :  { %vm446_vm5 = vcmask 195712   ;;  %vm477_vm6 = vcmask 130112  }
  0x79   :  { %v42_v14 = vpop.permute.xlu0 %41  }
  0x7a   :  { %44 = vst.msk [vmem:[#allocation0] sm:$0x3] %vm43_vm8, %v42_v14   ;;  %46 = vst.msk [vmem:[#allocation0 + $0x6] sm:$0xc] %vm43_vm8, %v42_v14  }
  0x7b   :  { %48 = vst.msk [vmem:[#allocation0 + $0xc] sm:$0x30] %vm43_vm8, %v42_v14   ;;  %50 = vst.msk [vmem:[#allocation0 + $0x12] sm:$0xc0] %vm43_vm8, %v42_v14   ;;  %v104_v15 = vpop.permute.xlu1 %103  }
  0x7d   :  { %v73_v16 = vpop.permute.xlu0 %72  }
  0x7e   :  { %75 = vst.msk [vmem:[#allocation0] sm:$0x3] %vm74_vm9, %v73_v16   ;;  %77 = vst.msk [vmem:[#allocation0 + $0x6] sm:$0xc] %vm74_vm9, %v73_v16  }
  0x7f   :  { %79 = vst.msk [vmem:[#allocation0 + $0xc] sm:$0x30] %vm74_vm9, %v73_v16   ;;  %81 = vst.msk [vmem:[#allocation0 + $0x12] sm:$0xc0] %vm74_vm9, %v73_v16  }
  0x80   :  { %106 = vst.msk [vmem:[#allocation0] sm:$0x3] %vm105_vm10, %v104_v15   ;;  %108 = vst.msk [vmem:[#allocation0 + $0x6] sm:$0xc] %vm105_vm10, %v104_v15   ;;  %v135_v17 = vpop.permute.xlu1 %134  }
  0x81   :  { %110 = vst.msk [vmem:[#allocation0 + $0xc] sm:$0x30] %vm105_vm10, %v104_v15   ;;  %112 = vst.msk [vmem:[#allocation0 + $0x12] sm:$0xc0] %vm105_vm10, %v104_v15  }
  0x82   :  { %137 = vst.msk [vmem:[#allocation0] sm:$0x3] %vm136_vm11, %v135_v17   ;;  %139 = vst.msk [vmem:[#allocation0 + $0x6] sm:$0xc] %vm136_vm11, %v135_v17   ;;  %v166_v18 = vpop.permute.xlu0 %165  }
  0x83   :  { %141 = vst.msk [vmem:[#allocation0 + $0xc] sm:$0x30] %vm136_vm11, %v135_v17   ;;  %143 = vst.msk [vmem:[#allocation0 + $0x12] sm:$0xc0] %vm136_vm11, %v135_v17  }
  0x84   :  { %168 = vst.msk [vmem:[#allocation0] sm:$0x3] %vm167_vm12, %v166_v18   ;;  %170 = vst.msk [vmem:[#allocation0 + $0x6] sm:$0xc] %vm167_vm12, %v166_v18   ;;  %v197_v19 = vpop.permute.xlu1 %196  }
  0x85   :  { %172 = vst.msk [vmem:[#allocation0 + $0xc] sm:$0x30] %vm167_vm12, %v166_v18   ;;  %174 = vst.msk [vmem:[#allocation0 + $0x12] sm:$0xc0] %vm167_vm12, %v166_v18  }
  0x86   :  { %199 = vst.msk [vmem:[#allocation0] sm:$0x3] %vm198_vm13, %v197_v19   ;;  %201 = vst.msk [vmem:[#allocation0 + $0x6] sm:$0xc] %vm198_vm13, %v197_v19  }
  0x87   :  { %203 = vst.msk [vmem:[#allocation0 + $0xc] sm:$0x30] %vm198_vm13, %v197_v19   ;;  %205 = vst.msk [vmem:[#allocation0 + $0x12] sm:$0xc0] %vm198_vm13, %v197_v19   ;;  %v228_v20 = vpop.permute.xlu0 %227  }
  0x88   :  { %230 = vst.msk [vmem:[#allocation0] sm:$0x3] %vm229_vm14, %v228_v20   ;;  %232 = vst.msk [vmem:[#allocation0 + $0x6] sm:$0xc] %vm229_vm14, %v228_v20  }
  0x89   :  { %234 = vst.msk [vmem:[#allocation0 + $0xc] sm:$0x30] %vm229_vm14, %v228_v20   ;;  %236 = vst.msk [vmem:[#allocation0 + $0x12] sm:$0xc0] %vm229_vm14, %v228_v20  }
  0x8a   :  { %v259_v21 = vpop.permute.xlu1 %258  }
  0x8b   :  { %261 = vst.msk [vmem:[#allocation0] sm:$0x3] %vm260_vm15, %v259_v21   ;;  %263 = vst.msk [vmem:[#allocation0 + $0x6] sm:$0xc] %vm260_vm15, %v259_v21   ;;  %v290_v22 = vpop.permute.xlu0 %289  }
  0x8c   :  { %265 = vst.msk [vmem:[#allocation0 + $0xc] sm:$0x30] %vm260_vm15, %v259_v21   ;;  %267 = vst.msk [vmem:[#allocation0 + $0x12] sm:$0xc0] %vm260_vm15, %v259_v21  }
  0x8d   :  { %292 = vst.msk [vmem:[#allocation0] sm:$0x3] %vm291_vm0, %v290_v22   ;;  %294 = vst.msk [vmem:[#allocation0 + $0x6] sm:$0xc] %vm291_vm0, %v290_v22  }
  0x8e   :  { %296 = vst.msk [vmem:[#allocation0 + $0xc] sm:$0x30] %vm291_vm0, %v290_v22   ;;  %298 = vst.msk [vmem:[#allocation0 + $0x12] sm:$0xc0] %vm291_vm0, %v290_v22   ;;  %v321_v23 = vpop.permute.xlu1 %320  }
  0x8f   :  { %323 = vst.msk [vmem:[#allocation0] sm:$0x3] %vm322_vm1, %v321_v23   ;;  %325 = vst.msk [vmem:[#allocation0 + $0x6] sm:$0xc] %vm322_vm1, %v321_v23  }
  0x90   :  { %327 = vst.msk [vmem:[#allocation0 + $0xc] sm:$0x30] %vm322_vm1, %v321_v23   ;;  %329 = vst.msk [vmem:[#allocation0 + $0x12] sm:$0xc0] %vm322_vm1, %v321_v23  }
  0x91   :  { %v352_v24 = vpop.permute.xlu0 %351  }
  0x92   :  { %354 = vst.msk [vmem:[#allocation0] sm:$0x3] %vm353_vm2, %v352_v24   ;;  %356 = vst.msk [vmem:[#allocation0 + $0x6] sm:$0xc] %vm353_vm2, %v352_v24   ;;  %v383_v25 = vpop.permute.xlu1 %382  }
  0x93   :  { %358 = vst.msk [vmem:[#allocation0 + $0xc] sm:$0x30] %vm353_vm2, %v352_v24   ;;  %360 = vst.msk [vmem:[#allocation0 + $0x12] sm:$0xc0] %vm353_vm2, %v352_v24  }
  0x94   :  { %385 = vst.msk [vmem:[#allocation0] sm:$0x3] %vm384_vm3, %v383_v25   ;;  %387 = vst.msk [vmem:[#allocation0 + $0x6] sm:$0xc] %vm384_vm3, %v383_v25  }
  0x95   :  { %389 = vst.msk [vmem:[#allocation0 + $0xc] sm:$0x30] %vm384_vm3, %v383_v25   ;;  %391 = vst.msk [vmem:[#allocation0 + $0x12] sm:$0xc0] %vm384_vm3, %v383_v25   ;;  %v414_v26 = vpop.permute.xlu0 %413  }
  0x96   :  { %416 = vst.msk [vmem:[#allocation0] sm:$0x3] %vm415_vm4, %v414_v26   ;;  %418 = vst.msk [vmem:[#allocation0 + $0x6] sm:$0xc] %vm415_vm4, %v414_v26  }
  0x97   :  { %420 = vst.msk [vmem:[#allocation0 + $0xc] sm:$0x30] %vm415_vm4, %v414_v26   ;;  %422 = vst.msk [vmem:[#allocation0 + $0x12] sm:$0xc0] %vm415_vm4, %v414_v26  }
  0x98   :  { %v445_v27 = vpop.permute.xlu1 %444  }
  0x99   :  { %447 = vst.msk [vmem:[#allocation0] sm:$0x3] %vm446_vm5, %v445_v27   ;;  %449 = vst.msk [vmem:[#allocation0 + $0x6] sm:$0xc] %vm446_vm5, %v445_v27  }
  0x9a   :  { %451 = vst.msk [vmem:[#allocation0 + $0xc] sm:$0x30] %vm446_vm5, %v445_v27   ;;  %453 = vst.msk [vmem:[#allocation0 + $0x12] sm:$0xc0] %vm446_vm5, %v445_v27   ;;  %v476_v28 = vpop.permute.xlu0 %475  }
  0x9b   :  { %478 = vst.msk [vmem:[#allocation0] sm:$0x3] %vm477_vm6, %v476_v28   ;;  %480 = vst.msk [vmem:[#allocation0 + $0x6] sm:$0xc] %vm477_vm6, %v476_v28  }
  0x9c   :  { %482 = vst.msk [vmem:[#allocation0 + $0xc] sm:$0x30] %vm477_vm6, %v476_v28   ;;  %484 = vst.msk [vmem:[#allocation0 + $0x12] sm:$0xc0] %vm477_vm6, %v476_v28  }
  0xa2   :  { %v488_v29 = vld [vmem:[#allocation0] sm:$0x3]  ;;  %v492_v30 = vld [vmem:[#allocation0 + $0x8] sm:$0x3] }
  0xa3   :  { %v497_v31 = vld [vmem:[#allocation0 + $0x10] sm:$0x3]  ;;  %490 = vst [vmem:[%s938_s1] sm:$0x3] %v488_v29  ;;  %585 = vst [vmem:[%s938_s1 + $0x2] sm:$0x3] %v492_v30 }
  0xa4   :  { %586 = vst [vmem:[%s938_s1 + $0x4] sm:$0x3] %v497_v31  ;;  %v503_v32 = vld [vmem:[#allocation0 + $0x18] sm:$0x3] }
  0xa5   :  { %587 = vst [vmem:[%s938_s1 + $0x6] sm:$0x3] %v503_v32 }

// kernel: crf_loss.2
= control target key start
LH: loop header
LB: loop body
LE: loop exit
PB: predicated region body
PF: predicated region fallthrough
CT: control target
= control target key end

     0   :  { %s3677_s0 = inlined_call_operand.vmem [shape: s32[3,1], index: 0, kind: input, shape index: {}]   ;;  %s3678_s2 = inlined_call_operand.vmem [shape: f32[2,9,512], index: 2, kind: input, shape index: {}]   ;;  %s3679_s3 = inlined_call_operand.vmem [shape: f32[2,9,512], index: 3, kind: input, shape index: {}]   ;;  %s3680_s4 = inlined_call_operand.vmem [shape: f32[2,1,512], index: 4, kind: output, shape index: {}]   ;;  %s3681_s1 = inlined_call_operand.vmem [shape: s32[3,1], index: 1, kind: input, shape index: {}]  }
   0x1   :  { %s9_s17 = sshll.u32 %s3677_s0, 4  ;;  %s13_s20 = sshll.u32 %s3681_s1, 4  ;;  %s10_s17 = int_to_ptr.vmem [resolvable:$true] %s9_s17  ;;  %s14_s20 = int_to_ptr.vmem [resolvable:$true] %s13_s20 }
   0x2   :  { %s3213_s21 = scalar_lea.vmem %s10_s17, 64  ;;  %p3218_p1 = scmp.lt.s32.totalorder %s10_s17, %s10_s17 }
   0x3   :  { %p3214_p0 = scmp.ne.s32.totalorder %s10_s17, %s3213_s21  ;;  %p3219_p2 = scmp.lt.s32.totalorder %s3213_s21, %s3213_s21 }
   0x5   :  { %p3220_p3 = por %p3219_p2, %p3218_p1 }
   0x7   :  { %p3221_p4 = pnand %p3220_p3, %p3214_p0 }
   0x9   :  { %3224 = shalt.err (!%p3221_p4)  }
   0xa   :  { %s3263_s22 = smov [#allocation3]   ;;  %s3225_s23 = scalar_lea.vmem %s14_s20, 64 }
   0xb   :  { %12 = dma.vmem_to_smem %s10_s17, 64, %s3263_s22, [#allocation2] }
   0xc   :  { %p3226_p5 = scmp.ne.s32.totalorder %s14_s20, %s3225_s23  ;;  %p3230_p6 = scmp.lt.s32.totalorder %s14_s20, %s14_s20 }
   0xd   :  { %p3231_p7 = scmp.lt.s32.totalorder %s3225_s23, %s3225_s23 }
   0xf   :  { %p3232_p8 = por %p3231_p7, %p3230_p6 }
  0x11   :  { %p3233_p9 = pnand %p3232_p8, %p3226_p5 }
  0x13   :  { %3236 = shalt.err (!%p3233_p9)  }
  0x14   :  { %s3264_s0 = smov [#allocation4]  }
  0x15   :  { %16 = dma.vmem_to_smem %s14_s20, 64, %s3264_s0, [#allocation2] }
  0x16   :  { %3249 = dma.done.wait [#allocation2], 128 }
  0x17   :  { %3250 = vsyncadd [#allocation2], 4294967168 }
  0x18   :  { %18 = sfence }
  0x19   :  { %s3301_s1 = smov 0   ;;  %s3303_s24 = smov 0  }
  0x1a   :  { %s3305_s25 = smov 0  }
  0x1b LB: > { %s43_s26 = sadd.s32 1, %s3257_s24  ;;  %p2499_p10 = scmp.ge.s32.totalorder %s3261_s25, 1  ;;  %s3261_s25 = sphi %s3305_s25, %s24_s25   ;;  %s3257_s24 = sphi %s3303_s24, %s3687_s24   ;;  %s3253_s1 = sphi %s3301_s1, %s3686_s1  }
  0x1c   : > { %p45_p11 = scmp.ge.s32.totalorder %s43_s26, 2  ;;  %p169_p12 = scmp.lt.s32.totalorder %s3261_s25, 3 }
  0x1e   : > { %s3689_s26 = smov (%p45_p11, %s43_s26), 0  ;;  %p170_p13 = pnand %p2499_p10, %p169_p12 }
  0x1f   : > { %p208_p0 = scmp.lt.s32.totalorder (!%p170_p13), %s3253_s1, 1  ;;  %v241_v0 = vlaneseq (!%p170_p13)  ;;  %s246_s27 = sld [smem:[#allocation3]] (!%p170_p13)  ;;  %v3265_v2 = vmov (!%p170_p13), 0.0  }
  0x20   : > { %173 = sbr.rel (%p170_p13) target bundleno = 894 (0x37e), region = 28  ;;  %s247_s28 = sld [smem:[#allocation4]] (!%p170_p13) }
  0x21   : > { %s2505_s29 = sld [smem:[#allocation3 + $0x80]] (!%p170_p13)  ;;  %vm3320_vm0 = vcmp.lt.s32.totalorder (!%p170_p13), %v241_v0, 512 }
  0x22   : > { %s2506_s30 = sld [smem:[#allocation4 + $0x80]] (!%p170_p13) }
  0x23   : > { %s2509_s5 = sld [smem:[#allocation3 + $0x100]] (!%p170_p13) }
  0x24   : > { %s2510_s17 = sld [smem:[#allocation4 + $0x100]] (!%p170_p13) }
  0x26   : > { %s248_s18 = ssub.s32 (!%p170_p13), %s246_s27, %s247_s28 }
  0x27   : > { %s3691_s1 = smov (!%p208_p0, %s3253_s1), 1  ;;  %p254_p1 = scmp.gt.s32.totalorder %s248_s18, 0 }
  0x28   : > { %s2648_s6 = sshll.u32 %s3691_s1, 6  ;;  %s2504_s7 = sshll.u32 %s3691_s1, 2 }
  0x29   : > { %s3327_s10 = scalar_lea.vmem %s3678_s2, %s2648_s6  ;;  %s3332_s13 = scalar_lea.vmem %s3679_s3, %s2648_s6 }
  0x2a   : > { %s3337_s16 = scalar_lea.vmem %s3680_s4, %s2504_s7  ;;  %s273_s19 = ssub.s32 %s2505_s29, %s2506_s30 }
  0x2b   : > { %245 = vst.msk [vmem:[%s3337_s16] sm:$0xf] %vm3320_vm0, %v3265_v2  ;;  %s291_s20 = ssub.s32 %s2509_s5, %s2510_s17  ;;  %s3693_s18 = smov (!%p254_p1, %s248_s18), 0 }
  0x2c   : > { %p279_p2 = scmp.gt.s32.totalorder %s273_s19, 0  ;;  %s256_s21 = smul.u32 %s3693_s18, %s3693_s18 }
  0x2d   : > { %p297_p3 = scmp.gt.s32.totalorder %s291_s20, 0 }
  0x2e   : > { %s3695_s19 = smov (!%p279_p2, %s273_s19), 0 }
  0x2f   : > { %s281_s22 = smul.u32 %s3695_s19, %s3695_s19  ;;  %s3697_s20 = smov (!%p297_p3, %s291_s20), 0 }
  0x30   : > { %s299_s0 = smul.u32 %s3697_s20, %s3697_s20 }
  0x31   : > { %s282_s23 = sadd.s32 %s281_s22, %s256_s21 }
  0x32   : > { %s300_s1 = sadd.s32 %s299_s0, %s282_s23 }
  0x33   : > { %p2513_p4 = scmp.gt.s32.totalorder %s300_s1, 1000 }
  0x34   : > { %v305_v3 = vld [vmem:[%s3332_s13] sm:$0xff] (!%p2513_p4)  ;;  %v306_v5 = vld [vmem:[%s3332_s13 + $0x8] sm:$0xff] (!%p2513_p4)  ;;  %vm642_vm1 = vcmask (!%p2513_p4), 1040384   ;;  %vm3266_vm2 = vmmov (!%p2513_p4), 1   ;;  %v316_v11 = vld [vmem:[%s3327_s10 + $0x18] sm:$0xff] (!%p2513_p4)  ;;  %v3267_v13 = vmov (!%p2513_p4), 0.0  }
  0x35   : > { %304 = sbr.rel (%p2513_p4) target bundleno = 894 (0x37e), region = 36  ;;  %v309_v4 = vld [vmem:[%s3332_s13 + $0x20] sm:$0x1] (!%p2513_p4)  ;;  %321 = vxpose.xlu0.b32.start [1/2] (short) (!%p2513_p4), %v305_v3, 128  ;;  %353 = vxpose.xlu1.b32.start [1/2] (short) (!%p2513_p4), %v306_v5, 128  ;;  %v310_v6 = vld [vmem:[%s3332_s13 + $0x28] sm:$0x1] (!%p2513_p4)  ;;  %vm3348_vm3 = vmpackc.low (!%p2513_p4), %vm642_vm1, %vm3266_vm2  ;;  %vm449_vm4 = vcmask (!%p2513_p4), 72704  }
  0x36   : > { %v314_v7 = vld [vmem:[%s3327_s10 + $0x8] sm:$0xff] (!%p2513_p4)  ;;  %v320_v12 = vld [vmem:[%s3327_s10 + $0x38] sm:$0x1] (!%p2513_p4)  ;;  %719 = vmatprep.mubr.f32.mxu0 (!%p2513_p4), %v3267_v13  ;;  %1168 = vmatprep.mubr.f32.mxu1 (!%p2513_p4), %v3267_v13  ;;  %v313_v15 = vld [vmem:[%s3327_s10] sm:$0xff] (!%p2513_p4) }
  0x37   : > { %v318_v8 = vld [vmem:[%s3327_s10 + $0x28] sm:$0x1] (!%p2513_p4)  ;;  %v2656_v14 = vpack.c.bf16 (!%p2513_p4), %v320_v12, %v316_v11  ;;  %v317_v16 = vld [vmem:[%s3327_s10 + $0x20] sm:$0x1] (!%p2513_p4)  ;;  %v315_v17 = vld [vmem:[%s3327_s10 + $0x10] sm:$0xff] (!%p2513_p4) }
  0x38   : > { %v2650_v9 = vpack.c.bf16 (!%p2513_p4), %v318_v8, %v314_v7  ;;  %v2653_v18 = vpack.c.bf16 (!%p2513_p4), %v317_v16, %v313_v15  ;;  %v319_v19 = vld [vmem:[%s3327_s10 + $0x30] sm:$0x1] (!%p2513_p4)  ;;  %v308_v22 = vld [vmem:[%s3332_s13 + $0x18] sm:$0xff] (!%p2513_p4) }
  0x39   : > { %322 = vxpose.xlu0.b32.end [2/2] (short) (!%p2513_p4), %v309_v4, 128  ;;  %354 = vxpose.xlu1.b32.end [2/2] (short) (!%p2513_p4), %v310_v6, 128  ;;  %v2659_v20 = vpack.c.bf16 (!%p2513_p4), %v319_v19, %v315_v17  ;;  %v307_v21 = vld [vmem:[%s3332_s13 + $0x10] sm:$0xff] (!%p2513_p4)  ;;  %v312_v24 = vld [vmem:[%s3332_s13 + $0x38] sm:$0x1] (!%p2513_p4) }
  0x3a   : > { %2652 = vmatprep.subr.msk.bf16.mxu0 (!%p2513_p4), %vm3348_vm3, %v2650_v9  ;;  %2658 = vmatprep.subr.msk.bf16.mxu1 (!%p2513_p4), %vm3348_vm3, %v2656_v14  ;;  %v311_v23 = vld [vmem:[%s3332_s13 + $0x30] sm:$0x1] (!%p2513_p4) }
  0x3b   : > { %2655 = vmatpush1.bf16.msk.msra.mxu0 (!%p2513_p4), %vm3348_vm3, %v2653_v18  ;;  %2661 = vmatpush1.bf16.msk.msra.mxu1 (!%p2513_p4), %vm3348_vm3, %v2659_v20 }
  0x72   : > { %385 = vxpose.xlu0.b32.start [1/2] (short) %v307_v21, 128  ;;  %417 = vxpose.xlu1.b32.start [1/2] (short) %v308_v22, 128 }
  0x76   : > { %386 = vxpose.xlu0.b32.end [2/2] (short) %v311_v23, 128  ;;  %418 = vxpose.xlu1.b32.end [2/2] (short) %v312_v24, 128 }
  0xb5   : > { %v337_v25 = vpop.trf.xlu0  ;;  %v369_v34 = vpop.trf.xlu1 }
  0xb6   : > { %2516 = vmatmul.mubr.msk.f32.vlgmr.msra.gmra.mrb[0].mxu0 %vm449_vm4, %v337_v25  ;;  %2582 = vmatmul.mubr.msk.f32.vlgmr.msra.gmra.mrb[0].mxu1 %vm449_vm4, %v337_v25 }
  0xb7   : > { %725 = vmatprep.mubr.f32.mxu0 %v3267_v13  ;;  %1174 = vmatprep.mubr.f32.mxu1 %v3267_v13 }
  0xb9   : > { %v338_v26 = vpop.trf.xlu0  ;;  %v370_v36 = vpop.trf.xlu1 }
  0xba   : > { %2517 = vmatmul.mubr.msk.f32.gmra.mrb[2].mxu0 %vm449_vm4, %v338_v26  ;;  %2583 = vmatmul.mubr.msk.f32.gmra.mrb[2].mxu1 %vm449_vm4, %v338_v26 }
  0xbb   : > { %731 = vmatprep.mubr.f32.mxu0 %v3267_v13  ;;  %1180 = vmatprep.mubr.f32.mxu1 %v3267_v13 }
  0xbd   : > { %v339_v27 = vpop.trf.xlu0  ;;  %v371_v39 = vpop.trf.xlu1 }
  0xbe   : > { %2518 = vmatmul.mubr.msk.f32.gmra.mrb[4].mxu0 %vm449_vm4, %v339_v27  ;;  %2584 = vmatmul.mubr.msk.f32.gmra.mrb[4].mxu1 %vm449_vm4, %v339_v27 }
  0xbf   : > { %737 = vmatprep.mubr.f32.mxu0 %v3267_v13  ;;  %1186 = vmatprep.mubr.f32.mxu1 %v3267_v13 }
  0xc1   : > { %v340_v28 = vpop.trf.xlu0  ;;  %v372_v41 = vpop.trf.xlu1 }
  0xc2   : > { %2519 = vmatmul.mubr.msk.f32.gmra.mrb[6].mxu0 %vm449_vm4, %v340_v28  ;;  %2585 = vmatmul.mubr.msk.f32.gmra.mrb[6].mxu1 %vm449_vm4, %v340_v28 }
  0xc3   : > { %743 = vmatprep.mubr.f32.mxu0 %v3267_v13  ;;  %1192 = vmatprep.mubr.f32.mxu1 %v3267_v13 }
  0xc5   : > { %v341_v29 = vpop.trf.xlu0  ;;  %v373_v44 = vpop.trf.xlu1 }
  0xc6   : > { %2520 = vmatmul.mubr.msk.f32.gmra.mrb[8].mxu0 %vm449_vm4, %v341_v29  ;;  %2586 = vmatmul.mubr.msk.f32.gmra.mrb[8].mxu1 %vm449_vm4, %v341_v29 }
  0xc7   : > { %749 = vmatprep.mubr.f32.mxu0 %v3267_v13  ;;  %1198 = vmatprep.mubr.f32.mxu1 %v3267_v13 }
  0xc9   : > { %v342_v30 = vpop.trf.xlu0  ;;  %v374_v46 = vpop.trf.xlu1 }
  0xca   : > { %2521 = vmatmul.mubr.msk.f32.gmra.mrb[10].mxu0 %vm449_vm4, %v342_v30  ;;  %2587 = vmatmul.mubr.msk.f32.gmra.mrb[10].mxu1 %vm449_vm4, %v342_v30 }
  0xcb   : > { %755 = vmatprep.mubr.f32.mxu0 %v3267_v13  ;;  %1204 = vmatprep.mubr.f32.mxu1 %v3267_v13 }
  0xcd   : > { %v343_v31 = vpop.trf.xlu0  ;;  %v375_v47 = vpop.trf.xlu1 }
  0xce   : > { %2522 = vmatmul.mubr.msk.f32.gmra.mrb[12].mxu0 %vm449_vm4, %v343_v31  ;;  %2588 = vmatmul.mubr.msk.f32.gmra.mrb[12].mxu1 %vm449_vm4, %v343_v31 }
  0xcf   : > { %761 = vmatprep.mubr.f32.mxu0 %v3267_v13  ;;  %1210 = vmatprep.mubr.f32.mxu1 %v3267_v13 }
  0xd1   : > { %v344_v32 = vpop.trf.xlu0  ;;  %v376_v48 = vpop.trf.xlu1 }
  0xd2   : > { %2523 = vmatmul.mubr.msk.f32.gmra.mrb[14].mxu0 %vm449_vm4, %v344_v32  ;;  %2589 = vmatmul.mubr.msk.f32.gmra.mrb[14].mxu1 %vm449_vm4, %v344_v32 }
  0xd3   : > { %767 = vmatprep.mubr.f32.mxu0 %v3267_v13  ;;  %1216 = vmatprep.mubr.f32.mxu1 %v3267_v13 }
  0xd5   : > { %v345_v33 = vpop.trf.xlu0  ;;  %v377_v49 = vpop.trf.xlu1 }
  0xd6   : > { %2524 = vmatmul.mubr.msk.f32.gmra.mrb[16].mxu0 %vm449_vm4, %v345_v33  ;;  %2590 = vmatmul.mubr.msk.f32.gmra.mrb[16].mxu1 %vm449_vm4, %v345_v33 }
  0xd7   : > { %773 = vmatprep.mubr.f32.mxu0 %v3267_v13  ;;  %1222 = vmatprep.mubr.f32.mxu1 %v3267_v13 }
  0xd9   : > { %v346_v35 = vpop.trf.xlu0  ;;  %v378_v50 = vpop.trf.xlu1 }
  0xda   : > { %2525 = vmatmul.mubr.msk.f32.gmra.mrb[18].mxu0 %vm449_vm4, %v346_v35  ;;  %2591 = vmatmul.mubr.msk.f32.gmra.mrb[18].mxu1 %vm449_vm4, %v346_v35 }
  0xdb   : > { %779 = vmatprep.mubr.f32.mxu0 %v3267_v13  ;;  %1228 = vmatprep.mubr.f32.mxu1 %v3267_v13 }
  0xdd   : > { %v347_v37 = vpop.trf.xlu0  ;;  %v379_v51 = vpop.trf.xlu1 }
  0xde   : > { %2526 = vmatmul.mubr.msk.f32.gmra.mrb[20].mxu0 %vm449_vm4, %v347_v37  ;;  %2592 = vmatmul.mubr.msk.f32.gmra.mrb[20].mxu1 %vm449_vm4, %v347_v37 }
  0xdf   : > { %785 = vmatprep.mubr.f32.mxu0 %v3267_v13  ;;  %1234 = vmatprep.mubr.f32.mxu1 %v3267_v13 }
  0xe1   : > { %v348_v38 = vpop.trf.xlu0  ;;  %v380_v53 = vpop.trf.xlu1 }
  0xe2   : > { %2527 = vmatmul.mubr.msk.f32.gmra.mrb[22].mxu0 %vm449_vm4, %v348_v38  ;;  %2593 = vmatmul.mubr.msk.f32.gmra.mrb[22].mxu1 %vm449_vm4, %v348_v38 }
  0xe3   : > { %791 = vmatprep.mubr.f32.mxu0 %v3267_v13  ;;  %1240 = vmatprep.mubr.f32.mxu1 %v3267_v13 }
  0xe5   : > { %v349_v40 = vpop.trf.xlu0  ;;  %v381_v55 = vpop.trf.xlu1 }
  0xe6   : > { %2528 = vmatmul.mubr.msk.f32.gmra.mrb[24].mxu0 %vm449_vm4, %v349_v40  ;;  %2594 = vmatmul.mubr.msk.f32.gmra.mrb[24].mxu1 %vm449_vm4, %v349_v40 }
  0xe7   : > { %797 = vmatprep.mubr.f32.mxu0 %v3267_v13  ;;  %1246 = vmatprep.mubr.f32.mxu1 %v3267_v13 }
  0xe9   : > { %v350_v42 = vpop.trf.xlu0  ;;  %v382_v57 = vpop.trf.xlu1 }
  0xea   : > { %2529 = vmatmul.mubr.msk.f32.gmra.mrb[26].mxu0 %vm449_vm4, %v350_v42  ;;  %2595 = vmatmul.mubr.msk.f32.gmra.mrb[26].mxu1 %vm449_vm4, %v350_v42 }
  0xeb   : > { %803 = vmatprep.mubr.f32.mxu0 %v3267_v13  ;;  %1252 = vmatprep.mubr.f32.mxu1 %v3267_v13 }
  0xed   : > { %v351_v43 = vpop.trf.xlu0  ;;  %v383_v59 = vpop.trf.xlu1 }
  0xee   : > { %2530 = vmatmul.mubr.msk.f32.gmra.mrb[28].mxu0 %vm449_vm4, %v351_v43  ;;  %2596 = vmatmul.mubr.msk.f32.gmra.mrb[28].mxu1 %vm449_vm4, %v351_v43 }
  0xef   : > { %809 = vmatprep.mubr.f32.mxu0 %v3267_v13  ;;  %1258 = vmatprep.mubr.f32.mxu1 %v3267_v13 }
  0xf1   : > { %v352_v45 = vpop.trf.xlu0  ;;  %v384_v61 = vpop.trf.xlu1 }
  0xf2   : > { %2531 = vmatmul.mubr.msk.f32.gmra.mrb[30].mxu0 %vm449_vm4, %v352_v45  ;;  %2597 = vmatmul.mubr.msk.f32.gmra.mrb[30].mxu1 %vm449_vm4, %v352_v45 }
  0xf3   : > { %815 = vmatprep.mubr.f32.mxu0 %v3267_v13  ;;  %1264 = vmatprep.mubr.f32.mxu1 %v3267_v13 }
  0xf5   : > { %v401_v52 = vpop.trf.xlu0  ;;  %v433_v5 = vpop.trf.xlu1 }
  0xf6   : > { %2532 = vmatmul.mubr.msk.f32.gmra.mrb[32].mxu0 %vm449_vm4, %v369_v34  ;;  %2598 = vmatmul.mubr.msk.f32.gmra.mrb[32].mxu1 %vm449_vm4, %v369_v34 }
  0xf7   : > { %821 = vmatprep.mubr.f32.mxu0 %v3267_v13  ;;  %1270 = vmatprep.mubr.f32.mxu1 %v3267_v13 }
  0xf9   : > { %v402_v54 = vpop.trf.xlu0  ;;  %v434_v7 = vpop.trf.xlu1 }
  0xfa   : > { %2533 = vmatmul.mubr.msk.f32.gmra.mrb[34].mxu0 %vm449_vm4, %v370_v36  ;;  %2599 = vmatmul.mubr.msk.f32.gmra.mrb[34].mxu1 %vm449_vm4, %v370_v36 }
  0xfb   : > { %827 = vmatprep.mubr.f32.mxu0 %v3267_v13  ;;  %1276 = vmatprep.mubr.f32.mxu1 %v3267_v13 }
  0xfd   : > { %v403_v56 = vpop.trf.xlu0  ;;  %v435_v9 = vpop.trf.xlu1 }
  0xfe   : > { %2534 = vmatmul.mubr.msk.f32.gmra.mrb[36].mxu0 %vm449_vm4, %v371_v39  ;;  %2600 = vmatmul.mubr.msk.f32.gmra.mrb[36].mxu1 %vm449_vm4, %v371_v39 }
  0xff   : > { %833 = vmatprep.mubr.f32.mxu0 %v3267_v13  ;;  %1282 = vmatprep.mubr.f32.mxu1 %v3267_v13 }
 0x101   : > { %v404_v58 = vpop.trf.xlu0  ;;  %v436_v11 = vpop.trf.xlu1 }
 0x102   : > { %2535 = vmatmul.mubr.msk.f32.gmra.mrb[38].mxu0 %vm449_vm4, %v372_v41  ;;  %2601 = vmatmul.mubr.msk.f32.gmra.mrb[38].mxu1 %vm449_vm4, %v372_v41 }
 0x103   : > { %839 = vmatprep.mubr.f32.mxu0 %v3267_v13  ;;  %1288 = vmatprep.mubr.f32.mxu1 %v3267_v13 }
 0x105   : > { %v405_v60 = vpop.trf.xlu0  ;;  %v437_v14 = vpop.trf.xlu1 }
 0x106   : > { %2536 = vmatmul.mubr.msk.f32.gmra.mrb[40].mxu0 %vm449_vm4, %v373_v44  ;;  %2602 = vmatmul.mubr.msk.f32.gmra.mrb[40].mxu1 %vm449_vm4, %v373_v44 }
 0x107   : > { %845 = vmatprep.mubr.f32.mxu0 %v3267_v13  ;;  %1294 = vmatprep.mubr.f32.mxu1 %v3267_v13 }
 0x109   : > { %v406_v62 = vpop.trf.xlu0  ;;  %v438_v16 = vpop.trf.xlu1 }
 0x10a   : > { %2537 = vmatmul.mubr.msk.f32.gmra.mrb[42].mxu0 %vm449_vm4, %v374_v46  ;;  %2603 = vmatmul.mubr.msk.f32.gmra.mrb[42].mxu1 %vm449_vm4, %v374_v46 }
 0x10b   : > { %851 = vmatprep.mubr.f32.mxu0 %v3267_v13  ;;  %1300 = vmatprep.mubr.f32.mxu1 %v3267_v13 }
 0x10d   : > { %v407_v63 = vpop.trf.xlu0  ;;  %v439_v18 = vpop.trf.xlu1 }
 0x10e   : > { %2538 = vmatmul.mubr.msk.f32.gmra.mrb[44].mxu0 %vm449_vm4, %v375_v47  ;;  %2604 = vmatmul.mubr.msk.f32.gmra.mrb[44].mxu1 %vm449_vm4, %v375_v47 }
 0x10f   : > { %857 = vmatprep.mubr.f32.mxu0 %v3267_v13  ;;  %1306 = vmatprep.mubr.f32.mxu1 %v3267_v13 }
 0x111   : > { %v408_v2 = vpop.trf.xlu0  ;;  %v440_v19 = vpop.trf.xlu1 }
 0x112   : > { %2539 = vmatmul.mubr.msk.f32.gmra.mrb[46].mxu0 %vm449_vm4, %v376_v48  ;;  %2605 = vmatmul.mubr.msk.f32.gmra.mrb[46].mxu1 %vm449_vm4, %v376_v48 }
 0x113   : > { %863 = vmatprep.mubr.f32.mxu0 %v3267_v13  ;;  %1312 = vmatprep.mubr.f32.mxu1 %v3267_v13 }
 0x115   : > { %v409_v3 = vpop.trf.xlu0  ;;  %v3572_v20 = vpop.trf.xlu1 }
 0x116   : > { %2540 = vmatmul.mubr.msk.f32.gmra.mrb[48].mxu0 %vm449_vm4, %v377_v49  ;;  %2606 = vmatmul.mubr.msk.f32.gmra.mrb[48].mxu1 %vm449_vm4, %v377_v49 }
 0x117   : > { %869 = vmatprep.mubr.f32.mxu0 %v3267_v13  ;;  %1318 = vmatprep.mubr.f32.mxu1 %v3267_v13 }
 0x119   : > { %v410_v4 = vpop.trf.xlu0  ;;  %v3580_v21 = vpop.trf.xlu1 }
 0x11a   : > { %2541 = vmatmul.mubr.msk.f32.gmra.mrb[50].mxu0 %vm449_vm4, %v378_v50  ;;  %2607 = vmatmul.mubr.msk.f32.gmra.mrb[50].mxu1 %vm449_vm4, %v378_v50 }
 0x11b   : > { %875 = vmatprep.mubr.f32.mxu0 %v3267_v13  ;;  %1324 = vmatprep.mubr.f32.mxu1 %v3267_v13 }
 0x11d   : > { %v411_v6 = vpop.trf.xlu0  ;;  %v3588_v22 = vpop.trf.xlu1 }
 0x11e   : > { %2542 = vmatmul.mubr.msk.f32.gmra.mrb[52].mxu0 %vm449_vm4, %v379_v51  ;;  %2608 = vmatmul.mubr.msk.f32.gmra.mrb[52].mxu1 %vm449_vm4, %v379_v51 }
 0x11f   : > { %881 = vmatprep.mubr.f32.mxu0 %v3267_v13  ;;  %1330 = vmatprep.mubr.f32.mxu1 %v3267_v13 }
 0x121   : > { %v412_v8 = vpop.trf.xlu0  ;;  %v3598_v39 = vpop.trf.xlu1 }
 0x122   : > { %2543 = vmatmul.mubr.msk.f32.gmra.mrb[54].mxu0 %vm449_vm4, %v380_v53  ;;  %2609 = vmatmul.mubr.msk.f32.gmra.mrb[54].mxu1 %vm449_vm4, %v380_v53 }
 0x123   : > { %887 = vmatprep.mubr.f32.mxu0 %v3267_v13  ;;  %1336 = vmatprep.mubr.f32.mxu1 %v3267_v13 }
 0x125   : > { %v413_v10 = vpop.trf.xlu0 }
 0x126   : > { %2544 = vmatmul.mubr.msk.f32.gmra.mrb[56].mxu0 %vm449_vm4, %v381_v55  ;;  %2610 = vmatmul.mubr.msk.f32.gmra.mrb[56].mxu1 %vm449_vm4, %v381_v55 }
 0x127   : > { %893 = vmatprep.mubr.f32.mxu0 %v3267_v13  ;;  %1342 = vmatprep.mubr.f32.mxu1 %v3267_v13 }
 0x129   : > { %v414_v12 = vpop.trf.xlu0 }
 0x12a   : > { %2545 = vmatmul.mubr.msk.f32.gmra.mrb[58].mxu0 %vm449_vm4, %v382_v57  ;;  %2611 = vmatmul.mubr.msk.f32.gmra.mrb[58].mxu1 %vm449_vm4, %v382_v57 }
 0x12b   : > { %899 = vmatprep.mubr.f32.mxu0 %v3267_v13  ;;  %1348 = vmatprep.mubr.f32.mxu1 %v3267_v13 }
 0x12d   : > { %v415_v15 = vpop.trf.xlu0 }
 0x12e   : > { %2546 = vmatmul.mubr.msk.f32.gmra.mrb[60].mxu0 %vm449_vm4, %v383_v59  ;;  %2612 = vmatmul.mubr.msk.f32.gmra.mrb[60].mxu1 %vm449_vm4, %v383_v59  ;;  %v3610_v59 = vpop.trf.xlu1 }
 0x12f   : > { %905 = vmatprep.mubr.f32.mxu0 %v3267_v13  ;;  %1354 = vmatprep.mubr.f32.mxu1 %v3267_v13 }
 0x131   : > { %v416_v17 = vpop.trf.xlu0 }
 0x132   : > { %2547 = vmatmul.mubr.msk.f32.gmra.mrb[62].mxu0 %vm449_vm4, %v384_v61  ;;  %2613 = vmatmul.mubr.msk.f32.gmra.mrb[62].mxu1 %vm449_vm4, %v384_v61 }
 0x133   : > { %911 = vmatprep.mubr.f32.mxu0 %v3267_v13  ;;  %1360 = vmatprep.mubr.f32.mxu1 %v3267_v13 }
 0x136   : > { %2548 = vmatmul.mubr.msk.f32.gmra.mrb[64].mxu0 %vm449_vm4, %v401_v52  ;;  %2614 = vmatmul.mubr.msk.f32.gmra.mrb[64].mxu1 %vm449_vm4, %v401_v52 }
 0x137   : > { %917 = vmatprep.mubr.f32.mxu0 %v3267_v13  ;;  %1366 = vmatprep.mubr.f32.mxu1 %v3267_v13 }
 0x13a   : > { %2549 = vmatmul.mubr.msk.f32.gmra.mrb[66].mxu0 %vm449_vm4, %v402_v54  ;;  %2615 = vmatmul.mubr.msk.f32.gmra.mrb[66].mxu1 %vm449_vm4, %v402_v54 }
 0x13b   : > { %923 = vmatprep.mubr.f32.mxu0 %v3267_v13  ;;  %1372 = vmatprep.mubr.f32.mxu1 %v3267_v13 }
 0x13e   : > { %2550 = vmatmul.mubr.msk.f32.gmra.mrb[68].mxu0 %vm449_vm4, %v403_v56  ;;  %2616 = vmatmul.mubr.msk.f32.gmra.mrb[68].mxu1 %vm449_vm4, %v403_v56 }
 0x13f   : > { %929 = vmatprep.mubr.f32.mxu0 %v3267_v13  ;;  %1378 = vmatprep.mubr.f32.mxu1 %v3267_v13 }
 0x142   : > { %2551 = vmatmul.mubr.msk.f32.gmra.mrb[70].mxu0 %vm449_vm4, %v404_v58  ;;  %2617 = vmatmul.mubr.msk.f32.gmra.mrb[70].mxu1 %vm449_vm4, %v404_v58 }
 0x143   : > { %935 = vmatprep.mubr.f32.mxu0 %v3267_v13  ;;  %1384 = vmatprep.mubr.f32.mxu1 %v3267_v13 }
 0x146   : > { %2552 = vmatmul.mubr.msk.f32.gmra.mrb[72].mxu0 %vm449_vm4, %v405_v60  ;;  %2618 = vmatmul.mubr.msk.f32.gmra.mrb[72].mxu1 %vm449_vm4, %v405_v60 }
 0x147   : > { %941 = vmatprep.mubr.f32.mxu0 %v3267_v13  ;;  %1390 = vmatprep.mubr.f32.mxu1 %v3267_v13 }
 0x14a   : > { %2553 = vmatmul.mubr.msk.f32.gmra.mrb[74].mxu0 %vm449_vm4, %v406_v62  ;;  %2619 = vmatmul.mubr.msk.f32.gmra.mrb[74].mxu1 %vm449_vm4, %v406_v62 }
 0x14b   : > { %947 = vmatprep.mubr.f32.mxu0 %v3267_v13  ;;  %1396 = vmatprep.mubr.f32.mxu1 %v3267_v13 }
 0x14e   : > { %2554 = vmatmul.mubr.msk.f32.gmra.mrb[76].mxu0 %vm449_vm4, %v407_v63  ;;  %2620 = vmatmul.mubr.msk.f32.gmra.mrb[76].mxu1 %vm449_vm4, %v407_v63 }
 0x14f   : > { %953 = vmatprep.mubr.f32.mxu0 %v3267_v13  ;;  %1402 = vmatprep.mubr.f32.mxu1 %v3267_v13 }
 0x152   : > { %2555 = vmatmul.mubr.msk.f32.gmra.mrb[78].mxu0 %vm449_vm4, %v408_v2  ;;  %2621 = vmatmul.mubr.msk.f32.gmra.mrb[78].mxu1 %vm449_vm4, %v408_v2 }
 0x153   : > { %959 = vmatprep.mubr.f32.mxu0 %v3267_v13  ;;  %1408 = vmatprep.mubr.f32.mxu1 %v3267_v13 }
 0x156   : > { %2556 = vmatmul.mubr.msk.f32.gmra.mrb[80].mxu0 %vm449_vm4, %v409_v3  ;;  %2622 = vmatmul.mubr.msk.f32.gmra.mrb[80].mxu1 %vm449_vm4, %v409_v3 }
 0x157   : > { %965 = vmatprep.mubr.f32.mxu0 %v3267_v13  ;;  %1414 = vmatprep.mubr.f32.mxu1 %v3267_v13 }
 0x15a   : > { %2557 = vmatmul.mubr.msk.f32.gmra.mrb[82].mxu0 %vm449_vm4, %v410_v4  ;;  %2623 = vmatmul.mubr.msk.f32.gmra.mrb[82].mxu1 %vm449_vm4, %v410_v4 }
 0x15b   : > { %971 = vmatprep.mubr.f32.mxu0 %v3267_v13  ;;  %1420 = vmatprep.mubr.f32.mxu1 %v3267_v13 }
 0x15e   : > { %2558 = vmatmul.mubr.msk.f32.gmra.mrb[84].mxu0 %vm449_vm4, %v411_v6  ;;  %2624 = vmatmul.mubr.msk.f32.gmra.mrb[84].mxu1 %vm449_vm4, %v411_v6 }
 0x15f   : > { %977 = vmatprep.mubr.f32.mxu0 %v3267_v13  ;;  %1426 = vmatprep.mubr.f32.mxu1 %v3267_v13 }
 0x162   : > { %2559 = vmatmul.mubr.msk.f32.gmra.mrb[86].mxu0 %vm449_vm4, %v412_v8  ;;  %2625 = vmatmul.mubr.msk.f32.gmra.mrb[86].mxu1 %vm449_vm4, %v412_v8 }
 0x163   : > { %983 = vmatprep.mubr.f32.mxu0 %v3267_v13  ;;  %1432 = vmatprep.mubr.f32.mxu1 %v3267_v13 }
 0x166   : > { %2560 = vmatmul.mubr.msk.f32.gmra.mrb[88].mxu0 %vm449_vm4, %v413_v10  ;;  %2626 = vmatmul.mubr.msk.f32.gmra.mrb[88].mxu1 %vm449_vm4, %v413_v10 }
 0x167   : > { %989 = vmatprep.mubr.f32.mxu0 %v3267_v13  ;;  %1438 = vmatprep.mubr.f32.mxu1 %v3267_v13 }
 0x16a   : > { %2561 = vmatmul.mubr.msk.f32.gmra.mrb[90].mxu0 %vm449_vm4, %v414_v12  ;;  %2627 = vmatmul.mubr.msk.f32.gmra.mrb[90].mxu1 %vm449_vm4, %v414_v12 }
 0x16b   : > { %995 = vmatprep.mubr.f32.mxu0 %v3267_v13  ;;  %1444 = vmatprep.mubr.f32.mxu1 %v3267_v13 }
 0x16e   : > { %2562 = vmatmul.mubr.msk.f32.gmra.mrb[92].mxu0 %vm449_vm4, %v415_v15  ;;  %2628 = vmatmul.mubr.msk.f32.gmra.mrb[92].mxu1 %vm449_vm4, %v415_v15 }
 0x16f   : > { %1001 = vmatprep.mubr.f32.mxu0 %v3267_v13  ;;  %1450 = vmatprep.mubr.f32.mxu1 %v3267_v13 }
 0x172   : > { %2563 = vmatmul.mubr.msk.f32.gmra.mrb[94].mxu0 %vm449_vm4, %v416_v17  ;;  %2629 = vmatmul.mubr.msk.f32.gmra.mrb[94].mxu1 %vm449_vm4, %v416_v17 }
 0x173   : > { %1007 = vmatprep.mubr.f32.mxu0 %v3267_v13  ;;  %1456 = vmatprep.mubr.f32.mxu1 %v3267_v13 }
 0x176   : > { %2564 = vmatmul.mubr.msk.f32.gmra.mrb[96].mxu0 %vm449_vm4, %v433_v5  ;;  %2630 = vmatmul.mubr.msk.f32.gmra.mrb[96].mxu1 %vm449_vm4, %v433_v5 }
 0x177   : > { %1013 = vmatprep.mubr.f32.mxu0 %v3267_v13  ;;  %1462 = vmatprep.mubr.f32.mxu1 %v3267_v13 }
 0x17a   : > { %2565 = vmatmul.mubr.msk.f32.gmra.mrb[98].mxu0 %vm449_vm4, %v434_v7  ;;  %2631 = vmatmul.mubr.msk.f32.gmra.mrb[98].mxu1 %vm449_vm4, %v434_v7 }
 0x17b   : > { %1019 = vmatprep.mubr.f32.mxu0 %v3267_v13  ;;  %1468 = vmatprep.mubr.f32.mxu1 %v3267_v13 }
 0x17e   : > { %2566 = vmatmul.mubr.msk.f32.gmra.mrb[100].mxu0 %vm449_vm4, %v435_v9  ;;  %2632 = vmatmul.mubr.msk.f32.gmra.mrb[100].mxu1 %vm449_vm4, %v435_v9 }
 0x17f   : > { %1025 = vmatprep.mubr.f32.mxu0 %v3267_v13  ;;  %1474 = vmatprep.mubr.f32.mxu1 %v3267_v13 }
 0x182   : > { %2567 = vmatmul.mubr.msk.f32.gmra.mrb[102].mxu0 %vm449_vm4, %v436_v11  ;;  %2633 = vmatmul.mubr.msk.f32.gmra.mrb[102].mxu1 %vm449_vm4, %v436_v11 }
 0x183   : > { %1031 = vmatprep.mubr.f32.mxu0 %v3267_v13  ;;  %1480 = vmatprep.mubr.f32.mxu1 %v3267_v13 }
 0x186   : > { %2568 = vmatmul.mubr.msk.f32.gmra.mrb[104].mxu0 %vm449_vm4, %v437_v14  ;;  %2634 = vmatmul.mubr.msk.f32.gmra.mrb[104].mxu1 %vm449_vm4, %v437_v14 }
 0x187   : > { %1037 = vmatprep.mubr.f32.mxu0 %v3267_v13  ;;  %1486 = vmatprep.mubr.f32.mxu1 %v3267_v13 }
 0x189   : > { %v721_v23 = vpop.f32.mrb[0].mxu0  ;;  %v1170_v24 = vpop.f32.mrb[0].mxu1 }
 0x18a   : > { %v1553_v25 = vmul.f32 1.442695, %v721_v23  ;;  %v1557_v26 = vmul.f32 1.442695, %v1170_v24  ;;  %v723_v27 = vpop.f32.mrb[1].mxu0  ;;  %v1172_v28 = vpop.f32.mrb[1].mxu1  ;;  %2569 = vmatmul.mubr.msk.f32.gmra.mrb[106].mxu0 %vm449_vm4, %v438_v16  ;;  %2635 = vmatmul.mubr.msk.f32.gmra.mrb[106].mxu1 %vm449_vm4, %v438_v16 }
 0x18b   : > { %v1555_v29 = vmul.f32 1.442695, %v723_v27  ;;  %v1559_v30 = vmul.f32 1.442695, %v1172_v28  ;;  %1043 = vmatprep.mubr.f32.mxu0 %v3267_v13  ;;  %1492 = vmatprep.mubr.f32.mxu1 %v3267_v13  ;;  %v446_v28 = vpop.trf.xlu1 }
 0x18c   : > { %2701 = vpow2.f32 %v1553_v25 }
 0x18d   : > { %2703 = vpow2.f32 %v1557_v26  ;;  %v727_v31 = vpop.f32.mrb[2].mxu0  ;;  %v1176_v32 = vpop.f32.mrb[2].mxu1 }
 0x18e   : > { %2705 = vpow2.f32 %v1555_v29  ;;  %v1561_v33 = vmul.f32 1.442695, %v727_v31  ;;  %v1565_v34 = vmul.f32 1.442695, %v1176_v32  ;;  %v729_v35 = vpop.f32.mrb[3].mxu0  ;;  %v1178_v36 = vpop.f32.mrb[3].mxu1  ;;  %2570 = vmatmul.mubr.msk.f32.gmra.mrb[108].mxu0 %vm449_vm4, %v439_v18  ;;  %2636 = vmatmul.mubr.msk.f32.gmra.mrb[108].mxu1 %vm449_vm4, %v439_v18 }
 0x18f   : > { %2707 = vpow2.f32 %v1559_v30  ;;  %v1563_v37 = vmul.f32 1.442695, %v729_v35  ;;  %v1567_v38 = vmul.f32 1.442695, %v1178_v36  ;;  %1049 = vmatprep.mubr.f32.mxu0 %v3267_v13  ;;  %1498 = vmatprep.mubr.f32.mxu1 %v3267_v13 }
 0x190   : > { %2709 = vpow2.f32 %v1561_v33 }
 0x191   : > { %2711 = vpow2.f32 %v1565_v34  ;;  %v733_v40 = vpop.f32.mrb[4].mxu0  ;;  %v1182_v41 = vpop.f32.mrb[4].mxu1 }
 0x192   : > { %2713 = vpow2.f32 %v1563_v37  ;;  %2571 = vmatmul.mubr.msk.f32.gmra.mrb[110].mxu0 %vm449_vm4, %v440_v19  ;;  %2637 = vmatmul.mubr.msk.f32.gmra.mrb[110].mxu1 %vm449_vm4, %v440_v19  ;;  %v1569_v42 = vmul.f32 1.442695, %v733_v40  ;;  %v1573_v43 = vmul.f32 1.442695, %v1182_v41  ;;  %v735_v44 = vpop.f32.mrb[5].mxu0  ;;  %v1184_v45 = vpop.f32.mrb[5].mxu1 }
 0x193   : > { %2715 = vpow2.f32 %v1567_v38  ;;  %v1571_v46 = vmul.f32 1.442695, %v735_v44  ;;  %v1575_v47 = vmul.f32 1.442695, %v1184_v45  ;;  %1055 = vmatprep.mubr.f32.mxu0 %v3267_v13  ;;  %1504 = vmatprep.mubr.f32.mxu1 %v3267_v13 }
 0x194   : > { %2717 = vpow2.f32 %v1569_v42 }
 0x195   : > { %2719 = vpow2.f32 %v1573_v43  ;;  %v739_v48 = vpop.f32.mrb[6].mxu0  ;;  %v1188_v49 = vpop.f32.mrb[6].mxu1 }
 0x196   : > { %v2702_v50 = vpop.eup %2701  ;;  %2721 = vpow2.f32 %v1571_v46  ;;  %v1577_v51 = vmul.f32 1.442695, %v739_v48  ;;  %v1581_v52 = vmul.f32 1.442695, %v1188_v49  ;;  %v741_v53 = vpop.f32.mrb[7].mxu0  ;;  %2572 = vmatmul.mubr.msk.f32.gmra.mrb[112].mxu0 %vm449_vm4, %v3572_v20  ;;  %2638 = vmatmul.mubr.msk.f32.gmra.mrb[112].mxu1 %vm449_vm4, %v3572_v20 }
 0x197   : > { %v1190_v54 = vpop.f32.mrb[7].mxu1  ;;  %v2704_v55 = vpop.eup %2703  ;;  %2723 = vpow2.f32 %v1575_v47  ;;  %v1579_v56 = vmul.f32 1.442695, %v741_v53  ;;  %1061 = vmatprep.mubr.f32.mxu0 %v3267_v13  ;;  %1510 = vmatprep.mubr.f32.mxu1 %v3267_v13 }
 0x198   : > { %v1583_v57 = vmul.f32 1.442695, %v1190_v54  ;;  %v2706_v58 = vpop.eup %2705  ;;  %2725 = vpow2.f32 %v1577_v51 }
 0x199   : > { %v2708_v60 = vpop.eup %2707  ;;  %2727 = vpow2.f32 %v1581_v52  ;;  %v745_v61 = vpop.f32.mrb[8].mxu0 }
 0x19a   : > { %v1194_v62 = vpop.f32.mrb[8].mxu1  ;;  %v2710_v63 = vpop.eup %2709  ;;  %2729 = vpow2.f32 %v1579_v56  ;;  %2573 = vmatmul.mubr.msk.f32.gmra.mrb[114].mxu0 %vm449_vm4, %v3580_v21  ;;  %2639 = vmatmul.mubr.msk.f32.gmra.mrb[114].mxu1 %vm449_vm4, %v3580_v21  ;;  %v1585_v2 = vmul.f32 1.442695, %v745_v61 }
 0x19b   : > { %v1589_v3 = vmul.f32 1.442695, %v1194_v62  ;;  %v747_v4 = vpop.f32.mrb[9].mxu0  ;;  %v1196_v5 = vpop.f32.mrb[9].mxu1  ;;  %2731 = vpow2.f32 %v1583_v57  ;;  %1067 = vmatprep.mubr.f32.mxu0 %v3267_v13  ;;  %1516 = vmatprep.mubr.f32.mxu1 %v3267_v13  ;;  %v2065_v7 = vpack.c.bf16 %v2710_v63, %v2702_v50 }
 0x19c   : > { %v2712_v6 = vpop.eup %2711  ;;  %v1587_v8 = vmul.f32 1.442695, %v747_v4  ;;  %v1591_v9 = vmul.f32 1.442695, %v1196_v5  ;;  %2733 = vpow2.f32 %v1585_v2  ;;  %v447_v56 = vpop.trf.xlu1 }
 0x19d   : > { %v2714_v10 = vpop.eup %2713  ;;  %v2067_v11 = vpack.c.bf16 %v2712_v6, %v2704_v55  ;;  %2735 = vpow2.f32 %v1589_v3  ;;  %v751_v15 = vpop.f32.mrb[10].mxu0 }
 0x19e   : > { %v2716_v12 = vpop.eup %2715  ;;  %v2066_v14 = vpack.c.bf16 %v2714_v10, %v2706_v58  ;;  %v1200_v16 = vpop.f32.mrb[10].mxu1  ;;  %2574 = vmatmul.mubr.msk.f32.gmra.mrb[116].mxu0 %vm449_vm4, %v3588_v22  ;;  %2640 = vmatmul.mubr.msk.f32.gmra.mrb[116].mxu1 %vm449_vm4, %v3588_v22  ;;  %2737 = vpow2.f32 %v1587_v8  ;;  %v1593_v19 = vmul.f32 1.442695, %v751_v15 }
 0x19f   : > { %v3618_v17 = vpop.eup %2717  ;;  %v2068_v18 = vpack.c.bf16 %v2716_v12, %v2708_v60  ;;  %v1597_v20 = vmul.f32 1.442695, %v1200_v16  ;;  %v753_v21 = vpop.f32.mrb[11].mxu0  ;;  %1073 = vmatprep.mubr.f32.mxu0 %v3267_v13  ;;  %2739 = vpow2.f32 %v1591_v9  ;;  %1522 = vmatprep.mubr.f32.mxu1 %v3267_v13 }
 0x1a0   : > { %v1202_v23 = vpop.f32.mrb[11].mxu1  ;;  %v2720_v24 = vpop.eup %2719  ;;  %2194 = vmatprep.subr.bf16.mxu0 %v2066_v14  ;;  %v1595_v25 = vmul.f32 1.442695, %v753_v21  ;;  %2741 = vpow2.f32 %v1593_v19 }
 0x1a1   : > { %v1599_v26 = vmul.f32 1.442695, %v1202_v23  ;;  %v2722_v27 = vpop.eup %2721  ;;  %2276 = vmatprep.subr.bf16.mxu1 %v2068_v18  ;;  %2195 = vmatpush1.bf16.msra.mxu0 %v2065_v7  ;;  %2743 = vpow2.f32 %v1597_v20  ;;  %v757_v22 = vpop.f32.mrb[12].mxu0 }
 0x1a2   : > { %v2724_v29 = vpop.eup %2723  ;;  %2277 = vmatpush1.bf16.msra.mxu1 %v2067_v11  ;;  %v1206_v30 = vpop.f32.mrb[12].mxu1  ;;  %2575 = vmatmul.mubr.msk.f32.gmra.mrb[118].mxu0 %vm449_vm4, %v3598_v39  ;;  %2745 = vpow2.f32 %v1595_v25  ;;  %v1601_v32 = vmul.f32 1.442695, %v757_v22 }
 0x1a3   : > { %v2726_v31 = vpop.eup %2725  ;;  %2641 = vmatmul.mubr.msk.f32.gmra.mrb[118].mxu1 %vm449_vm4, %v3598_v39  ;;  %v1605_v33 = vmul.f32 1.442695, %v1206_v30  ;;  %v759_v34 = vpop.f32.mrb[13].mxu0  ;;  %1079 = vmatprep.mubr.f32.mxu0 %v3267_v13  ;;  %2747 = vpow2.f32 %v1599_v26 }
 0x1a4   : > { %v1208_v35 = vpop.f32.mrb[13].mxu1  ;;  %v2728_v36 = vpop.eup %2727  ;;  %1528 = vmatprep.mubr.f32.mxu1 %v3267_v13  ;;  %v2069_v37 = vpack.c.bf16 %v2726_v31, %v3618_v17  ;;  %v1603_v38 = vmul.f32 1.442695, %v759_v34  ;;  %2749 = vpow2.f32 %v1601_v32 }
 0x1a5   : > { %v1607_v40 = vmul.f32 1.442695, %v1208_v35  ;;  %v2730_v41 = vpop.eup %2729  ;;  %v2071_v42 = vpack.c.bf16 %v2728_v36, %v2720_v24  ;;  %2751 = vpow2.f32 %v1605_v33  ;;  %v763_v44 = vpop.f32.mrb[14].mxu0  ;;  %v3268_v36 = vmov 1065369472  }
 0x1a6   : > { %v2732_v43 = vpop.eup %2731  ;;  %v2070_v39 = vpack.c.bf16 %v2730_v41, %v2722_v27  ;;  %v1212_v45 = vpop.f32.mrb[14].mxu1  ;;  %2576 = vmatmul.mubr.msk.f32.gmra.mrb[120].mxu0 %vm449_vm4, %v3610_v59  ;;  %2753 = vpow2.f32 %v1603_v38  ;;  %v1609_v48 = vmul.f32 1.442695, %v763_v44 }
 0x1a7   : > { %v3633_v46 = vpop.eup %2733  ;;  %2642 = vmatmul.mubr.msk.f32.gmra.mrb[120].mxu1 %vm449_vm4, %v3610_v59  ;;  %v2072_v47 = vpack.c.bf16 %v2732_v43, %v2724_v29  ;;  %v1613_v49 = vmul.f32 1.442695, %v1212_v45  ;;  %v765_v50 = vpop.f32.mrb[15].mxu0  ;;  %1085 = vmatprep.mubr.f32.mxu0 %v3267_v13  ;;  %2755 = vpow2.f32 %v1607_v40 }
 0x1a8   : > { %v1214_v51 = vpop.f32.mrb[15].mxu1  ;;  %v2736_v52 = vpop.eup %2735  ;;  %2196 = vmatprep.subr.bf16.mxu0 %v2070_v39  ;;  %v1611_v53 = vmul.f32 1.442695, %v765_v50  ;;  %2757 = vpow2.f32 %v1609_v48  ;;  %1534 = vmatprep.mubr.f32.mxu1 %v3267_v13 }
 0x1a9   : > { %v1615_v54 = vmul.f32 1.442695, %v1214_v51  ;;  %v2738_v55 = vpop.eup %2737  ;;  %2278 = vmatprep.subr.bf16.mxu1 %v2072_v47  ;;  %2197 = vmatpush1.bf16.msra.mxu0 %v2069_v37  ;;  %2759 = vpow2.f32 %v1613_v49  ;;  %v769_v58 = vpop.f32.mrb[16].mxu0 }
 0x1aa   : > { %v2740_v57 = vpop.eup %2739  ;;  %2279 = vmatpush1.bf16.msra.mxu1 %v2071_v42  ;;  %v1218_v59 = vpop.f32.mrb[16].mxu1  ;;  %2577 = vmatmul.mubr.msk.f32.gmra.mrb[122].mxu0 %vm449_vm4, %v446_v28  ;;  %2761 = vpow2.f32 %v1611_v53  ;;  %v1617_v61 = vmul.f32 1.442695, %v769_v58 }
 0x1ab   : > { %v2742_v60 = vpop.eup %2741  ;;  %2643 = vmatmul.mubr.msk.f32.gmra.mrb[122].mxu1 %vm449_vm4, %v446_v28  ;;  %v1621_v62 = vmul.f32 1.442695, %v1218_v59  ;;  %v771_v63 = vpop.f32.mrb[17].mxu0  ;;  %1091 = vmatprep.mubr.f32.mxu0 %v3267_v13  ;;  %2763 = vpow2.f32 %v1615_v54 }
 0x1ac   : > { %v1220_v2 = vpop.f32.mrb[17].mxu1  ;;  %v2744_v3 = vpop.eup %2743  ;;  %1540 = vmatprep.mubr.f32.mxu1 %v3267_v13  ;;  %v2073_v4 = vpack.c.bf16 %v2742_v60, %v3633_v46  ;;  %v1619_v5 = vmul.f32 1.442695, %v771_v63  ;;  %2765 = vpow2.f32 %v1617_v61 }
 0x1ad   : > { %v1623_v6 = vmul.f32 1.442695, %v1220_v2  ;;  %v2746_v7 = vpop.eup %2745  ;;  %v2075_v8 = vpack.c.bf16 %v2744_v3, %v2736_v52  ;;  %2767 = vpow2.f32 %v1621_v62  ;;  %v775_v11 = vpop.f32.mrb[18].mxu0 }
 0x1ae   : > { %v2748_v9 = vpop.eup %2747  ;;  %v2074_v10 = vpack.c.bf16 %v2746_v7, %v2738_v55  ;;  %v1224_v12 = vpop.f32.mrb[18].mxu1  ;;  %2578 = vmatmul.mubr.msk.f32.gmra.mrb[124].mxu0 %vm449_vm4, %v447_v56  ;;  %2769 = vpow2.f32 %v1619_v5  ;;  %v1625_v16 = vmul.f32 1.442695, %v775_v11 }
 0x1af   : > { %v3646_v14 = vpop.eup %2749  ;;  %2644 = vmatmul.mubr.msk.f32.gmra.mrb[124].mxu1 %vm449_vm4, %v447_v56  ;;  %v2076_v15 = vpack.c.bf16 %v2748_v9, %v2740_v57  ;;  %v1629_v17 = vmul.f32 1.442695, %v1224_v12  ;;  %v777_v18 = vpop.f32.mrb[19].mxu0  ;;  %1097 = vmatprep.mubr.f32.mxu0 %v3267_v13  ;;  %2771 = vpow2.f32 %v1623_v6 }
 0x1b0   : > { %v1226_v19 = vpop.f32.mrb[19].mxu1  ;;  %v2752_v20 = vpop.eup %2751  ;;  %1546 = vmatprep.mubr.f32.mxu1 %v3267_v13  ;;  %v1627_v23 = vmul.f32 1.442695, %v777_v18  ;;  %2198 = vmatprep.subr.bf16.mxu0 %v2074_v10  ;;  %2773 = vpow2.f32 %v1625_v16 }
 0x1b1   : > { %v448_v21 = vpop.trf.xlu1  ;;  %v1631_v24 = vmul.f32 1.442695, %v1226_v19  ;;  %v2754_v25 = vpop.eup %2753  ;;  %2280 = vmatprep.subr.bf16.mxu1 %v2076_v15  ;;  %2199 = vmatpush1.bf16.msra.mxu0 %v2073_v4  ;;  %2775 = vpow2.f32 %v1629_v17 }
 0x1b2   : > { %v2756_v26 = vpop.eup %2755  ;;  %2281 = vmatpush1.bf16.msra.mxu1 %v2075_v8  ;;  %v781_v27 = vpop.f32.mrb[20].mxu0  ;;  %2579 = vmatmul.mubr.msk.f32.gmra.mrb[126].mxu0 %vm449_vm4, %v448_v21  ;;  %2777 = vpow2.f32 %v1627_v23 }
 0x1b3   : > { %v1230_v28 = vpop.f32.mrb[20].mxu1  ;;  %v2758_v29 = vpop.eup %2757  ;;  %2645 = vmatmul.mubr.msk.f32.gmra.mrb[126].mxu1 %vm449_vm4, %v448_v21  ;;  %v1633_v13 = vmul.f32 1.442695, %v781_v27  ;;  %2779 = vpow2.f32 %v1631_v24  ;;  %2226 = vmatprep.mubr.bf16.mxu0 %v3268_v36 }
 0x1b4   : > { %v1637_v22 = vmul.f32 1.442695, %v1230_v28  ;;  %v783_v30 = vpop.f32.mrb[21].mxu0  ;;  %v1232_v31 = vpop.f32.mrb[21].mxu1  ;;  %v2077_v33 = vpack.c.bf16 %v2758_v29, %v3646_v14  ;;  %2308 = vmatprep.mubr.bf16.mxu1 %v3268_v36 }
 0x1b5   : > { %v2760_v32 = vpop.eup %2759  ;;  %v1635_v34 = vmul.f32 1.442695, %v783_v30  ;;  %v1639_v35 = vmul.f32 1.442695, %v1232_v31  ;;  %2781 = vpow2.f32 %v1633_v13  ;;  %v787_v42 = vpop.f32.mrb[22].mxu0 }
 0x1b6   : > { %v2762_v37 = vpop.eup %2761  ;;  %v2079_v38 = vpack.c.bf16 %v2760_v32, %v2752_v20  ;;  %2783 = vpow2.f32 %v1637_v22  ;;  %v1236_v43 = vpop.f32.mrb[22].mxu1  ;;  %v1641_v45 = vmul.f32 1.442695, %v787_v42 }
 0x1b7   : > { %v2764_v40 = vpop.eup %2763  ;;  %v2078_v41 = vpack.c.bf16 %v2762_v37, %v2754_v25  ;;  %2785 = vpow2.f32 %v1635_v34  ;;  %v1645_v46 = vmul.f32 1.442695, %v1236_v43  ;;  %v789_v47 = vpop.f32.mrb[23].mxu0 }
 0x1b8   : > { %v2766_v39 = vpop.eup %2765  ;;  %v2080_v44 = vpack.c.bf16 %v2764_v40, %v2756_v26  ;;  %v1238_v48 = vpop.f32.mrb[23].mxu1  ;;  %2787 = vpow2.f32 %v1639_v35  ;;  %v1643_v50 = vmul.f32 1.442695, %v789_v47 }
 0x1b9   : > { %v2768_v49 = vpop.eup %2767  ;;  %2200 = vmatprep.subr.bf16.mxu0 %v2078_v41  ;;  %v1647_v51 = vmul.f32 1.442695, %v1238_v48  ;;  %2789 = vpow2.f32 %v1641_v45  ;;  %v793_v54 = vpop.f32.mrb[24].mxu0 }
 0x1ba   : > { %v2770_v52 = vpop.eup %2769  ;;  %2282 = vmatprep.subr.bf16.mxu1 %v2080_v44  ;;  %2201 = vmatpush1.bf16.msra.mxu0 %v2077_v33  ;;  %2791 = vpow2.f32 %v1645_v46  ;;  %v1242_v55 = vpop.f32.mrb[24].mxu1  ;;  %v1649_v57 = vmul.f32 1.442695, %v793_v54 }
 0x1bb   : > { %v2772_v53 = vpop.eup %2771  ;;  %2283 = vmatpush1.bf16.msra.mxu1 %v2079_v38  ;;  %2793 = vpow2.f32 %v1643_v50  ;;  %v1653_v58 = vmul.f32 1.442695, %v1242_v55  ;;  %v795_v59 = vpop.f32.mrb[25].mxu0 }
 0x1bc   : > { %v2774_v56 = vpop.eup %2773  ;;  %v1244_v60 = vpop.f32.mrb[25].mxu1  ;;  %2795 = vpow2.f32 %v1647_v51  ;;  %v1651_v63 = vmul.f32 1.442695, %v795_v59 }
 0x1bd   : > { %v2776_v61 = vpop.eup %2775  ;;  %v2081_v62 = vpack.c.bf16 %v2774_v56, %v2766_v39  ;;  %v1655_v2 = vmul.f32 1.442695, %v1244_v60  ;;  %2797 = vpow2.f32 %v1649_v57  ;;  %v799_v7 = vpop.f32.mrb[26].mxu0 }
 0x1be   : > { %v2778_v3 = vpop.eup %2777  ;;  %v2083_v4 = vpack.c.bf16 %v2776_v61, %v2768_v49  ;;  %2799 = vpow2.f32 %v1653_v58  ;;  %v1248_v8 = vpop.f32.mrb[26].mxu1  ;;  %v1657_v11 = vmul.f32 1.442695, %v799_v7 }
 0x1bf   : > { %v2780_v5 = vpop.eup %2779  ;;  %v2082_v6 = vpack.c.bf16 %v2778_v3, %v2770_v52  ;;  %2801 = vpow2.f32 %v1651_v63  ;;  %v1661_v12 = vmul.f32 1.442695, %v1248_v8  ;;  %v801_v14 = vpop.f32.mrb[27].mxu0 }
 0x1c0   : > { %v2782_v9 = vpop.eup %2781  ;;  %v2084_v10 = vpack.c.bf16 %v2780_v5, %v2772_v53  ;;  %v1250_v15 = vpop.f32.mrb[27].mxu1  ;;  %2803 = vpow2.f32 %v1655_v2  ;;  %v1659_v17 = vmul.f32 1.442695, %v801_v14 }
 0x1c1   : > { %v2784_v16 = vpop.eup %2783  ;;  %2202 = vmatprep.subr.bf16.mxu0 %v2082_v6  ;;  %v1663_v18 = vmul.f32 1.442695, %v1250_v15  ;;  %2805 = vpow2.f32 %v1657_v11  ;;  %v805_v21 = vpop.f32.mrb[28].mxu0 }
 0x1c2   : > { %v2786_v19 = vpop.eup %2785  ;;  %2284 = vmatprep.subr.bf16.mxu1 %v2084_v10  ;;  %2203 = vmatpush1.bf16.msra.mxu0 %v2081_v62  ;;  %2807 = vpow2.f32 %v1661_v12  ;;  %v1254_v23 = vpop.f32.mrb[28].mxu1  ;;  %v1665_v25 = vmul.f32 1.442695, %v805_v21 }
 0x1c3   : > { %v2788_v20 = vpop.eup %2787  ;;  %2285 = vmatpush1.bf16.msra.mxu1 %v2083_v4  ;;  %2809 = vpow2.f32 %v1659_v17  ;;  %v1669_v26 = vmul.f32 1.442695, %v1254_v23  ;;  %v807_v27 = vpop.f32.mrb[29].mxu0 }
 0x1c4   : > { %v2790_v24 = vpop.eup %2789  ;;  %v1256_v28 = vpop.f32.mrb[29].mxu1  ;;  %2811 = vpow2.f32 %v1663_v18  ;;  %v1667_v22 = vmul.f32 1.442695, %v807_v27 }
 0x1c5   : > { %v2792_v29 = vpop.eup %2791  ;;  %v2085_v13 = vpack.c.bf16 %v2790_v24, %v2782_v9  ;;  %v1671_v30 = vmul.f32 1.442695, %v1256_v28  ;;  %2813 = vpow2.f32 %v1665_v25  ;;  %v811_v35 = vpop.f32.mrb[30].mxu0 }
 0x1c6   : > { %v2794_v31 = vpop.eup %2793  ;;  %v2087_v32 = vpack.c.bf16 %v2792_v29, %v2784_v16  ;;  %2815 = vpow2.f32 %v1669_v26  ;;  %v1260_v37 = vpop.f32.mrb[30].mxu1  ;;  %v1673_v41 = vmul.f32 1.442695, %v811_v35 }
 0x1c7   : > { %v2796_v33 = vpop.eup %2795  ;;  %v2086_v34 = vpack.c.bf16 %v2794_v31, %v2786_v19  ;;  %2817 = vpow2.f32 %v1667_v22  ;;  %v1677_v42 = vmul.f32 1.442695, %v1260_v37  ;;  %v813_v43 = vpop.f32.mrb[31].mxu0 }
 0x1c8   : > { %v2798_v38 = vpop.eup %2797  ;;  %v2088_v40 = vpack.c.bf16 %v2796_v33, %v2788_v20  ;;  %v1262_v39 = vpop.f32.mrb[31].mxu1  ;;  %2819 = vpow2.f32 %v1671_v30  ;;  %v1675_v45 = vmul.f32 1.442695, %v813_v43 }
 0x1c9   : > { %v2800_v44 = vpop.eup %2799  ;;  %2204 = vmatprep.subr.bf16.mxu0 %v2086_v34  ;;  %v1679_v46 = vmul.f32 1.442695, %v1262_v39  ;;  %2821 = vpow2.f32 %v1673_v41  ;;  %v817_v49 = vpop.f32.mrb[32].mxu0 }
 0x1ca   : > { %v2802_v47 = vpop.eup %2801  ;;  %2286 = vmatprep.subr.bf16.mxu1 %v2088_v40  ;;  %2205 = vmatpush1.bf16.msra.mxu0 %v2085_v13  ;;  %2823 = vpow2.f32 %v1677_v42  ;;  %v1266_v50 = vpop.f32.mrb[32].mxu1  ;;  %v1681_v52 = vmul.f32 1.442695, %v817_v49 }
 0x1cb   : > { %v2804_v48 = vpop.eup %2803  ;;  %2287 = vmatpush1.bf16.msra.mxu1 %v2087_v32  ;;  %2825 = vpow2.f32 %v1675_v45  ;;  %v1685_v53 = vmul.f32 1.442695, %v1266_v50  ;;  %v819_v54 = vpop.f32.mrb[33].mxu0 }
 0x1cc   : > { %v2806_v51 = vpop.eup %2805  ;;  %v1268_v55 = vpop.f32.mrb[33].mxu1  ;;  %2827 = vpow2.f32 %v1679_v46  ;;  %v1683_v58 = vmul.f32 1.442695, %v819_v54 }
 0x1cd   : > { %v2808_v56 = vpop.eup %2807  ;;  %v2089_v57 = vpack.c.bf16 %v2806_v51, %v2798_v38  ;;  %v1687_v59 = vmul.f32 1.442695, %v1268_v55  ;;  %2829 = vpow2.f32 %v1681_v52  ;;  %v823_v2 = vpop.f32.mrb[34].mxu0 }
 0x1ce   : > { %v2810_v60 = vpop.eup %2809  ;;  %v2091_v61 = vpack.c.bf16 %v2808_v56, %v2800_v44  ;;  %2831 = vpow2.f32 %v1685_v53  ;;  %v1272_v3 = vpop.f32.mrb[34].mxu1  ;;  %v1689_v6 = vmul.f32 1.442695, %v823_v2 }
 0x1cf   : > { %v2812_v62 = vpop.eup %2811  ;;  %v2090_v63 = vpack.c.bf16 %v2810_v60, %v2802_v47  ;;  %2833 = vpow2.f32 %v1683_v58  ;;  %v1693_v7 = vmul.f32 1.442695, %v1272_v3  ;;  %v825_v8 = vpop.f32.mrb[35].mxu0 }
 0x1d0   : > { %v2814_v4 = vpop.eup %2813  ;;  %v2092_v5 = vpack.c.bf16 %v2812_v62, %v2804_v48  ;;  %v1274_v9 = vpop.f32.mrb[35].mxu1  ;;  %2835 = vpow2.f32 %v1687_v59  ;;  %v1691_v11 = vmul.f32 1.442695, %v825_v8 }
 0x1d1   : > { %v2816_v10 = vpop.eup %2815  ;;  %2206 = vmatprep.subr.bf16.mxu0 %v2090_v63  ;;  %v1695_v12 = vmul.f32 1.442695, %v1274_v9  ;;  %2837 = vpow2.f32 %v1689_v6  ;;  %v829_v16 = vpop.f32.mrb[36].mxu0 }
 0x1d2   : > { %v2818_v14 = vpop.eup %2817  ;;  %2288 = vmatprep.subr.bf16.mxu1 %v2092_v5  ;;  %2207 = vmatpush1.bf16.msra.mxu0 %v2089_v57  ;;  %2839 = vpow2.f32 %v1693_v7  ;;  %v1278_v17 = vpop.f32.mrb[36].mxu1  ;;  %v1697_v19 = vmul.f32 1.442695, %v829_v16 }
 0x1d3   : > { %v2820_v15 = vpop.eup %2819  ;;  %2289 = vmatpush1.bf16.msra.mxu1 %v2091_v61  ;;  %2841 = vpow2.f32 %v1691_v11  ;;  %v1701_v20 = vmul.f32 1.442695, %v1278_v17  ;;  %v831_v21 = vpop.f32.mrb[37].mxu0 }
 0x1d4   : > { %v2822_v18 = vpop.eup %2821  ;;  %v1280_v23 = vpop.f32.mrb[37].mxu1  ;;  %2843 = vpow2.f32 %v1695_v12  ;;  %v1699_v26 = vmul.f32 1.442695, %v831_v21 }
 0x1d5   : > { %v2824_v24 = vpop.eup %2823  ;;  %v2093_v25 = vpack.c.bf16 %v2822_v18, %v2814_v4  ;;  %v1703_v27 = vmul.f32 1.442695, %v1280_v23  ;;  %2845 = vpow2.f32 %v1697_v19  ;;  %v835_v30 = vpop.f32.mrb[38].mxu0 }
 0x1d6   : > { %v2826_v28 = vpop.eup %2825  ;;  %v2095_v29 = vpack.c.bf16 %v2824_v24, %v2816_v10  ;;  %2847 = vpow2.f32 %v1701_v20  ;;  %v1284_v31 = vpop.f32.mrb[38].mxu1  ;;  %v1705_v34 = vmul.f32 1.442695, %v835_v30 }
 0x1d7   : > { %v2828_v13 = vpop.eup %2827  ;;  %v2094_v22 = vpack.c.bf16 %v2826_v28, %v2818_v14  ;;  %2849 = vpow2.f32 %v1699_v26  ;;  %v1709_v35 = vmul.f32 1.442695, %v1284_v31  ;;  %v837_v37 = vpop.f32.mrb[39].mxu0 }
 0x1d8   : > { %v2830_v32 = vpop.eup %2829  ;;  %v2096_v33 = vpack.c.bf16 %v2828_v13, %v2820_v15  ;;  %v1286_v38 = vpop.f32.mrb[39].mxu1  ;;  %2851 = vpow2.f32 %v1703_v27  ;;  %v1707_v41 = vmul.f32 1.442695, %v837_v37 }
 0x1d9   : > { %v2832_v40 = vpop.eup %2831  ;;  %2208 = vmatprep.subr.bf16.mxu0 %v2094_v22  ;;  %v1711_v42 = vmul.f32 1.442695, %v1286_v38  ;;  %2853 = vpow2.f32 %v1705_v34  ;;  %v841_v44 = vpop.f32.mrb[40].mxu0 }
 0x1da   : > { %v2834_v43 = vpop.eup %2833  ;;  %2290 = vmatprep.subr.bf16.mxu1 %v2096_v33  ;;  %2209 = vmatpush1.bf16.msra.mxu0 %v2093_v25  ;;  %2855 = vpow2.f32 %v1709_v35  ;;  %v1290_v45 = vpop.f32.mrb[40].mxu1  ;;  %v1713_v47 = vmul.f32 1.442695, %v841_v44 }
 0x1db   : > { %v2836_v39 = vpop.eup %2835  ;;  %2291 = vmatpush1.bf16.msra.mxu1 %v2095_v29  ;;  %2857 = vpow2.f32 %v1707_v41  ;;  %v1717_v48 = vmul.f32 1.442695, %v1290_v45  ;;  %v843_v49 = vpop.f32.mrb[41].mxu0 }
 0x1dc   : > { %v2838_v46 = vpop.eup %2837  ;;  %v1292_v50 = vpop.f32.mrb[41].mxu1  ;;  %2859 = vpow2.f32 %v1711_v42  ;;  %v1715_v53 = vmul.f32 1.442695, %v843_v49 }
 0x1dd   : > { %v2840_v51 = vpop.eup %2839  ;;  %v2097_v52 = vpack.c.bf16 %v2838_v46, %v2830_v32  ;;  %v1719_v54 = vmul.f32 1.442695, %v1292_v50  ;;  %2861 = vpow2.f32 %v1713_v47  ;;  %v847_v59 = vpop.f32.mrb[42].mxu0 }
 0x1de   : > { %v2842_v55 = vpop.eup %2841  ;;  %v2099_v56 = vpack.c.bf16 %v2840_v51, %v2832_v40  ;;  %2863 = vpow2.f32 %v1717_v48  ;;  %v1296_v60 = vpop.f32.mrb[42].mxu1  ;;  %v1721_v63 = vmul.f32 1.442695, %v847_v59 }
 0x1df   : > { %v2844_v57 = vpop.eup %2843  ;;  %v2098_v58 = vpack.c.bf16 %v2842_v55, %v2834_v43  ;;  %2865 = vpow2.f32 %v1715_v53  ;;  %v1725_v2 = vmul.f32 1.442695, %v1296_v60  ;;  %v849_v3 = vpop.f32.mrb[43].mxu0 }
 0x1e0   : > { %v2846_v61 = vpop.eup %2845  ;;  %v2100_v62 = vpack.c.bf16 %v2844_v57, %v2836_v39  ;;  %v1298_v4 = vpop.f32.mrb[43].mxu1  ;;  %2867 = vpow2.f32 %v1719_v54  ;;  %v1723_v6 = vmul.f32 1.442695, %v849_v3 }
 0x1e1   : > { %v2848_v5 = vpop.eup %2847  ;;  %2210 = vmatprep.subr.bf16.mxu0 %v2098_v58  ;;  %v1727_v7 = vmul.f32 1.442695, %v1298_v4  ;;  %2869 = vpow2.f32 %v1721_v63  ;;  %v853_v10 = vpop.f32.mrb[44].mxu0 }
 0x1e2   : > { %v2850_v8 = vpop.eup %2849  ;;  %2292 = vmatprep.subr.bf16.mxu1 %v2100_v62  ;;  %2211 = vmatpush1.bf16.msra.mxu0 %v2097_v52  ;;  %2871 = vpow2.f32 %v1725_v2  ;;  %v1302_v11 = vpop.f32.mrb[44].mxu1  ;;  %v1729_v14 = vmul.f32 1.442695, %v853_v10 }
 0x1e3   : > { %v2852_v9 = vpop.eup %2851  ;;  %2293 = vmatpush1.bf16.msra.mxu1 %v2099_v56  ;;  %2873 = vpow2.f32 %v1723_v6  ;;  %v1733_v15 = vmul.f32 1.442695, %v1302_v11  ;;  %v855_v16 = vpop.f32.mrb[45].mxu0 }
 0x1e4   : > { %v2854_v12 = vpop.eup %2853  ;;  %v1304_v17 = vpop.f32.mrb[45].mxu1  ;;  %2875 = vpow2.f32 %v1727_v7  ;;  %v1731_v19 = vmul.f32 1.442695, %v855_v16 }
 0x1e5   : > { %v2856_v18 = vpop.eup %2855  ;;  %v1735_v20 = vmul.f32 1.442695, %v1304_v17  ;;  %v2101_v21 = vpack.c.bf16 %v2854_v12, %v2846_v61  ;;  %2877 = vpow2.f32 %v1729_v14  ;;  %v859_v26 = vpop.f32.mrb[46].mxu0 }
 0x1e6   : > { %v2858_v23 = vpop.eup %2857  ;;  %v2103_v24 = vpack.c.bf16 %v2856_v18, %v2848_v5  ;;  %2879 = vpow2.f32 %v1733_v15  ;;  %v1308_v27 = vpop.f32.mrb[46].mxu1  ;;  %v1737_v13 = vmul.f32 1.442695, %v859_v26 }
 0x1e7   : > { %v2860_v25 = vpop.eup %2859  ;;  %v2102_v28 = vpack.c.bf16 %v2858_v23, %v2850_v8  ;;  %2881 = vpow2.f32 %v1731_v19  ;;  %v1741_v22 = vmul.f32 1.442695, %v1308_v27  ;;  %v861_v30 = vpop.f32.mrb[47].mxu0 }
 0x1e8   : > { %v2862_v29 = vpop.eup %2861  ;;  %v1310_v31 = vpop.f32.mrb[47].mxu1  ;;  %v2104_v32 = vpack.c.bf16 %v2860_v25, %v2852_v9  ;;  %2883 = vpow2.f32 %v1735_v20  ;;  %v1739_v34 = vmul.f32 1.442695, %v861_v30 }
 0x1e9   : > { %v2864_v33 = vpop.eup %2863  ;;  %v1743_v35 = vmul.f32 1.442695, %v1310_v31  ;;  %2212 = vmatprep.subr.bf16.mxu0 %v2102_v28  ;;  %2885 = vpow2.f32 %v1737_v13  ;;  %v865_v40 = vpop.f32.mrb[48].mxu0 }
 0x1ea   : > { %v2866_v37 = vpop.eup %2865  ;;  %2294 = vmatprep.subr.bf16.mxu1 %v2104_v32  ;;  %2213 = vmatpush1.bf16.msra.mxu0 %v2101_v21  ;;  %2887 = vpow2.f32 %v1741_v22  ;;  %v1314_v41 = vpop.f32.mrb[48].mxu1  ;;  %v1745_v43 = vmul.f32 1.442695, %v865_v40 }
 0x1eb   : > { %v2868_v38 = vpop.eup %2867  ;;  %2295 = vmatpush1.bf16.msra.mxu1 %v2103_v24  ;;  %2889 = vpow2.f32 %v1739_v34  ;;  %v1749_v39 = vmul.f32 1.442695, %v1314_v41  ;;  %v867_v44 = vpop.f32.mrb[49].mxu0 }
 0x1ec   : > { %v2870_v42 = vpop.eup %2869  ;;  %v1316_v45 = vpop.f32.mrb[49].mxu1  ;;  %2891 = vpow2.f32 %v1743_v35  ;;  %v1747_v47 = vmul.f32 1.442695, %v867_v44 }
 0x1ed   : > { %v2872_v46 = vpop.eup %2871  ;;  %v1751_v48 = vmul.f32 1.442695, %v1316_v45  ;;  %v2105_v49 = vpack.c.bf16 %v2870_v42, %v2862_v29  ;;  %2893 = vpow2.f32 %v1745_v43  ;;  %v871_v53 = vpop.f32.mrb[50].mxu0 }
 0x1ee   : > { %v2874_v50 = vpop.eup %2873  ;;  %v2107_v51 = vpack.c.bf16 %v2872_v46, %v2864_v33  ;;  %2895 = vpow2.f32 %v1749_v39  ;;  %v1320_v54 = vpop.f32.mrb[50].mxu1  ;;  %v1753_v57 = vmul.f32 1.442695, %v871_v53 }
 0x1ef   : > { %v2876_v52 = vpop.eup %2875  ;;  %v2106_v55 = vpack.c.bf16 %v2874_v50, %v2866_v37  ;;  %2897 = vpow2.f32 %v1747_v47  ;;  %v1757_v58 = vmul.f32 1.442695, %v1320_v54  ;;  %v873_v59 = vpop.f32.mrb[51].mxu0 }
 0x1f0   : > { %v2878_v56 = vpop.eup %2877  ;;  %v1322_v60 = vpop.f32.mrb[51].mxu1  ;;  %v2108_v61 = vpack.c.bf16 %v2876_v52, %v2868_v38  ;;  %2899 = vpow2.f32 %v1751_v48  ;;  %v1755_v63 = vmul.f32 1.442695, %v873_v59 }
 0x1f1   : > { %v2880_v62 = vpop.eup %2879  ;;  %v1759_v2 = vmul.f32 1.442695, %v1322_v60  ;;  %2214 = vmatprep.subr.bf16.mxu0 %v2106_v55  ;;  %2901 = vpow2.f32 %v1753_v57  ;;  %v877_v5 = vpop.f32.mrb[52].mxu0 }
 0x1f2   : > { %v2882_v3 = vpop.eup %2881  ;;  %2296 = vmatprep.subr.bf16.mxu1 %v2108_v61  ;;  %2215 = vmatpush1.bf16.msra.mxu0 %v2105_v49  ;;  %2903 = vpow2.f32 %v1757_v58  ;;  %v1326_v6 = vpop.f32.mrb[52].mxu1  ;;  %v1761_v8 = vmul.f32 1.442695, %v877_v5 }
 0x1f3   : > { %v2884_v4 = vpop.eup %2883  ;;  %2297 = vmatpush1.bf16.msra.mxu1 %v2107_v51  ;;  %2905 = vpow2.f32 %v1755_v63  ;;  %v1765_v9 = vmul.f32 1.442695, %v1326_v6  ;;  %v879_v10 = vpop.f32.mrb[53].mxu0 }
 0x1f4   : > { %v2886_v7 = vpop.eup %2885  ;;  %v1328_v11 = vpop.f32.mrb[53].mxu1  ;;  %2907 = vpow2.f32 %v1759_v2  ;;  %v1763_v14 = vmul.f32 1.442695, %v879_v10 }
 0x1f5   : > { %v2888_v12 = vpop.eup %2887  ;;  %v1767_v15 = vmul.f32 1.442695, %v1328_v11  ;;  %v2109_v16 = vpack.c.bf16 %v2886_v7, %v2878_v56  ;;  %2909 = vpow2.f32 %v1761_v8  ;;  %v883_v20 = vpop.f32.mrb[54].mxu0 }
 0x1f6   : > { %v2890_v17 = vpop.eup %2889  ;;  %v2111_v18 = vpack.c.bf16 %v2888_v12, %v2880_v62  ;;  %2911 = vpow2.f32 %v1765_v9  ;;  %v1332_v21 = vpop.f32.mrb[54].mxu1  ;;  %v1769_v25 = vmul.f32 1.442695, %v883_v20 }
 0x1f7   : > { %v2892_v19 = vpop.eup %2891  ;;  %v2110_v23 = vpack.c.bf16 %v2890_v17, %v2882_v3  ;;  %2913 = vpow2.f32 %v1763_v14  ;;  %v1773_v26 = vmul.f32 1.442695, %v1332_v21  ;;  %v885_v27 = vpop.f32.mrb[55].mxu0 }
 0x1f8   : > { %v2894_v24 = vpop.eup %2893  ;;  %v1334_v28 = vpop.f32.mrb[55].mxu1  ;;  %v2112_v29 = vpack.c.bf16 %v2892_v19, %v2884_v4  ;;  %2915 = vpow2.f32 %v1767_v15  ;;  %v1771_v22 = vmul.f32 1.442695, %v885_v27 }
 0x1f9   : > { %v2896_v13 = vpop.eup %2895  ;;  %v1775_v30 = vmul.f32 1.442695, %v1334_v28  ;;  %2216 = vmatprep.subr.bf16.mxu0 %v2110_v23  ;;  %2917 = vpow2.f32 %v1769_v25  ;;  %v889_v33 = vpop.f32.mrb[56].mxu0 }
 0x1fa   : > { %v2898_v31 = vpop.eup %2897  ;;  %2298 = vmatprep.subr.bf16.mxu1 %v2112_v29  ;;  %2217 = vmatpush1.bf16.msra.mxu0 %v2109_v16  ;;  %2919 = vpow2.f32 %v1773_v26  ;;  %v1338_v34 = vpop.f32.mrb[56].mxu1  ;;  %v1777_v37 = vmul.f32 1.442695, %v889_v33 }
 0x1fb   : > { %v2900_v32 = vpop.eup %2899  ;;  %2299 = vmatpush1.bf16.msra.mxu1 %v2111_v18  ;;  %2921 = vpow2.f32 %v1771_v22  ;;  %v1781_v38 = vmul.f32 1.442695, %v1338_v34  ;;  %v891_v40 = vpop.f32.mrb[57].mxu0 }
 0x1fc   : > { %v2902_v35 = vpop.eup %2901  ;;  %v1340_v41 = vpop.f32.mrb[57].mxu1  ;;  %2923 = vpow2.f32 %v1775_v30  ;;  %v1779_v43 = vmul.f32 1.442695, %v891_v40 }
 0x1fd   : > { %v2904_v42 = vpop.eup %2903  ;;  %v1783_v39 = vmul.f32 1.442695, %v1340_v41  ;;  %v2113_v44 = vpack.c.bf16 %v2902_v35, %v2894_v24  ;;  %2925 = vpow2.f32 %v1777_v37  ;;  %v895_v48 = vpop.f32.mrb[58].mxu0 }
 0x1fe   : > { %v2906_v45 = vpop.eup %2905  ;;  %v2115_v46 = vpack.c.bf16 %v2904_v42, %v2896_v13  ;;  %2927 = vpow2.f32 %v1781_v38  ;;  %v1344_v49 = vpop.f32.mrb[58].mxu1  ;;  %v1785_v52 = vmul.f32 1.442695, %v895_v48 }
 0x1ff   : > { %v2908_v47 = vpop.eup %2907  ;;  %v2114_v50 = vpack.c.bf16 %v2906_v45, %v2898_v31  ;;  %2929 = vpow2.f32 %v1779_v43  ;;  %v1789_v53 = vmul.f32 1.442695, %v1344_v49  ;;  %v897_v54 = vpop.f32.mrb[59].mxu0 }
 0x200   : > { %v2910_v51 = vpop.eup %2909  ;;  %v1346_v55 = vpop.f32.mrb[59].mxu1  ;;  %v2116_v56 = vpack.c.bf16 %v2908_v47, %v2900_v32  ;;  %2931 = vpow2.f32 %v1783_v39  ;;  %v1787_v58 = vmul.f32 1.442695, %v897_v54 }
 0x201   : > { %v2912_v57 = vpop.eup %2911  ;;  %v1791_v59 = vmul.f32 1.442695, %v1346_v55  ;;  %2218 = vmatprep.subr.bf16.mxu0 %v2114_v50  ;;  %2933 = vpow2.f32 %v1785_v52  ;;  %v901_v62 = vpop.f32.mrb[60].mxu0 }
 0x202   : > { %v2914_v60 = vpop.eup %2913  ;;  %2300 = vmatprep.subr.bf16.mxu1 %v2116_v56  ;;  %2219 = vmatpush1.bf16.msra.mxu0 %v2113_v44  ;;  %2935 = vpow2.f32 %v1789_v53  ;;  %v1350_v63 = vpop.f32.mrb[60].mxu1  ;;  %v1793_v3 = vmul.f32 1.442695, %v901_v62 }
 0x203   : > { %v2916_v61 = vpop.eup %2915  ;;  %2301 = vmatpush1.bf16.msra.mxu1 %v2115_v46  ;;  %2937 = vpow2.f32 %v1787_v58  ;;  %v1797_v4 = vmul.f32 1.442695, %v1350_v63  ;;  %v903_v5 = vpop.f32.mrb[61].mxu0 }
 0x204   : > { %v2918_v2 = vpop.eup %2917  ;;  %v1352_v6 = vpop.f32.mrb[61].mxu1  ;;  %2939 = vpow2.f32 %v1791_v59  ;;  %v1795_v8 = vmul.f32 1.442695, %v903_v5 }
 0x205   : > { %v2920_v7 = vpop.eup %2919  ;;  %v1799_v9 = vmul.f32 1.442695, %v1352_v6  ;;  %v2117_v10 = vpack.c.bf16 %v2918_v2, %v2910_v51  ;;  %2941 = vpow2.f32 %v1793_v3  ;;  %v907_v15 = vpop.f32.mrb[62].mxu0 }
 0x206   : > { %v2922_v11 = vpop.eup %2921  ;;  %v2119_v12 = vpack.c.bf16 %v2920_v7, %v2912_v57  ;;  %2943 = vpow2.f32 %v1797_v4  ;;  %v1356_v16 = vpop.f32.mrb[62].mxu1  ;;  %v1801_v19 = vmul.f32 1.442695, %v907_v15 }
 0x207   : > { %v2924_v14 = vpop.eup %2923  ;;  %v2118_v17 = vpack.c.bf16 %v2922_v11, %v2914_v60  ;;  %2945 = vpow2.f32 %v1795_v8  ;;  %v1805_v20 = vmul.f32 1.442695, %v1356_v16  ;;  %v909_v21 = vpop.f32.mrb[63].mxu0 }
 0x208   : > { %v2926_v18 = vpop.eup %2925  ;;  %v1358_v23 = vpop.f32.mrb[63].mxu1  ;;  %v2120_v24 = vpack.c.bf16 %v2924_v14, %v2916_v61  ;;  %2947 = vpow2.f32 %v1799_v9  ;;  %v1803_v26 = vmul.f32 1.442695, %v909_v21 }
 0x209   : > { %v2928_v25 = vpop.eup %2927  ;;  %v1807_v27 = vmul.f32 1.442695, %v1358_v23  ;;  %2220 = vmatprep.subr.bf16.mxu0 %v2118_v17  ;;  %2949 = vpow2.f32 %v1801_v19  ;;  %v913_v13 = vpop.f32.mrb[64].mxu0 }
 0x20a   : > { %v2930_v28 = vpop.eup %2929  ;;  %2302 = vmatprep.subr.bf16.mxu1 %v2120_v24  ;;  %2221 = vmatpush1.bf16.msra.mxu0 %v2117_v10  ;;  %2951 = vpow2.f32 %v1805_v20  ;;  %v1362_v22 = vpop.f32.mrb[64].mxu1  ;;  %v1809_v31 = vmul.f32 1.442695, %v913_v13 }
 0x20b   : > { %v2932_v29 = vpop.eup %2931  ;;  %2303 = vmatpush1.bf16.msra.mxu1 %v2119_v12  ;;  %2953 = vpow2.f32 %v1803_v26  ;;  %v1813_v32 = vmul.f32 1.442695, %v1362_v22  ;;  %v915_v33 = vpop.f32.mrb[65].mxu0 }
 0x20c   : > { %v2934_v30 = vpop.eup %2933  ;;  %v1364_v34 = vpop.f32.mrb[65].mxu1  ;;  %2955 = vpow2.f32 %v1807_v27  ;;  %v1811_v37 = vmul.f32 1.442695, %v915_v33 }
 0x20d   : > { %v2936_v35 = vpop.eup %2935  ;;  %v1815_v38 = vmul.f32 1.442695, %v1364_v34  ;;  %v2121_v40 = vpack.c.bf16 %v2934_v30, %v2926_v18  ;;  %2957 = vpow2.f32 %v1809_v31  ;;  %v919_v39 = vpop.f32.mrb[66].mxu0 }
 0x20e   : > { %v2938_v41 = vpop.eup %2937  ;;  %v2123_v42 = vpack.c.bf16 %v2936_v35, %v2928_v25  ;;  %2959 = vpow2.f32 %v1813_v32  ;;  %v1368_v44 = vpop.f32.mrb[66].mxu1  ;;  %v1817_v47 = vmul.f32 1.442695, %v919_v39 }
 0x20f   : > { %v2940_v43 = vpop.eup %2939  ;;  %v2122_v45 = vpack.c.bf16 %v2938_v41, %v2930_v28  ;;  %2961 = vpow2.f32 %v1811_v37  ;;  %v1821_v48 = vmul.f32 1.442695, %v1368_v44  ;;  %v921_v49 = vpop.f32.mrb[67].mxu0 }
 0x210   : > { %v2942_v46 = vpop.eup %2941  ;;  %v1370_v50 = vpop.f32.mrb[67].mxu1  ;;  %v2124_v51 = vpack.c.bf16 %v2940_v43, %v2932_v29  ;;  %2963 = vpow2.f32 %v1815_v38  ;;  %v1819_v53 = vmul.f32 1.442695, %v921_v49 }
 0x211   : > { %v2944_v52 = vpop.eup %2943  ;;  %v1823_v54 = vmul.f32 1.442695, %v1370_v50  ;;  %2222 = vmatprep.subr.bf16.mxu0 %v2122_v45  ;;  %2965 = vpow2.f32 %v1817_v47  ;;  %v925_v57 = vpop.f32.mrb[68].mxu0 }
 0x212   : > { %v2946_v55 = vpop.eup %2945  ;;  %2304 = vmatprep.subr.bf16.mxu1 %v2124_v51  ;;  %2223 = vmatpush1.bf16.msra.mxu0 %v2121_v40  ;;  %2967 = vpow2.f32 %v1821_v48  ;;  %v1374_v58 = vpop.f32.mrb[68].mxu1  ;;  %v1825_v60 = vmul.f32 1.442695, %v925_v57 }
 0x213   : > { %v2948_v56 = vpop.eup %2947  ;;  %2305 = vmatpush1.bf16.msra.mxu1 %v2123_v42  ;;  %2969 = vpow2.f32 %v1819_v53  ;;  %v1829_v61 = vmul.f32 1.442695, %v1374_v58  ;;  %v927_v62 = vpop.f32.mrb[69].mxu0 }
 0x214   : > { %v2950_v59 = vpop.eup %2949  ;;  %v1376_v63 = vpop.f32.mrb[69].mxu1  ;;  %2971 = vpow2.f32 %v1823_v54  ;;  %v1827_v3 = vmul.f32 1.442695, %v927_v62 }
 0x215   : > { %v2952_v2 = vpop.eup %2951  ;;  %v1831_v4 = vmul.f32 1.442695, %v1376_v63  ;;  %v2125_v5 = vpack.c.bf16 %v2950_v59, %v2942_v46  ;;  %2973 = vpow2.f32 %v1825_v60  ;;  %v931_v9 = vpop.f32.mrb[70].mxu0 }
 0x216   : > { %v2954_v6 = vpop.eup %2953  ;;  %v2127_v7 = vpack.c.bf16 %v2952_v2, %v2944_v52  ;;  %2975 = vpow2.f32 %v1829_v61  ;;  %v1380_v10 = vpop.f32.mrb[70].mxu1  ;;  %v1833_v14 = vmul.f32 1.442695, %v931_v9 }
 0x217   : > { %v2956_v8 = vpop.eup %2955  ;;  %v2126_v11 = vpack.c.bf16 %v2954_v6, %v2946_v55  ;;  %2977 = vpow2.f32 %v1827_v3  ;;  %v1837_v15 = vmul.f32 1.442695, %v1380_v10  ;;  %v933_v16 = vpop.f32.mrb[71].mxu0 }
 0x218   : > { %v2958_v12 = vpop.eup %2957  ;;  %v1382_v17 = vpop.f32.mrb[71].mxu1  ;;  %v2128_v18 = vpack.c.bf16 %v2956_v8, %v2948_v56  ;;  %2979 = vpow2.f32 %v1831_v4  ;;  %v1835_v20 = vmul.f32 1.442695, %v933_v16 }
 0x219   : > { %v2960_v19 = vpop.eup %2959  ;;  %v1839_v21 = vmul.f32 1.442695, %v1382_v17  ;;  %2224 = vmatprep.subr.bf16.mxu0 %v2126_v11  ;;  %2981 = vpow2.f32 %v1833_v14  ;;  %v937_v25 = vpop.f32.mrb[72].mxu0 }
 0x21a   : > { %v2962_v23 = vpop.eup %2961  ;;  %2306 = vmatprep.subr.bf16.mxu1 %v2128_v18  ;;  %2225 = vmatpush1.bf16.msra.mxu0 %v2125_v5  ;;  %2983 = vpow2.f32 %v1837_v15  ;;  %v1386_v26 = vpop.f32.mrb[72].mxu1  ;;  %v1841_v28 = vmul.f32 1.442695, %v937_v25 }
 0x21b   : > { %v2964_v24 = vpop.eup %2963  ;;  %2307 = vmatpush1.bf16.msra.mxu1 %v2127_v7  ;;  %2985 = vpow2.f32 %v1835_v20  ;;  %v1845_v29 = vmul.f32 1.442695, %v1386_v26  ;;  %v939_v13 = vpop.f32.mrb[73].mxu0 }
 0x21c   : > { %v2966_v27 = vpop.eup %2965  ;;  %v1388_v22 = vpop.f32.mrb[73].mxu1  ;;  %2987 = vpow2.f32 %v1839_v21  ;;  %v1843_v31 = vmul.f32 1.442695, %v939_v13 }
 0x21d   : > { %v2968_v30 = vpop.eup %2967  ;;  %v1847_v32 = vmul.f32 1.442695, %v1388_v22  ;;  %2227 = vmatmul.mubr.bf16.vlgmr.msra.gmra.mrb[128].mxu0 %v3268_v36  ;;  %v2129_v33 = vpack.c.bf16 %v2966_v27, %v2958_v12  ;;  %2989 = vpow2.f32 %v1841_v28  ;;  %v943_v38 = vpop.f32.mrb[74].mxu0 }
 0x21e   : > { %v2970_v34 = vpop.eup %2969  ;;  %2309 = vmatmul.mubr.bf16.vlgmr.msra.gmra.mrb[128].mxu1 %v3268_v36  ;;  %v2131_v35 = vpack.c.bf16 %v2968_v30, %v2960_v19  ;;  %2267 = vmatprep.mubr.bf16.mxu0 %v3268_v36  ;;  %2991 = vpow2.f32 %v1845_v29  ;;  %v1392_v40 = vpop.f32.mrb[74].mxu1  ;;  %v1849_v43 = vmul.f32 1.442695, %v943_v38 }
 0x21f   : > { %v2972_v37 = vpop.eup %2971  ;;  %v2130_v41 = vpack.c.bf16 %v2970_v34, %v2962_v23  ;;  %2349 = vmatprep.mubr.bf16.mxu1 %v3268_v36  ;;  %2993 = vpow2.f32 %v1843_v31  ;;  %v1853_v39 = vmul.f32 1.442695, %v1392_v40  ;;  %v945_v44 = vpop.f32.mrb[75].mxu0 }
 0x220   : > { %v2974_v42 = vpop.eup %2973  ;;  %v1394_v45 = vpop.f32.mrb[75].mxu1  ;;  %v2132_v46 = vpack.c.bf16 %v2972_v37, %v2964_v24  ;;  %2995 = vpow2.f32 %v1847_v32  ;;  %v1851_v48 = vmul.f32 1.442695, %v945_v44 }
 0x221   : > { %v2976_v47 = vpop.eup %2975  ;;  %v1855_v49 = vmul.f32 1.442695, %v1394_v45  ;;  %2235 = vmatprep.subr.bf16.mxu0 %v2130_v41  ;;  %2997 = vpow2.f32 %v1849_v43  ;;  %v949_v52 = vpop.f32.mrb[76].mxu0 }
 0x222   : > { %v2978_v50 = vpop.eup %2977  ;;  %2317 = vmatprep.subr.bf16.mxu1 %v2132_v46  ;;  %2236 = vmatpush1.bf16.msra.mxu0 %v2129_v33  ;;  %2999 = vpow2.f32 %v1853_v39  ;;  %v1398_v53 = vpop.f32.mrb[76].mxu1  ;;  %v1857_v55 = vmul.f32 1.442695, %v949_v52 }
 0x223   : > { %v2980_v51 = vpop.eup %2979  ;;  %2318 = vmatpush1.bf16.msra.mxu1 %v2131_v35  ;;  %3001 = vpow2.f32 %v1851_v48  ;;  %v1861_v56 = vmul.f32 1.442695, %v1398_v53  ;;  %v951_v57 = vpop.f32.mrb[77].mxu0 }
 0x224   : > { %v2982_v54 = vpop.eup %2981  ;;  %v1400_v58 = vpop.f32.mrb[77].mxu1  ;;  %3003 = vpow2.f32 %v1855_v49  ;;  %v1859_v60 = vmul.f32 1.442695, %v951_v57 }
 0x225   : > { %v2984_v59 = vpop.eup %2983  ;;  %v1863_v61 = vmul.f32 1.442695, %v1400_v58  ;;  %v2133_v62 = vpack.c.bf16 %v2982_v54, %v2974_v42  ;;  %3005 = vpow2.f32 %v1857_v55  ;;  %v955_v4 = vpop.f32.mrb[78].mxu0 }
 0x226   : > { %v2986_v63 = vpop.eup %2985  ;;  %v2135_v2 = vpack.c.bf16 %v2984_v59, %v2976_v47  ;;  %3007 = vpow2.f32 %v1861_v56  ;;  %v1404_v5 = vpop.f32.mrb[78].mxu1  ;;  %v1865_v8 = vmul.f32 1.442695, %v955_v4 }
 0x227   : > { %v2988_v3 = vpop.eup %2987  ;;  %v2134_v6 = vpack.c.bf16 %v2986_v63, %v2978_v50  ;;  %3009 = vpow2.f32 %v1859_v60  ;;  %v1869_v9 = vmul.f32 1.442695, %v1404_v5  ;;  %v957_v10 = vpop.f32.mrb[79].mxu0 }
 0x228   : > { %v2990_v7 = vpop.eup %2989  ;;  %v1406_v11 = vpop.f32.mrb[79].mxu1  ;;  %v2136_v12 = vpack.c.bf16 %v2988_v3, %v2980_v51  ;;  %3011 = vpow2.f32 %v1863_v61  ;;  %v1867_v15 = vmul.f32 1.442695, %v957_v10 }
 0x229   : > { %v2992_v14 = vpop.eup %2991  ;;  %v1871_v16 = vmul.f32 1.442695, %v1406_v11  ;;  %2237 = vmatprep.subr.bf16.mxu0 %v2134_v6  ;;  %3013 = vpow2.f32 %v1865_v8  ;;  %v961_v19 = vpop.f32.mrb[80].mxu0 }
 0x22a   : > { %v2994_v17 = vpop.eup %2993  ;;  %2319 = vmatprep.subr.bf16.mxu1 %v2136_v12  ;;  %2238 = vmatpush1.bf16.msra.mxu0 %v2133_v62  ;;  %3015 = vpow2.f32 %v1869_v9  ;;  %v1410_v20 = vpop.f32.mrb[80].mxu1  ;;  %v1873_v23 = vmul.f32 1.442695, %v961_v19 }
 0x22b   : > { %v2996_v18 = vpop.eup %2995  ;;  %2320 = vmatpush1.bf16.msra.mxu1 %v2135_v2  ;;  %3017 = vpow2.f32 %v1867_v15  ;;  %v1877_v24 = vmul.f32 1.442695, %v1410_v20  ;;  %v963_v25 = vpop.f32.mrb[81].mxu0 }
 0x22c   : > { %v2998_v21 = vpop.eup %2997  ;;  %v1412_v26 = vpop.f32.mrb[81].mxu1  ;;  %3019 = vpow2.f32 %v1871_v16  ;;  %v1875_v28 = vmul.f32 1.442695, %v963_v25 }
 0x22d   : > { %v3000_v27 = vpop.eup %2999  ;;  %v1879_v29 = vmul.f32 1.442695, %v1412_v26  ;;  %v2137_v13 = vpack.c.bf16 %v2998_v21, %v2990_v7  ;;  %3021 = vpow2.f32 %v1873_v23  ;;  %v967_v32 = vpop.f32.mrb[82].mxu0 }
 0x22e   : > { %v3002_v22 = vpop.eup %3001  ;;  %v2139_v30 = vpack.c.bf16 %v3000_v27, %v2992_v14  ;;  %3023 = vpow2.f32 %v1877_v24  ;;  %v1416_v33 = vpop.f32.mrb[82].mxu1  ;;  %v1881_v37 = vmul.f32 1.442695, %v967_v32 }
 0x22f   : > { %v3004_v31 = vpop.eup %3003  ;;  %v2138_v34 = vpack.c.bf16 %v3002_v22, %v2994_v17  ;;  %3025 = vpow2.f32 %v1875_v28  ;;  %v1885_v38 = vmul.f32 1.442695, %v1416_v33  ;;  %v969_v40 = vpop.f32.mrb[83].mxu0 }
 0x230   : > { %v3006_v35 = vpop.eup %3005  ;;  %v1418_v41 = vpop.f32.mrb[83].mxu1  ;;  %v2140_v42 = vpack.c.bf16 %v3004_v31, %v2996_v18  ;;  %3027 = vpow2.f32 %v1879_v29  ;;  %v1883_v39 = vmul.f32 1.442695, %v969_v40 }
 0x231   : > { %v3008_v43 = vpop.eup %3007  ;;  %v1887_v44 = vmul.f32 1.442695, %v1418_v41  ;;  %2239 = vmatprep.subr.bf16.mxu0 %v2138_v34  ;;  %3029 = vpow2.f32 %v1881_v37  ;;  %v973_v47 = vpop.f32.mrb[84].mxu0 }
 0x232   : > { %v3010_v45 = vpop.eup %3009  ;;  %2321 = vmatprep.subr.bf16.mxu1 %v2140_v42  ;;  %2240 = vmatpush1.bf16.msra.mxu0 %v2137_v13  ;;  %3031 = vpow2.f32 %v1885_v38  ;;  %v1422_v48 = vpop.f32.mrb[84].mxu1  ;;  %v1889_v50 = vmul.f32 1.442695, %v973_v47 }
 0x233   : > { %v3012_v46 = vpop.eup %3011  ;;  %2322 = vmatpush1.bf16.msra.mxu1 %v2139_v30  ;;  %3033 = vpow2.f32 %v1883_v39  ;;  %v1893_v51 = vmul.f32 1.442695, %v1422_v48  ;;  %v975_v52 = vpop.f32.mrb[85].mxu0 }
 0x234   : > { %v3014_v49 = vpop.eup %3013  ;;  %v1424_v53 = vpop.f32.mrb[85].mxu1  ;;  %3035 = vpow2.f32 %v1887_v44  ;;  %v1891_v55 = vmul.f32 1.442695, %v975_v52 }
 0x235   : > { %v3016_v54 = vpop.eup %3015  ;;  %v1895_v56 = vmul.f32 1.442695, %v1424_v53  ;;  %v2141_v57 = vpack.c.bf16 %v3014_v49, %v3006_v35  ;;  %3037 = vpow2.f32 %v1889_v50  ;;  %v979_v61 = vpop.f32.mrb[86].mxu0 }
 0x236   : > { %v3018_v58 = vpop.eup %3017  ;;  %v2143_v59 = vpack.c.bf16 %v3016_v54, %v3008_v43  ;;  %3039 = vpow2.f32 %v1893_v51  ;;  %v1428_v62 = vpop.f32.mrb[86].mxu1  ;;  %v1897_v3 = vmul.f32 1.442695, %v979_v61 }
 0x237   : > { %v3020_v60 = vpop.eup %3019  ;;  %v2142_v63 = vpack.c.bf16 %v3018_v58, %v3010_v45  ;;  %3041 = vpow2.f32 %v1891_v55  ;;  %v1901_v4 = vmul.f32 1.442695, %v1428_v62  ;;  %v981_v5 = vpop.f32.mrb[87].mxu0 }
 0x238   : > { %v3022_v2 = vpop.eup %3021  ;;  %v1430_v6 = vpop.f32.mrb[87].mxu1  ;;  %v2144_v7 = vpack.c.bf16 %v3020_v60, %v3012_v46  ;;  %3043 = vpow2.f32 %v1895_v56  ;;  %v1899_v9 = vmul.f32 1.442695, %v981_v5 }
 0x239   : > { %v3024_v8 = vpop.eup %3023  ;;  %v1903_v10 = vmul.f32 1.442695, %v1430_v6  ;;  %2241 = vmatprep.subr.bf16.mxu0 %v2142_v63  ;;  %3045 = vpow2.f32 %v1897_v3  ;;  %v985_v14 = vpop.f32.mrb[88].mxu0 }
 0x23a   : > { %v3026_v11 = vpop.eup %3025  ;;  %2323 = vmatprep.subr.bf16.mxu1 %v2144_v7  ;;  %2242 = vmatpush1.bf16.msra.mxu0 %v2141_v57  ;;  %3047 = vpow2.f32 %v1901_v4  ;;  %v1434_v15 = vpop.f32.mrb[88].mxu1  ;;  %v1905_v17 = vmul.f32 1.442695, %v985_v14 }
 0x23b   : > { %v3028_v12 = vpop.eup %3027  ;;  %2324 = vmatpush1.bf16.msra.mxu1 %v2143_v59  ;;  %3049 = vpow2.f32 %v1899_v9  ;;  %v1909_v18 = vmul.f32 1.442695, %v1434_v15  ;;  %v987_v19 = vpop.f32.mrb[89].mxu0 }
 0x23c   : > { %v3030_v16 = vpop.eup %3029  ;;  %v1436_v20 = vpop.f32.mrb[89].mxu1  ;;  %3051 = vpow2.f32 %v1903_v10  ;;  %v1907_v23 = vmul.f32 1.442695, %v987_v19 }
 0x23d   : > { %v3032_v21 = vpop.eup %3031  ;;  %v1911_v24 = vmul.f32 1.442695, %v1436_v20  ;;  %v2145_v25 = vpack.c.bf16 %v3030_v16, %v3022_v2  ;;  %3053 = vpow2.f32 %v1905_v17  ;;  %v991_v29 = vpop.f32.mrb[90].mxu0 }
 0x23e   : > { %v3034_v26 = vpop.eup %3033  ;;  %v2147_v27 = vpack.c.bf16 %v3032_v21, %v3024_v8  ;;  %3055 = vpow2.f32 %v1909_v18  ;;  %v1440_v13 = vpop.f32.mrb[90].mxu1  ;;  %v1913_v31 = vmul.f32 1.442695, %v991_v29 }
 0x23f   : > { %v3036_v28 = vpop.eup %3035  ;;  %v2146_v22 = vpack.c.bf16 %v3034_v26, %v3026_v11  ;;  %3057 = vpow2.f32 %v1907_v23  ;;  %v1917_v32 = vmul.f32 1.442695, %v1440_v13  ;;  %v993_v33 = vpop.f32.mrb[91].mxu0 }
 0x240   : > { %v3038_v30 = vpop.eup %3037  ;;  %v1442_v34 = vpop.f32.mrb[91].mxu1  ;;  %v2148_v35 = vpack.c.bf16 %v3036_v28, %v3028_v12  ;;  %3059 = vpow2.f32 %v1911_v24  ;;  %v1915_v38 = vmul.f32 1.442695, %v993_v33 }
 0x241   : > { %v3040_v37 = vpop.eup %3039  ;;  %v1919_v40 = vmul.f32 1.442695, %v1442_v34  ;;  %2243 = vmatprep.subr.bf16.mxu0 %v2146_v22  ;;  %3061 = vpow2.f32 %v1913_v31  ;;  %v997_v43 = vpop.f32.mrb[92].mxu0 }
 0x242   : > { %v3042_v41 = vpop.eup %3041  ;;  %2325 = vmatprep.subr.bf16.mxu1 %v2148_v35  ;;  %2244 = vmatpush1.bf16.msra.mxu0 %v2145_v25  ;;  %3063 = vpow2.f32 %v1917_v32  ;;  %v1446_v39 = vpop.f32.mrb[92].mxu1  ;;  %v1921_v45 = vmul.f32 1.442695, %v997_v43 }
 0x243   : > { %v3044_v42 = vpop.eup %3043  ;;  %2326 = vmatpush1.bf16.msra.mxu1 %v2147_v27  ;;  %3065 = vpow2.f32 %v1915_v38  ;;  %v1925_v46 = vmul.f32 1.442695, %v1446_v39  ;;  %v999_v47 = vpop.f32.mrb[93].mxu0 }
 0x244   : > { %v3046_v44 = vpop.eup %3045  ;;  %v1448_v48 = vpop.f32.mrb[93].mxu1  ;;  %3067 = vpow2.f32 %v1919_v40  ;;  %v1923_v50 = vmul.f32 1.442695, %v999_v47 }
 0x245   : > { %v3048_v49 = vpop.eup %3047  ;;  %v1927_v51 = vmul.f32 1.442695, %v1448_v48  ;;  %v2149_v52 = vpack.c.bf16 %v3046_v44, %v3038_v30  ;;  %3069 = vpow2.f32 %v1921_v45  ;;  %v1003_v56 = vpop.f32.mrb[94].mxu0 }
 0x246   : > { %v3050_v53 = vpop.eup %3049  ;;  %v2151_v54 = vpack.c.bf16 %v3048_v49, %v3040_v37  ;;  %3071 = vpow2.f32 %v1925_v46  ;;  %v1452_v57 = vpop.f32.mrb[94].mxu1  ;;  %v1929_v60 = vmul.f32 1.442695, %v1003_v56 }
 0x247   : > { %v3052_v55 = vpop.eup %3051  ;;  %v2150_v58 = vpack.c.bf16 %v3050_v53, %v3042_v41  ;;  %3073 = vpow2.f32 %v1923_v50  ;;  %v1933_v61 = vmul.f32 1.442695, %v1452_v57  ;;  %v1005_v62 = vpop.f32.mrb[95].mxu0 }
 0x248   : > { %v3054_v59 = vpop.eup %3053  ;;  %v1454_v63 = vpop.f32.mrb[95].mxu1  ;;  %v2152_v2 = vpack.c.bf16 %v3052_v55, %v3044_v42  ;;  %3075 = vpow2.f32 %v1927_v51  ;;  %v1931_v4 = vmul.f32 1.442695, %v1005_v62 }
 0x249   : > { %v3056_v3 = vpop.eup %3055  ;;  %v1935_v5 = vmul.f32 1.442695, %v1454_v63  ;;  %2245 = vmatprep.subr.bf16.mxu0 %v2150_v58  ;;  %3077 = vpow2.f32 %v1929_v60  ;;  %v1009_v8 = vpop.f32.mrb[96].mxu0 }
 0x24a   : > { %v3058_v6 = vpop.eup %3057  ;;  %2327 = vmatprep.subr.bf16.mxu1 %v2152_v2  ;;  %2246 = vmatpush1.bf16.msra.mxu0 %v2149_v52  ;;  %3079 = vpow2.f32 %v1933_v61  ;;  %v1458_v9 = vpop.f32.mrb[96].mxu1  ;;  %v1937_v11 = vmul.f32 1.442695, %v1009_v8 }
 0x24b   : > { %v3060_v7 = vpop.eup %3059  ;;  %2328 = vmatpush1.bf16.msra.mxu1 %v2151_v54  ;;  %3081 = vpow2.f32 %v1931_v4  ;;  %v1941_v12 = vmul.f32 1.442695, %v1458_v9  ;;  %v1011_v14 = vpop.f32.mrb[97].mxu0 }
 0x24c   : > { %v3062_v10 = vpop.eup %3061  ;;  %v1460_v15 = vpop.f32.mrb[97].mxu1  ;;  %3083 = vpow2.f32 %v1935_v5  ;;  %v1939_v17 = vmul.f32 1.442695, %v1011_v14 }
 0x24d   : > { %v3064_v16 = vpop.eup %3063  ;;  %v1943_v18 = vmul.f32 1.442695, %v1460_v15  ;;  %v2153_v19 = vpack.c.bf16 %v3062_v10, %v3054_v59  ;;  %3085 = vpow2.f32 %v1937_v11  ;;  %v1015_v24 = vpop.f32.mrb[98].mxu0 }
 0x24e   : > { %v3066_v20 = vpop.eup %3065  ;;  %v2155_v21 = vpack.c.bf16 %v3064_v16, %v3056_v3  ;;  %3087 = vpow2.f32 %v1941_v12  ;;  %v1464_v25 = vpop.f32.mrb[98].mxu1  ;;  %v1945_v28 = vmul.f32 1.442695, %v1015_v24 }
 0x24f   : > { %v3068_v23 = vpop.eup %3067  ;;  %v2154_v26 = vpack.c.bf16 %v3066_v20, %v3058_v6  ;;  %3089 = vpow2.f32 %v1939_v17  ;;  %v1949_v29 = vmul.f32 1.442695, %v1464_v25  ;;  %v1017_v13 = vpop.f32.mrb[99].mxu0 }
 0x250   : > { %v3070_v27 = vpop.eup %3069  ;;  %v1466_v22 = vpop.f32.mrb[99].mxu1  ;;  %v2156_v30 = vpack.c.bf16 %v3068_v23, %v3060_v7  ;;  %3091 = vpow2.f32 %v1943_v18  ;;  %v1947_v32 = vmul.f32 1.442695, %v1017_v13 }
 0x251   : > { %v3072_v31 = vpop.eup %3071  ;;  %v1951_v33 = vmul.f32 1.442695, %v1466_v22  ;;  %2247 = vmatprep.subr.bf16.mxu0 %v2154_v26  ;;  %3093 = vpow2.f32 %v1945_v28  ;;  %v1021_v37 = vpop.f32.mrb[100].mxu0 }
 0x252   : > { %v3074_v34 = vpop.eup %3073  ;;  %2329 = vmatprep.subr.bf16.mxu1 %v2156_v30  ;;  %2248 = vmatpush1.bf16.msra.mxu0 %v2153_v19  ;;  %3095 = vpow2.f32 %v1949_v29  ;;  %v1470_v38 = vpop.f32.mrb[100].mxu1  ;;  %v1953_v41 = vmul.f32 1.442695, %v1021_v37 }
 0x253   : > { %v3076_v35 = vpop.eup %3075  ;;  %2330 = vmatpush1.bf16.msra.mxu1 %v2155_v21  ;;  %3097 = vpow2.f32 %v1947_v32  ;;  %v1957_v42 = vmul.f32 1.442695, %v1470_v38  ;;  %v1023_v43 = vpop.f32.mrb[101].mxu0 }
 0x254   : > { %v3078_v40 = vpop.eup %3077  ;;  %v1472_v39 = vpop.f32.mrb[101].mxu1  ;;  %3099 = vpow2.f32 %v1951_v33  ;;  %v1955_v45 = vmul.f32 1.442695, %v1023_v43 }
 0x255   : > { %v3080_v44 = vpop.eup %3079  ;;  %v1959_v46 = vmul.f32 1.442695, %v1472_v39  ;;  %v2157_v47 = vpack.c.bf16 %v3078_v40, %v3070_v27  ;;  %3101 = vpow2.f32 %v1953_v41  ;;  %v1027_v51 = vpop.f32.mrb[102].mxu0 }
 0x256   : > { %v3082_v48 = vpop.eup %3081  ;;  %v2159_v49 = vpack.c.bf16 %v3080_v44, %v3072_v31  ;;  %3103 = vpow2.f32 %v1957_v42  ;;  %v1476_v52 = vpop.f32.mrb[102].mxu1  ;;  %v1961_v55 = vmul.f32 1.442695, %v1027_v51 }
 0x257   : > { %v3084_v50 = vpop.eup %3083  ;;  %v2158_v53 = vpack.c.bf16 %v3082_v48, %v3074_v34  ;;  %3105 = vpow2.f32 %v1955_v45  ;;  %v1965_v56 = vmul.f32 1.442695, %v1476_v52  ;;  %v1029_v57 = vpop.f32.mrb[103].mxu0 }
 0x258   : > { %v3086_v54 = vpop.eup %3085  ;;  %v1478_v58 = vpop.f32.mrb[103].mxu1  ;;  %v2160_v59 = vpack.c.bf16 %v3084_v50, %v3076_v35  ;;  %3107 = vpow2.f32 %v1959_v46  ;;  %v1963_v61 = vmul.f32 1.442695, %v1029_v57 }
 0x259   : > { %v3088_v60 = vpop.eup %3087  ;;  %v1967_v62 = vmul.f32 1.442695, %v1478_v58  ;;  %2249 = vmatprep.subr.bf16.mxu0 %v2158_v53  ;;  %3109 = vpow2.f32 %v1961_v55  ;;  %v1033_v3 = vpop.f32.mrb[104].mxu0 }
 0x25a   : > { %v3090_v63 = vpop.eup %3089  ;;  %2331 = vmatprep.subr.bf16.mxu1 %v2160_v59  ;;  %2250 = vmatpush1.bf16.msra.mxu0 %v2157_v47  ;;  %3111 = vpow2.f32 %v1965_v56  ;;  %v1482_v4 = vpop.f32.mrb[104].mxu1  ;;  %v1969_v6 = vmul.f32 1.442695, %v1033_v3 }
 0x25b   : > { %v3092_v2 = vpop.eup %3091  ;;  %2332 = vmatpush1.bf16.msra.mxu1 %v2159_v49  ;;  %3113 = vpow2.f32 %v1963_v61  ;;  %v1973_v7 = vmul.f32 1.442695, %v1482_v4  ;;  %v1035_v8 = vpop.f32.mrb[105].mxu0 }
 0x25c   : > { %v3094_v5 = vpop.eup %3093  ;;  %v1484_v9 = vpop.f32.mrb[105].mxu1  ;;  %3115 = vpow2.f32 %v1967_v62  ;;  %v1971_v11 = vmul.f32 1.442695, %v1035_v8 }
 0x25d   : > { %v3096_v10 = vpop.eup %3095  ;;  %v1975_v12 = vmul.f32 1.442695, %v1484_v9  ;;  %v2161_v14 = vpack.c.bf16 %v3094_v5, %v3086_v54  ;;  %3117 = vpow2.f32 %v1969_v6  ;;  %v1039_v18 = vpop.f32.mrb[106].mxu0 }
 0x25e   : > { %v3098_v15 = vpop.eup %3097  ;;  %v2163_v16 = vpack.c.bf16 %v3096_v10, %v3088_v60  ;;  %3119 = vpow2.f32 %v1973_v7  ;;  %v1488_v19 = vpop.f32.mrb[106].mxu1  ;;  %v1977_v23 = vmul.f32 1.442695, %v1039_v18 }
 0x25f   : > { %v3100_v17 = vpop.eup %3099  ;;  %v2162_v20 = vpack.c.bf16 %v3098_v15, %v3090_v63  ;;  %3121 = vpow2.f32 %v1971_v11  ;;  %v1981_v24 = vmul.f32 1.442695, %v1488_v19  ;;  %v1041_v25 = vpop.f32.mrb[107].mxu0 }
 0x260   : > { %v3102_v21 = vpop.eup %3101  ;;  %v1490_v26 = vpop.f32.mrb[107].mxu1  ;;  %v2164_v27 = vpack.c.bf16 %v3100_v17, %v3092_v2  ;;  %3123 = vpow2.f32 %v1975_v12  ;;  %v1979_v29 = vmul.f32 1.442695, %v1041_v25 }
 0x261   : > { %v3104_v28 = vpop.eup %3103  ;;  %v1983_v13 = vmul.f32 1.442695, %v1490_v26  ;;  %2251 = vmatprep.subr.bf16.mxu0 %v2162_v20  ;;  %3125 = vpow2.f32 %v1977_v23  ;;  %v1045_v31 = vpop.f32.mrb[108].mxu0 }
 0x262   : > { %v3106_v22 = vpop.eup %3105  ;;  %2333 = vmatprep.subr.bf16.mxu1 %v2164_v27  ;;  %2252 = vmatpush1.bf16.msra.mxu0 %v2161_v14  ;;  %3127 = vpow2.f32 %v1981_v24  ;;  %v1494_v32 = vpop.f32.mrb[108].mxu1  ;;  %v1985_v34 = vmul.f32 1.442695, %v1045_v31 }
 0x263   : > { %v3108_v30 = vpop.eup %3107  ;;  %2334 = vmatpush1.bf16.msra.mxu1 %v2163_v16  ;;  %3129 = vpow2.f32 %v1979_v29  ;;  %v1989_v35 = vmul.f32 1.442695, %v1494_v32  ;;  %v1047_v37 = vpop.f32.mrb[109].mxu0 }
 0x264   : > { %v3110_v33 = vpop.eup %3109  ;;  %v1496_v38 = vpop.f32.mrb[109].mxu1  ;;  %3131 = vpow2.f32 %v1983_v13  ;;  %v1987_v41 = vmul.f32 1.442695, %v1047_v37 }
 0x265   : > { %v3112_v40 = vpop.eup %3111  ;;  %v1991_v42 = vmul.f32 1.442695, %v1496_v38  ;;  %v2165_v43 = vpack.c.bf16 %v3110_v33, %v3102_v21  ;;  %3133 = vpow2.f32 %v1985_v34  ;;  %v1051_v46 = vpop.f32.mrb[110].mxu0 }
 0x266   : > { %v3114_v39 = vpop.eup %3113  ;;  %v2167_v44 = vpack.c.bf16 %v3112_v40, %v3104_v28  ;;  %3135 = vpow2.f32 %v1989_v35  ;;  %v1500_v47 = vpop.f32.mrb[110].mxu1  ;;  %v1993_v50 = vmul.f32 1.442695, %v1051_v46 }
 0x267   : > { %v3116_v45 = vpop.eup %3115  ;;  %v2166_v48 = vpack.c.bf16 %v3114_v39, %v3106_v22  ;;  %3137 = vpow2.f32 %v1987_v41  ;;  %v1997_v51 = vmul.f32 1.442695, %v1500_v47  ;;  %v1053_v52 = vpop.f32.mrb[111].mxu0 }
 0x268   : > { %v3118_v49 = vpop.eup %3117  ;;  %v1502_v53 = vpop.f32.mrb[111].mxu1  ;;  %v2168_v54 = vpack.c.bf16 %v3116_v45, %v3108_v30  ;;  %3139 = vpow2.f32 %v1991_v42  ;;  %v1995_v56 = vmul.f32 1.442695, %v1053_v52 }
 0x269   : > { %v3120_v55 = vpop.eup %3119  ;;  %v1999_v57 = vmul.f32 1.442695, %v1502_v53  ;;  %2253 = vmatprep.subr.bf16.mxu0 %v2166_v48  ;;  %3141 = vpow2.f32 %v1993_v50  ;;  %v1057_v60 = vpop.f32.mrb[112].mxu0 }
 0x26a   : > { %v3122_v58 = vpop.eup %3121  ;;  %2335 = vmatprep.subr.bf16.mxu1 %v2168_v54  ;;  %2254 = vmatpush1.bf16.msra.mxu0 %v2165_v43  ;;  %3143 = vpow2.f32 %v1997_v51  ;;  %v1506_v61 = vpop.f32.mrb[112].mxu1  ;;  %v2001_v63 = vmul.f32 1.442695, %v1057_v60 }
 0x26b   : > { %v3124_v59 = vpop.eup %3123  ;;  %2336 = vmatpush1.bf16.msra.mxu1 %v2167_v44  ;;  %3145 = vpow2.f32 %v1995_v56  ;;  %v2005_v2 = vmul.f32 1.442695, %v1506_v61  ;;  %v1059_v3 = vpop.f32.mrb[113].mxu0 }
 0x26c   : > { %v3126_v62 = vpop.eup %3125  ;;  %v1508_v4 = vpop.f32.mrb[113].mxu1  ;;  %3147 = vpow2.f32 %v1999_v57  ;;  %v2003_v6 = vmul.f32 1.442695, %v1059_v3 }
 0x26d   : > { %v3128_v5 = vpop.eup %3127  ;;  %v2007_v7 = vmul.f32 1.442695, %v1508_v4  ;;  %v2169_v8 = vpack.c.bf16 %v3126_v62, %v3118_v49  ;;  %3149 = vpow2.f32 %v2001_v63  ;;  %v1063_v12 = vpop.f32.mrb[114].mxu0 }
 0x26e   : > { %v3130_v9 = vpop.eup %3129  ;;  %v2171_v10 = vpack.c.bf16 %v3128_v5, %v3120_v55  ;;  %3151 = vpow2.f32 %v2005_v2  ;;  %v1512_v14 = vpop.f32.mrb[114].mxu1  ;;  %v2009_v17 = vmul.f32 1.442695, %v1063_v12 }
 0x26f   : > { %v3132_v11 = vpop.eup %3131  ;;  %v2170_v15 = vpack.c.bf16 %v3130_v9, %v3122_v58  ;;  %3153 = vpow2.f32 %v2003_v6  ;;  %v2013_v18 = vmul.f32 1.442695, %v1512_v14  ;;  %v1065_v19 = vpop.f32.mrb[115].mxu0 }
 0x270   : > { %v3134_v16 = vpop.eup %3133  ;;  %v1514_v20 = vpop.f32.mrb[115].mxu1  ;;  %v2172_v21 = vpack.c.bf16 %v3132_v11, %v3124_v59  ;;  %3155 = vpow2.f32 %v2007_v7  ;;  %v2011_v24 = vmul.f32 1.442695, %v1065_v19 }
 0x271   : > { %v3136_v23 = vpop.eup %3135  ;;  %v2015_v25 = vmul.f32 1.442695, %v1514_v20  ;;  %2255 = vmatprep.subr.bf16.mxu0 %v2170_v15  ;;  %3157 = vpow2.f32 %v2009_v17  ;;  %v1069_v28 = vpop.f32.mrb[116].mxu0 }
 0x272   : > { %v3138_v26 = vpop.eup %3137  ;;  %2337 = vmatprep.subr.bf16.mxu1 %v2172_v21  ;;  %2256 = vmatpush1.bf16.msra.mxu0 %v2169_v8  ;;  %3159 = vpow2.f32 %v2013_v18  ;;  %v1518_v29 = vpop.f32.mrb[116].mxu1  ;;  %v2017_v22 = vmul.f32 1.442695, %v1069_v28 }
 0x273   : > { %v3140_v27 = vpop.eup %3139  ;;  %2338 = vmatpush1.bf16.msra.mxu1 %v2171_v10  ;;  %3161 = vpow2.f32 %v2011_v24  ;;  %v2021_v30 = vmul.f32 1.442695, %v1518_v29  ;;  %v1071_v31 = vpop.f32.mrb[117].mxu0 }
 0x274   : > { %v3142_v13 = vpop.eup %3141  ;;  %v1520_v32 = vpop.f32.mrb[117].mxu1  ;;  %3163 = vpow2.f32 %v2015_v25  ;;  %v2019_v34 = vmul.f32 1.442695, %v1071_v31 }
 0x275   : > { %v3144_v33 = vpop.eup %3143  ;;  %v2023_v35 = vmul.f32 1.442695, %v1520_v32  ;;  %v2173_v37 = vpack.c.bf16 %v3142_v13, %v3134_v16  ;;  %3165 = vpow2.f32 %v2017_v22  ;;  %v1075_v42 = vpop.f32.mrb[118].mxu0 }
 0x276   : > { %v3146_v38 = vpop.eup %3145  ;;  %v2175_v40 = vpack.c.bf16 %v3144_v33, %v3136_v23  ;;  %3167 = vpow2.f32 %v2021_v30  ;;  %v1524_v43 = vpop.f32.mrb[118].mxu1  ;;  %v2025_v45 = vmul.f32 1.442695, %v1075_v42 }
 0x277   : > { %v3148_v41 = vpop.eup %3147  ;;  %v2174_v39 = vpack.c.bf16 %v3146_v38, %v3138_v26  ;;  %3169 = vpow2.f32 %v2019_v34  ;;  %v2029_v46 = vmul.f32 1.442695, %v1524_v43  ;;  %v1077_v47 = vpop.f32.mrb[119].mxu0 }
 0x278   : > { %v3150_v44 = vpop.eup %3149  ;;  %v1526_v48 = vpop.f32.mrb[119].mxu1  ;;  %v2176_v49 = vpack.c.bf16 %v3148_v41, %v3140_v27  ;;  %3171 = vpow2.f32 %v2023_v35  ;;  %v2027_v51 = vmul.f32 1.442695, %v1077_v47 }
 0x279   : > { %v3152_v50 = vpop.eup %3151  ;;  %v2031_v52 = vmul.f32 1.442695, %v1526_v48  ;;  %2257 = vmatprep.subr.bf16.mxu0 %v2174_v39  ;;  %3173 = vpow2.f32 %v2025_v45  ;;  %v1081_v55 = vpop.f32.mrb[120].mxu0 }
 0x27a   : > { %v3154_v53 = vpop.eup %3153  ;;  %2339 = vmatprep.subr.bf16.mxu1 %v2176_v49  ;;  %2258 = vmatpush1.bf16.msra.mxu0 %v2173_v37  ;;  %3175 = vpow2.f32 %v2029_v46  ;;  %v1530_v56 = vpop.f32.mrb[120].mxu1  ;;  %v2033_v58 = vmul.f32 1.442695, %v1081_v55 }
 0x27b   : > { %v3156_v54 = vpop.eup %3155  ;;  %2340 = vmatpush1.bf16.msra.mxu1 %v2175_v40  ;;  %3177 = vpow2.f32 %v2027_v51  ;;  %v2037_v59 = vmul.f32 1.442695, %v1530_v56  ;;  %v1083_v60 = vpop.f32.mrb[121].mxu0 }
 0x27c   : > { %v3158_v57 = vpop.eup %3157  ;;  %v1532_v61 = vpop.f32.mrb[121].mxu1  ;;  %3179 = vpow2.f32 %v2031_v52  ;;  %v2035_v63 = vmul.f32 1.442695, %v1083_v60 }
 0x27d   : > { %v3160_v62 = vpop.eup %3159  ;;  %v2039_v2 = vmul.f32 1.442695, %v1532_v61  ;;  %v2177_v3 = vpack.c.bf16 %v3158_v57, %v3150_v44  ;;  %3181 = vpow2.f32 %v2033_v58  ;;  %v1087_v7 = vpop.f32.mrb[122].mxu0 }
 0x27e   : > { %v3162_v4 = vpop.eup %3161  ;;  %v2179_v5 = vpack.c.bf16 %v3160_v62, %v3152_v50  ;;  %3183 = vpow2.f32 %v2037_v59  ;;  %v1536_v8 = vpop.f32.mrb[122].mxu1  ;;  %v2041_v11 = vmul.f32 1.442695, %v1087_v7 }
 0x27f   : > { %v3164_v6 = vpop.eup %3163  ;;  %v2178_v9 = vpack.c.bf16 %v3162_v4, %v3154_v53  ;;  %3185 = vpow2.f32 %v2035_v63  ;;  %v2045_v12 = vmul.f32 1.442695, %v1536_v8  ;;  %v1089_v14 = vpop.f32.mrb[123].mxu0  ;;  %v3269_v8 = vmov 1966171168  }
 0x280   : > { %v3166_v10 = vpop.eup %3165  ;;  %v1538_v15 = vpop.f32.mrb[123].mxu1  ;;  %v2180_v16 = vpack.c.bf16 %v3164_v6, %v3156_v54  ;;  %3187 = vpow2.f32 %v2039_v2  ;;  %v2043_v18 = vmul.f32 1.442695, %v1089_v14 }
 0x281   : > { %v3168_v17 = vpop.eup %3167  ;;  %v2047_v19 = vmul.f32 1.442695, %v1538_v15  ;;  %2259 = vmatprep.subr.bf16.mxu0 %v2178_v9  ;;  %3189 = vpow2.f32 %v2041_v11  ;;  %v1093_v23 = vpop.f32.mrb[124].mxu0  ;;  %v2365_v9 = vunpack.c.l.s4 %v3269_v8  ;;  %v2368_v11 = vshrl.u32 %v241_v0, 7 }
 0x282   : > { %v3170_v20 = vpop.eup %3169  ;;  %2341 = vmatprep.subr.bf16.mxu1 %v2180_v16  ;;  %2260 = vmatpush1.bf16.msra.mxu0 %v2177_v3  ;;  %3191 = vpow2.f32 %v2045_v12  ;;  %v1542_v24 = vpop.f32.mrb[124].mxu1  ;;  %v2049_v26 = vmul.f32 1.442695, %v1093_v23 }
 0x283   : > { %v3172_v21 = vpop.eup %3171  ;;  %2342 = vmatpush1.bf16.msra.mxu1 %v2179_v5  ;;  %3193 = vpow2.f32 %v2043_v18  ;;  %v2053_v27 = vmul.f32 1.442695, %v1542_v24  ;;  %v1095_v28 = vpop.f32.mrb[125].mxu0 }
 0x284   : > { %v3174_v25 = vpop.eup %3173  ;;  %v1544_v29 = vpop.f32.mrb[125].mxu1  ;;  %3195 = vpow2.f32 %v2047_v19  ;;  %v2051_v22 = vmul.f32 1.442695, %v1095_v28 }
 0x285   : > { %v3176_v13 = vpop.eup %3175  ;;  %v2055_v30 = vmul.f32 1.442695, %v1544_v29  ;;  %v2181_v31 = vpack.c.bf16 %v3174_v25, %v3166_v10  ;;  %3197 = vpow2.f32 %v2049_v26  ;;  %v1099_v35 = vpop.f32.mrb[126].mxu0  ;;  %v2366_v10 = vunpack.c.0.s8 %v2365_v9 }
 0x286   : > { %v3178_v32 = vpop.eup %3177  ;;  %v2183_v33 = vpack.c.bf16 %v3176_v13, %v3168_v17  ;;  %3199 = vpow2.f32 %v2053_v27  ;;  %v1548_v37 = vpop.f32.mrb[126].mxu1  ;;  %v2057_v41 = vmul.f32 1.442695, %v1099_v35  ;;  %v2193_v27 = vld [vmem:[%s3337_s16] sm:$0xf] }
 0x287   : > { %v3180_v34 = vpop.eup %3179  ;;  %v2182_v38 = vpack.c.bf16 %v3178_v32, %v3170_v20  ;;  %3201 = vpow2.f32 %v2051_v22  ;;  %v2061_v42 = vmul.f32 1.442695, %v1548_v37  ;;  %v1101_v43 = vpop.f32.mrb[127].mxu0  ;;  %v2369_v14 = vsub.s32 %v2366_v10, %v2368_v11 }
 0x288   : > { %v3182_v40 = vpop.eup %3181  ;;  %v1550_v39 = vpop.f32.mrb[127].mxu1  ;;  %v2184_v44 = vpack.c.bf16 %v3180_v34, %v3172_v21  ;;  %3203 = vpow2.f32 %v2055_v30  ;;  %v2059_v46 = vmul.f32 1.442695, %v1101_v43 }
 0x289   : > { %v3184_v45 = vpop.eup %3183  ;;  %v2063_v47 = vmul.f32 1.442695, %v1550_v39  ;;  %2261 = vmatprep.subr.bf16.mxu0 %v2182_v38  ;;  %3205 = vpow2.f32 %v2057_v41 }
 0x28a   : > { %v3186_v48 = vpop.eup %3185  ;;  %2343 = vmatprep.subr.bf16.mxu1 %v2184_v44  ;;  %2262 = vmatpush1.bf16.msra.mxu0 %v2181_v31  ;;  %3207 = vpow2.f32 %v2061_v42 }
 0x28b   : > { %v3188_v49 = vpop.eup %3187  ;;  %2344 = vmatpush1.bf16.msra.mxu1 %v2183_v33  ;;  %3209 = vpow2.f32 %v2059_v46 }
 0x28c   : > { %v3190_v50 = vpop.eup %3189  ;;  %3211 = vpow2.f32 %v2063_v47 }
 0x28d   : > { %v3192_v51 = vpop.eup %3191  ;;  %v2185_v52 = vpack.c.bf16 %v3190_v50, %v3182_v40 }
 0x28e   : > { %v3194_v53 = vpop.eup %3193  ;;  %v2187_v54 = vpack.c.bf16 %v3192_v51, %v3184_v45 }
 0x28f   : > { %v3196_v55 = vpop.eup %3195  ;;  %v2186_v56 = vpack.c.bf16 %v3194_v53, %v3186_v48 }
 0x290   : > { %v3198_v57 = vpop.eup %3197  ;;  %v2188_v58 = vpack.c.bf16 %v3196_v55, %v3188_v49 }
 0x291   : > { %v3200_v59 = vpop.eup %3199  ;;  %2263 = vmatprep.subr.bf16.mxu0 %v2186_v56 }
 0x292   : > { %v3202_v60 = vpop.eup %3201  ;;  %2345 = vmatprep.subr.bf16.mxu1 %v2188_v58  ;;  %2264 = vmatpush1.bf16.msra.mxu0 %v2185_v52 }
 0x293   : > { %v3204_v61 = vpop.eup %3203  ;;  %2346 = vmatpush1.bf16.msra.mxu1 %v2187_v54 }
 0x294   : > { %v3206_v62 = vpop.eup %3205 }
 0x295   : > { %v3208_v63 = vpop.eup %3207  ;;  %v2189_v2 = vpack.c.bf16 %v3206_v62, %v3198_v57 }
 0x296   : > { %v3210_v3 = vpop.eup %3209  ;;  %v2191_v4 = vpack.c.bf16 %v3208_v63, %v3200_v59 }
 0x297   : > { %v3212_v5 = vpop.eup %3211  ;;  %v2190_v6 = vpack.c.bf16 %v3210_v3, %v3202_v60 }
 0x298   : > { %v2192_v7 = vpack.c.bf16 %v3212_v5, %v3204_v61 }
 0x299   : > { %2265 = vmatprep.subr.bf16.mxu0 %v2190_v6 }
 0x29a   : > { %2347 = vmatprep.subr.bf16.mxu1 %v2192_v7  ;;  %2266 = vmatpush1.bf16.msra.mxu0 %v2189_v2 }
 0x29b   : > { %2348 = vmatpush1.bf16.msra.mxu1 %v2191_v4 }
 0x29d   : > { %2268 = vmatmul.mubr.bf16.vlgmr.msra.gmra.mrb[128].mxu0 %v3268_v36 }
 0x29e   : > { %2350 = vmatmul.mubr.bf16.vlgmr.msra.gmra.mrb[128].mxu1 %v3268_v36 }
 0x370   : > { %v2269_v12 = vpop.f32.mrb[128].mxu0 }
 0x371   : > { %v2351_v15 = vpop.f32.mrb[128].mxu1  ;;  %v2271_v16 = vpop.f32.mrb[129].mxu0 }
 0x372   : > { %v2362_v17 = vcombine.low %v2269_v12, %v2271_v16  ;;  %v2353_v18 = vpop.f32.mrb[129].mxu1  ;;  %v2273_v19 = vpop.f32.mrb[130].mxu0 }
 0x373   : > { %v2363_v20 = vcombine.low %v2351_v15, %v2353_v18  ;;  %v2355_v21 = vpop.f32.mrb[130].mxu1  ;;  %v2274_v23 = vpop.f32.mrb[131].mxu0 }
 0x374   : > { %v2370_v24 = vrot.slane %v2362_v17, %v2369_v14  ;;  %v2356_v25 = vpop.f32.mrb[131].mxu1 }
 0x375   : > { %v2377_v36 = vrot.slane %v2363_v20, %v2369_v14 }
 0x377   : > { %v2378_v26 = vcombine.low %v2370_v24, %v2377_v36 }
 0x379   : > { %v2385_v28 = vrot.slane %v2378_v26, %v2369_v14 }
 0x37b   : > { %v2387_v29 = vadd.f32 %v2385_v28, %v2193_v27 }
 0x37d   : > { %2392 = vst.msk [vmem:[%s3337_s16] sm:$0xf] %vm3320_vm0, %v2387_v29 }
 0x37e PF: > { %s24_s25 = sadd.s32 1, %s3261_s25   ;;  %s3686_s1 = smov %s3257_s24 }
 0x37f   : > { %p21_p5 = scmp.ge.s32.totalorder %s24_s25, 4   ;;  %s3687_s24 = smov %s3689_s26 }
 0x381   :  { %23 = sbr.rel (!%p21_p5) target bundleno = 27 (0x1b), region = 69 }

// kernel: crf_loss.3
= control target key start
LH: loop header
LB: loop body
LE: loop exit
PB: predicated region body
PF: predicated region fallthrough
CT: control target
= control target key end

     0   :  { %s3790_s0 = inlined_call_operand.vmem [shape: s32[3,1], index: 0, kind: input, shape index: {}]   ;;  %s3791_s2 = inlined_call_operand.vmem [shape: f32[2,9,512], index: 2, kind: input, shape index: {}]   ;;  %s3792_s3 = inlined_call_operand.vmem [shape: f32[2,9,512], index: 3, kind: input, shape index: {}]   ;;  %s3793_s4 = inlined_call_operand.vmem [shape: bf16[2,3,512], index: 4, kind: input, shape index: {}]   ;;  %s3794_s5 = inlined_call_operand.vmem [shape: f32[2,3,512], index: 5, kind: output, shape index: {}]   ;;  %s3795_s1 = inlined_call_operand.vmem [shape: s32[3,1], index: 1, kind: input, shape index: {}]  }
   0x1   :  { %s10_s20 = sshll.u32 %s3790_s0, 4  ;;  %s14_s23 = sshll.u32 %s3795_s1, 4  ;;  %s11_s20 = int_to_ptr.vmem [resolvable:$true] %s10_s20  ;;  %s15_s23 = int_to_ptr.vmem [resolvable:$true] %s14_s23 }
   0x2   :  { %s3306_s24 = scalar_lea.vmem %s11_s20, 64  ;;  %p3311_p1 = scmp.lt.s32.totalorder %s11_s20, %s11_s20 }
   0x3   :  { %p3307_p0 = scmp.ne.s32.totalorder %s11_s20, %s3306_s24  ;;  %p3312_p2 = scmp.lt.s32.totalorder %s3306_s24, %s3306_s24 }
   0x5   :  { %p3313_p3 = por %p3312_p2, %p3311_p1 }
   0x7   :  { %p3314_p4 = pnand %p3313_p3, %p3307_p0 }
   0x9   :  { %3317 = shalt.err (!%p3314_p4)  }
   0xa   :  { %s3356_s25 = smov [#allocation3]   ;;  %s3318_s26 = scalar_lea.vmem %s15_s23, 64 }
   0xb   :  { %13 = dma.vmem_to_smem %s11_s20, 64, %s3356_s25, [#allocation2] }
   0xc   :  { %p3319_p5 = scmp.ne.s32.totalorder %s15_s23, %s3318_s26  ;;  %p3323_p6 = scmp.lt.s32.totalorder %s15_s23, %s15_s23 }
   0xd   :  { %p3324_p7 = scmp.lt.s32.totalorder %s3318_s26, %s3318_s26 }
   0xf   :  { %p3325_p8 = por %p3324_p7, %p3323_p6 }
  0x11   :  { %p3326_p9 = pnand %p3325_p8, %p3319_p5 }
  0x13   :  { %3329 = shalt.err (!%p3326_p9)  }
  0x14   :  { %s3357_s0 = smov [#allocation4]  }
  0x15   :  { %17 = dma.vmem_to_smem %s15_s23, 64, %s3357_s0, [#allocation2] }
  0x16   :  { %3342 = dma.done.wait [#allocation2], 128 }
  0x17   :  { %3343 = vsyncadd [#allocation2], 4294967168 }
  0x18   :  { %19 = sfence }
  0x19   :  { %s3398_s1 = smov 0   ;;  %s3400_s27 = smov 0  }
  0x1a   :  { %s3402_s28 = smov 0  }
  0x1b LB: > { %s44_s29 = sadd.s32 1, %s3350_s27  ;;  %p2585_p10 = scmp.ge.s32.totalorder %s3354_s28, 1  ;;  %s3354_s28 = sphi %s3402_s28, %s25_s28   ;;  %s3350_s27 = sphi %s3400_s27, %s3799_s27   ;;  %s3346_s1 = sphi %s3398_s1, %s3798_s1  }
  0x1c   : > { %p46_p11 = scmp.ge.s32.totalorder %s44_s29, 2  ;;  %p211_p12 = scmp.lt.s32.totalorder %s3354_s28, 3 }
  0x1e   : > { %s3801_s29 = smov (%p46_p11, %s44_s29), 0  ;;  %p212_p13 = pnand %p2585_p10, %p211_p12 }
  0x1f   : > { %p262_p0 = scmp.lt.s32.totalorder (!%p212_p13), %s3346_s1, 1  ;;  %s307_s30 = sld [smem:[#allocation3]] (!%p212_p13)  ;;  %v3358_v0 = vmov (!%p212_p13), 0.0  }
  0x20   : > { %215 = sbr.rel (%p212_p13) target bundleno = 889 (0x379), region = 32  ;;  %s308_s6 = sld [smem:[#allocation4]] (!%p212_p13) }
  0x21   : > { %s2594_s7 = sld [smem:[#allocation3 + $0x80]] (!%p212_p13) }
  0x22   : > { %s2595_s8 = sld [smem:[#allocation4 + $0x80]] (!%p212_p13) }
  0x23   : > { %s2598_s9 = sld [smem:[#allocation3 + $0x100]] (!%p212_p13) }
  0x24   : > { %s2599_s26 = sld [smem:[#allocation4 + $0x100]] (!%p212_p13) }
  0x26   : > { %s309_s25 = ssub.s32 (!%p212_p13), %s307_s30, %s308_s6 }
  0x27   : > { %s3803_s1 = smov (!%p262_p0, %s3346_s1), 1  ;;  %p315_p1 = scmp.gt.s32.totalorder %s309_s25, 0 }
  0x28   : > { %s2737_s10 = sshll.u32 %s3803_s1, 6  ;;  %s2739_s11 = sshll.u32 %s3803_s1, 3 }
  0x29   : > { %s3419_s14 = scalar_lea.vmem %s3791_s2, %s2737_s10  ;;  %s3424_s17 = scalar_lea.vmem %s3792_s3, %s2737_s10 }
  0x2a   : > { %s3429_s20 = scalar_lea.vmem %s3793_s4, %s2739_s11  ;;  %s2740_s21 = sshll.u32 %s3803_s1, 4 }
  0x2b   : > { %s3434_s24 = scalar_lea.vmem %s3794_s5, %s2740_s21  ;;  %s334_s0 = ssub.s32 %s2594_s7, %s2595_s8 }
  0x2c   : > { %305 = vst [vmem:[%s3434_s24] sm:$0x77] %v3358_v0  ;;  %306 = vst [vmem:[%s3434_s24 + $0x8] sm:$0x77] %v3358_v0  ;;  %s3805_s25 = smov (!%p315_p1, %s309_s25), 0  ;;  %p340_p2 = scmp.gt.s32.totalorder %s334_s0, 0 }
  0x2d   : > { %s352_s10 = ssub.s32 %s2598_s9, %s2599_s26  ;;  %s317_s11 = smul.u32 %s3805_s25, %s3805_s25 }
  0x2e   : > { %s3807_s0 = smov (!%p340_p2, %s334_s0), 0  ;;  %p358_p3 = scmp.gt.s32.totalorder %s352_s10, 0 }
  0x2f   : > { %s342_s1 = smul.u32 %s3807_s0, %s3807_s0 }
  0x30   : > { %s3809_s10 = smov (!%p358_p3, %s352_s10), 0 }
  0x31   : > { %s343_s12 = sadd.s32 %s342_s1, %s317_s11  ;;  %s360_s13 = smul.u32 %s3809_s10, %s3809_s10 }
  0x33   : > { %s361_s15 = sadd.s32 %s360_s13, %s343_s12 }
  0x34   : > { %p2602_p4 = scmp.gt.s32.totalorder %s361_s15, 1000 }
  0x35   : > { %v366_v1 = vld [vmem:[%s3424_s17] sm:$0xff] (!%p2602_p4)  ;;  %v367_v3 = vld [vmem:[%s3424_s17 + $0x8] sm:$0xff] (!%p2602_p4)  ;;  %vm703_vm0 = vcmask (!%p2602_p4), 1040384   ;;  %vm3359_vm1 = vmmov (!%p2602_p4), 1   ;;  %v377_v9 = vld [vmem:[%s3419_s14 + $0x18] sm:$0xff] (!%p2602_p4)  ;;  %v3360_v11 = vmov (!%p2602_p4), 0.0  }
  0x36   : > { %365 = sbr.rel (%p2602_p4) target bundleno = 889 (0x379), region = 40  ;;  %v370_v2 = vld [vmem:[%s3424_s17 + $0x20] sm:$0x1] (!%p2602_p4)  ;;  %382 = vxpose.xlu0.b32.start [1/2] (short) (!%p2602_p4), %v366_v1, 128  ;;  %414 = vxpose.xlu1.b32.start [1/2] (short) (!%p2602_p4), %v367_v3, 128  ;;  %v371_v4 = vld [vmem:[%s3424_s17 + $0x28] sm:$0x1] (!%p2602_p4)  ;;  %vm3444_vm2 = vmpackc.low (!%p2602_p4), %vm703_vm0, %vm3359_vm1  ;;  %vm510_vm3 = vcmask (!%p2602_p4), 72704  }
  0x37   : > { %v375_v5 = vld [vmem:[%s3419_s14 + $0x8] sm:$0xff] (!%p2602_p4)  ;;  %v381_v10 = vld [vmem:[%s3419_s14 + $0x38] sm:$0x1] (!%p2602_p4)  ;;  %780 = vmatprep.mubr.f32.mxu0 (!%p2602_p4), %v3360_v11  ;;  %1229 = vmatprep.mubr.f32.mxu1 (!%p2602_p4), %v3360_v11  ;;  %v374_v13 = vld [vmem:[%s3419_s14] sm:$0xff] (!%p2602_p4) }
  0x38   : > { %v379_v6 = vld [vmem:[%s3419_s14 + $0x28] sm:$0x1] (!%p2602_p4)  ;;  %v2747_v12 = vpack.c.bf16 (!%p2602_p4), %v381_v10, %v377_v9  ;;  %v378_v14 = vld [vmem:[%s3419_s14 + $0x20] sm:$0x1] (!%p2602_p4)  ;;  %v376_v15 = vld [vmem:[%s3419_s14 + $0x10] sm:$0xff] (!%p2602_p4) }
  0x39   : > { %v2741_v7 = vpack.c.bf16 (!%p2602_p4), %v379_v6, %v375_v5  ;;  %v2744_v16 = vpack.c.bf16 (!%p2602_p4), %v378_v14, %v374_v13  ;;  %v380_v17 = vld [vmem:[%s3419_s14 + $0x30] sm:$0x1] (!%p2602_p4)  ;;  %v369_v20 = vld [vmem:[%s3424_s17 + $0x18] sm:$0xff] (!%p2602_p4) }
  0x3a   : > { %383 = vxpose.xlu0.b32.end [2/2] (short) (!%p2602_p4), %v370_v2, 128  ;;  %415 = vxpose.xlu1.b32.end [2/2] (short) (!%p2602_p4), %v371_v4, 128  ;;  %v2750_v18 = vpack.c.bf16 (!%p2602_p4), %v380_v17, %v376_v15  ;;  %v368_v19 = vld [vmem:[%s3424_s17 + $0x10] sm:$0xff] (!%p2602_p4)  ;;  %v373_v22 = vld [vmem:[%s3424_s17 + $0x38] sm:$0x1] (!%p2602_p4) }
  0x3b   : > { %2743 = vmatprep.subr.msk.bf16.mxu0 (!%p2602_p4), %vm3444_vm2, %v2741_v7  ;;  %2749 = vmatprep.subr.msk.bf16.mxu1 (!%p2602_p4), %vm3444_vm2, %v2747_v12  ;;  %v372_v21 = vld [vmem:[%s3424_s17 + $0x30] sm:$0x1] (!%p2602_p4) }
  0x3c   : > { %2746 = vmatpush1.bf16.msk.msra.mxu0 (!%p2602_p4), %vm3444_vm2, %v2744_v16  ;;  %2752 = vmatpush1.bf16.msk.msra.mxu1 (!%p2602_p4), %vm3444_vm2, %v2750_v18 }
  0x73   : > { %446 = vxpose.xlu0.b32.start [1/2] (short) %v368_v19, 128  ;;  %478 = vxpose.xlu1.b32.start [1/2] (short) %v369_v20, 128 }
  0x77   : > { %447 = vxpose.xlu0.b32.end [2/2] (short) %v372_v21, 128  ;;  %479 = vxpose.xlu1.b32.end [2/2] (short) %v373_v22, 128 }
  0xb6   : > { %v398_v23 = vpop.trf.xlu0  ;;  %v430_v32 = vpop.trf.xlu1 }
  0xb7   : > { %2605 = vmatmul.mubr.msk.f32.vlgmr.msra.gmra.mrb[0].mxu0 %vm510_vm3, %v398_v23  ;;  %2671 = vmatmul.mubr.msk.f32.vlgmr.msra.gmra.mrb[0].mxu1 %vm510_vm3, %v398_v23 }
  0xb8   : > { %786 = vmatprep.mubr.f32.mxu0 %v3360_v11  ;;  %1235 = vmatprep.mubr.f32.mxu1 %v3360_v11 }
  0xba   : > { %v399_v24 = vpop.trf.xlu0  ;;  %v431_v34 = vpop.trf.xlu1 }
  0xbb   : > { %2606 = vmatmul.mubr.msk.f32.gmra.mrb[2].mxu0 %vm510_vm3, %v399_v24  ;;  %2672 = vmatmul.mubr.msk.f32.gmra.mrb[2].mxu1 %vm510_vm3, %v399_v24 }
  0xbc   : > { %792 = vmatprep.mubr.f32.mxu0 %v3360_v11  ;;  %1241 = vmatprep.mubr.f32.mxu1 %v3360_v11 }
  0xbe   : > { %v400_v25 = vpop.trf.xlu0  ;;  %v432_v37 = vpop.trf.xlu1 }
  0xbf   : > { %2607 = vmatmul.mubr.msk.f32.gmra.mrb[4].mxu0 %vm510_vm3, %v400_v25  ;;  %2673 = vmatmul.mubr.msk.f32.gmra.mrb[4].mxu1 %vm510_vm3, %v400_v25 }
  0xc0   : > { %798 = vmatprep.mubr.f32.mxu0 %v3360_v11  ;;  %1247 = vmatprep.mubr.f32.mxu1 %v3360_v11 }
  0xc2   : > { %v401_v26 = vpop.trf.xlu0  ;;  %v433_v39 = vpop.trf.xlu1 }
  0xc3   : > { %2608 = vmatmul.mubr.msk.f32.gmra.mrb[6].mxu0 %vm510_vm3, %v401_v26  ;;  %2674 = vmatmul.mubr.msk.f32.gmra.mrb[6].mxu1 %vm510_vm3, %v401_v26 }
  0xc4   : > { %804 = vmatprep.mubr.f32.mxu0 %v3360_v11  ;;  %1253 = vmatprep.mubr.f32.mxu1 %v3360_v11 }
  0xc6   : > { %v402_v27 = vpop.trf.xlu0  ;;  %v434_v42 = vpop.trf.xlu1 }
  0xc7   : > { %2609 = vmatmul.mubr.msk.f32.gmra.mrb[8].mxu0 %vm510_vm3, %v402_v27  ;;  %2675 = vmatmul.mubr.msk.f32.gmra.mrb[8].mxu1 %vm510_vm3, %v402_v27 }
  0xc8   : > { %810 = vmatprep.mubr.f32.mxu0 %v3360_v11  ;;  %1259 = vmatprep.mubr.f32.mxu1 %v3360_v11 }
  0xca   : > { %v403_v28 = vpop.trf.xlu0  ;;  %v435_v44 = vpop.trf.xlu1 }
  0xcb   : > { %2610 = vmatmul.mubr.msk.f32.gmra.mrb[10].mxu0 %vm510_vm3, %v403_v28  ;;  %2676 = vmatmul.mubr.msk.f32.gmra.mrb[10].mxu1 %vm510_vm3, %v403_v28 }
  0xcc   : > { %816 = vmatprep.mubr.f32.mxu0 %v3360_v11  ;;  %1265 = vmatprep.mubr.f32.mxu1 %v3360_v11 }
  0xce   : > { %v404_v29 = vpop.trf.xlu0  ;;  %v436_v45 = vpop.trf.xlu1 }
  0xcf   : > { %2611 = vmatmul.mubr.msk.f32.gmra.mrb[12].mxu0 %vm510_vm3, %v404_v29  ;;  %2677 = vmatmul.mubr.msk.f32.gmra.mrb[12].mxu1 %vm510_vm3, %v404_v29 }
  0xd0   : > { %822 = vmatprep.mubr.f32.mxu0 %v3360_v11  ;;  %1271 = vmatprep.mubr.f32.mxu1 %v3360_v11 }
  0xd2   : > { %v405_v30 = vpop.trf.xlu0  ;;  %v437_v46 = vpop.trf.xlu1 }
  0xd3   : > { %2612 = vmatmul.mubr.msk.f32.gmra.mrb[14].mxu0 %vm510_vm3, %v405_v30  ;;  %2678 = vmatmul.mubr.msk.f32.gmra.mrb[14].mxu1 %vm510_vm3, %v405_v30 }
  0xd4   : > { %828 = vmatprep.mubr.f32.mxu0 %v3360_v11  ;;  %1277 = vmatprep.mubr.f32.mxu1 %v3360_v11 }
  0xd6   : > { %v406_v31 = vpop.trf.xlu0  ;;  %v438_v47 = vpop.trf.xlu1 }
  0xd7   : > { %2613 = vmatmul.mubr.msk.f32.gmra.mrb[16].mxu0 %vm510_vm3, %v406_v31  ;;  %2679 = vmatmul.mubr.msk.f32.gmra.mrb[16].mxu1 %vm510_vm3, %v406_v31 }
  0xd8   : > { %834 = vmatprep.mubr.f32.mxu0 %v3360_v11  ;;  %1283 = vmatprep.mubr.f32.mxu1 %v3360_v11 }
  0xda   : > { %v407_v33 = vpop.trf.xlu0  ;;  %v439_v48 = vpop.trf.xlu1 }
  0xdb   : > { %2614 = vmatmul.mubr.msk.f32.gmra.mrb[18].mxu0 %vm510_vm3, %v407_v33  ;;  %2680 = vmatmul.mubr.msk.f32.gmra.mrb[18].mxu1 %vm510_vm3, %v407_v33 }
  0xdc   : > { %840 = vmatprep.mubr.f32.mxu0 %v3360_v11  ;;  %1289 = vmatprep.mubr.f32.mxu1 %v3360_v11 }
  0xde   : > { %v408_v35 = vpop.trf.xlu0  ;;  %v440_v49 = vpop.trf.xlu1 }
  0xdf   : > { %2615 = vmatmul.mubr.msk.f32.gmra.mrb[20].mxu0 %vm510_vm3, %v408_v35  ;;  %2681 = vmatmul.mubr.msk.f32.gmra.mrb[20].mxu1 %vm510_vm3, %v408_v35 }
  0xe0   : > { %846 = vmatprep.mubr.f32.mxu0 %v3360_v11  ;;  %1295 = vmatprep.mubr.f32.mxu1 %v3360_v11 }
  0xe2   : > { %v409_v36 = vpop.trf.xlu0  ;;  %v441_v51 = vpop.trf.xlu1 }
  0xe3   : > { %2616 = vmatmul.mubr.msk.f32.gmra.mrb[22].mxu0 %vm510_vm3, %v409_v36  ;;  %2682 = vmatmul.mubr.msk.f32.gmra.mrb[22].mxu1 %vm510_vm3, %v409_v36 }
  0xe4   : > { %852 = vmatprep.mubr.f32.mxu0 %v3360_v11  ;;  %1301 = vmatprep.mubr.f32.mxu1 %v3360_v11 }
  0xe6   : > { %v410_v38 = vpop.trf.xlu0  ;;  %v442_v53 = vpop.trf.xlu1 }
  0xe7   : > { %2617 = vmatmul.mubr.msk.f32.gmra.mrb[24].mxu0 %vm510_vm3, %v410_v38  ;;  %2683 = vmatmul.mubr.msk.f32.gmra.mrb[24].mxu1 %vm510_vm3, %v410_v38 }
  0xe8   : > { %858 = vmatprep.mubr.f32.mxu0 %v3360_v11  ;;  %1307 = vmatprep.mubr.f32.mxu1 %v3360_v11 }
  0xea   : > { %v411_v40 = vpop.trf.xlu0  ;;  %v443_v55 = vpop.trf.xlu1 }
  0xeb   : > { %2618 = vmatmul.mubr.msk.f32.gmra.mrb[26].mxu0 %vm510_vm3, %v411_v40  ;;  %2684 = vmatmul.mubr.msk.f32.gmra.mrb[26].mxu1 %vm510_vm3, %v411_v40 }
  0xec   : > { %864 = vmatprep.mubr.f32.mxu0 %v3360_v11  ;;  %1313 = vmatprep.mubr.f32.mxu1 %v3360_v11 }
  0xee   : > { %v412_v41 = vpop.trf.xlu0  ;;  %v444_v57 = vpop.trf.xlu1 }
  0xef   : > { %2619 = vmatmul.mubr.msk.f32.gmra.mrb[28].mxu0 %vm510_vm3, %v412_v41  ;;  %2685 = vmatmul.mubr.msk.f32.gmra.mrb[28].mxu1 %vm510_vm3, %v412_v41 }
  0xf0   : > { %870 = vmatprep.mubr.f32.mxu0 %v3360_v11  ;;  %1319 = vmatprep.mubr.f32.mxu1 %v3360_v11 }
  0xf2   : > { %v413_v43 = vpop.trf.xlu0  ;;  %v445_v59 = vpop.trf.xlu1 }
  0xf3   : > { %2620 = vmatmul.mubr.msk.f32.gmra.mrb[30].mxu0 %vm510_vm3, %v413_v43  ;;  %2686 = vmatmul.mubr.msk.f32.gmra.mrb[30].mxu1 %vm510_vm3, %v413_v43 }
  0xf4   : > { %876 = vmatprep.mubr.f32.mxu0 %v3360_v11  ;;  %1325 = vmatprep.mubr.f32.mxu1 %v3360_v11 }
  0xf6   : > { %v462_v50 = vpop.trf.xlu0  ;;  %v494_v1 = vpop.trf.xlu1 }
  0xf7   : > { %2621 = vmatmul.mubr.msk.f32.gmra.mrb[32].mxu0 %vm510_vm3, %v430_v32  ;;  %2687 = vmatmul.mubr.msk.f32.gmra.mrb[32].mxu1 %vm510_vm3, %v430_v32 }
  0xf8   : > { %882 = vmatprep.mubr.f32.mxu0 %v3360_v11  ;;  %1331 = vmatprep.mubr.f32.mxu1 %v3360_v11 }
  0xfa   : > { %v463_v52 = vpop.trf.xlu0  ;;  %v495_v3 = vpop.trf.xlu1 }
  0xfb   : > { %2622 = vmatmul.mubr.msk.f32.gmra.mrb[34].mxu0 %vm510_vm3, %v431_v34  ;;  %2688 = vmatmul.mubr.msk.f32.gmra.mrb[34].mxu1 %vm510_vm3, %v431_v34 }
  0xfc   : > { %888 = vmatprep.mubr.f32.mxu0 %v3360_v11  ;;  %1337 = vmatprep.mubr.f32.mxu1 %v3360_v11 }
  0xfe   : > { %v464_v54 = vpop.trf.xlu0  ;;  %v496_v5 = vpop.trf.xlu1 }
  0xff   : > { %2623 = vmatmul.mubr.msk.f32.gmra.mrb[36].mxu0 %vm510_vm3, %v432_v37  ;;  %2689 = vmatmul.mubr.msk.f32.gmra.mrb[36].mxu1 %vm510_vm3, %v432_v37 }
 0x100   : > { %894 = vmatprep.mubr.f32.mxu0 %v3360_v11  ;;  %1343 = vmatprep.mubr.f32.mxu1 %v3360_v11 }
 0x102   : > { %v465_v56 = vpop.trf.xlu0  ;;  %v497_v7 = vpop.trf.xlu1 }
 0x103   : > { %2624 = vmatmul.mubr.msk.f32.gmra.mrb[38].mxu0 %vm510_vm3, %v433_v39  ;;  %2690 = vmatmul.mubr.msk.f32.gmra.mrb[38].mxu1 %vm510_vm3, %v433_v39 }
 0x104   : > { %900 = vmatprep.mubr.f32.mxu0 %v3360_v11  ;;  %1349 = vmatprep.mubr.f32.mxu1 %v3360_v11 }
 0x106   : > { %v466_v58 = vpop.trf.xlu0  ;;  %v498_v9 = vpop.trf.xlu1 }
 0x107   : > { %2625 = vmatmul.mubr.msk.f32.gmra.mrb[40].mxu0 %vm510_vm3, %v434_v42  ;;  %2691 = vmatmul.mubr.msk.f32.gmra.mrb[40].mxu1 %vm510_vm3, %v434_v42 }
 0x108   : > { %906 = vmatprep.mubr.f32.mxu0 %v3360_v11  ;;  %1355 = vmatprep.mubr.f32.mxu1 %v3360_v11 }
 0x10a   : > { %v467_v60 = vpop.trf.xlu0  ;;  %v499_v12 = vpop.trf.xlu1 }
 0x10b   : > { %2626 = vmatmul.mubr.msk.f32.gmra.mrb[42].mxu0 %vm510_vm3, %v435_v44  ;;  %2692 = vmatmul.mubr.msk.f32.gmra.mrb[42].mxu1 %vm510_vm3, %v435_v44 }
 0x10c   : > { %912 = vmatprep.mubr.f32.mxu0 %v3360_v11  ;;  %1361 = vmatprep.mubr.f32.mxu1 %v3360_v11 }
 0x10e   : > { %v468_v61 = vpop.trf.xlu0  ;;  %v500_v14 = vpop.trf.xlu1 }
 0x10f   : > { %2627 = vmatmul.mubr.msk.f32.gmra.mrb[44].mxu0 %vm510_vm3, %v436_v45  ;;  %2693 = vmatmul.mubr.msk.f32.gmra.mrb[44].mxu1 %vm510_vm3, %v436_v45 }
 0x110   : > { %918 = vmatprep.mubr.f32.mxu0 %v3360_v11  ;;  %1367 = vmatprep.mubr.f32.mxu1 %v3360_v11 }
 0x112   : > { %v469_v62 = vpop.trf.xlu0  ;;  %v501_v15 = vpop.trf.xlu1 }
 0x113   : > { %2628 = vmatmul.mubr.msk.f32.gmra.mrb[46].mxu0 %vm510_vm3, %v437_v46  ;;  %2694 = vmatmul.mubr.msk.f32.gmra.mrb[46].mxu1 %vm510_vm3, %v437_v46 }
 0x114   : > { %924 = vmatprep.mubr.f32.mxu0 %v3360_v11  ;;  %1373 = vmatprep.mubr.f32.mxu1 %v3360_v11 }
 0x116   : > { %v470_v63 = vpop.trf.xlu0  ;;  %v3668_v16 = vpop.trf.xlu1 }
 0x117   : > { %2629 = vmatmul.mubr.msk.f32.gmra.mrb[48].mxu0 %vm510_vm3, %v438_v47  ;;  %2695 = vmatmul.mubr.msk.f32.gmra.mrb[48].mxu1 %vm510_vm3, %v438_v47 }
 0x118   : > { %930 = vmatprep.mubr.f32.mxu0 %v3360_v11  ;;  %1379 = vmatprep.mubr.f32.mxu1 %v3360_v11 }
 0x11a   : > { %v471_v0 = vpop.trf.xlu0  ;;  %v3676_v17 = vpop.trf.xlu1 }
 0x11b   : > { %2630 = vmatmul.mubr.msk.f32.gmra.mrb[50].mxu0 %vm510_vm3, %v439_v48  ;;  %2696 = vmatmul.mubr.msk.f32.gmra.mrb[50].mxu1 %vm510_vm3, %v439_v48 }
 0x11c   : > { %936 = vmatprep.mubr.f32.mxu0 %v3360_v11  ;;  %1385 = vmatprep.mubr.f32.mxu1 %v3360_v11 }
 0x11e   : > { %v472_v2 = vpop.trf.xlu0  ;;  %v3684_v18 = vpop.trf.xlu1 }
 0x11f   : > { %2631 = vmatmul.mubr.msk.f32.gmra.mrb[52].mxu0 %vm510_vm3, %v440_v49  ;;  %2697 = vmatmul.mubr.msk.f32.gmra.mrb[52].mxu1 %vm510_vm3, %v440_v49 }
 0x120   : > { %942 = vmatprep.mubr.f32.mxu0 %v3360_v11  ;;  %1391 = vmatprep.mubr.f32.mxu1 %v3360_v11 }
 0x122   : > { %v473_v4 = vpop.trf.xlu0  ;;  %v3694_v35 = vpop.trf.xlu1 }
 0x123   : > { %2632 = vmatmul.mubr.msk.f32.gmra.mrb[54].mxu0 %vm510_vm3, %v441_v51  ;;  %2698 = vmatmul.mubr.msk.f32.gmra.mrb[54].mxu1 %vm510_vm3, %v441_v51 }
 0x124   : > { %948 = vmatprep.mubr.f32.mxu0 %v3360_v11  ;;  %1397 = vmatprep.mubr.f32.mxu1 %v3360_v11 }
 0x126   : > { %v474_v6 = vpop.trf.xlu0 }
 0x127   : > { %2633 = vmatmul.mubr.msk.f32.gmra.mrb[56].mxu0 %vm510_vm3, %v442_v53  ;;  %2699 = vmatmul.mubr.msk.f32.gmra.mrb[56].mxu1 %vm510_vm3, %v442_v53 }
 0x128   : > { %954 = vmatprep.mubr.f32.mxu0 %v3360_v11  ;;  %1403 = vmatprep.mubr.f32.mxu1 %v3360_v11 }
 0x12a   : > { %v475_v8 = vpop.trf.xlu0 }
 0x12b   : > { %2634 = vmatmul.mubr.msk.f32.gmra.mrb[58].mxu0 %vm510_vm3, %v443_v55  ;;  %2700 = vmatmul.mubr.msk.f32.gmra.mrb[58].mxu1 %vm510_vm3, %v443_v55  ;;  %v3708_v55 = vpop.trf.xlu1 }
 0x12c   : > { %960 = vmatprep.mubr.f32.mxu0 %v3360_v11  ;;  %1409 = vmatprep.mubr.f32.mxu1 %v3360_v11 }
 0x12e   : > { %v476_v10 = vpop.trf.xlu0 }
 0x12f   : > { %2635 = vmatmul.mubr.msk.f32.gmra.mrb[60].mxu0 %vm510_vm3, %v444_v57  ;;  %2701 = vmatmul.mubr.msk.f32.gmra.mrb[60].mxu1 %vm510_vm3, %v444_v57 }
 0x130   : > { %966 = vmatprep.mubr.f32.mxu0 %v3360_v11  ;;  %1415 = vmatprep.mubr.f32.mxu1 %v3360_v11 }
 0x132   : > { %v477_v13 = vpop.trf.xlu0 }
 0x133   : > { %2636 = vmatmul.mubr.msk.f32.gmra.mrb[62].mxu0 %vm510_vm3, %v445_v59  ;;  %2702 = vmatmul.mubr.msk.f32.gmra.mrb[62].mxu1 %vm510_vm3, %v445_v59 }
 0x134   : > { %972 = vmatprep.mubr.f32.mxu0 %v3360_v11  ;;  %1421 = vmatprep.mubr.f32.mxu1 %v3360_v11 }
 0x137   : > { %2637 = vmatmul.mubr.msk.f32.gmra.mrb[64].mxu0 %vm510_vm3, %v462_v50  ;;  %2703 = vmatmul.mubr.msk.f32.gmra.mrb[64].mxu1 %vm510_vm3, %v462_v50 }
 0x138   : > { %978 = vmatprep.mubr.f32.mxu0 %v3360_v11  ;;  %1427 = vmatprep.mubr.f32.mxu1 %v3360_v11 }
 0x13b   : > { %2638 = vmatmul.mubr.msk.f32.gmra.mrb[66].mxu0 %vm510_vm3, %v463_v52  ;;  %2704 = vmatmul.mubr.msk.f32.gmra.mrb[66].mxu1 %vm510_vm3, %v463_v52 }
 0x13c   : > { %984 = vmatprep.mubr.f32.mxu0 %v3360_v11  ;;  %1433 = vmatprep.mubr.f32.mxu1 %v3360_v11 }
 0x13f   : > { %2639 = vmatmul.mubr.msk.f32.gmra.mrb[68].mxu0 %vm510_vm3, %v464_v54  ;;  %2705 = vmatmul.mubr.msk.f32.gmra.mrb[68].mxu1 %vm510_vm3, %v464_v54 }
 0x140   : > { %990 = vmatprep.mubr.f32.mxu0 %v3360_v11  ;;  %1439 = vmatprep.mubr.f32.mxu1 %v3360_v11 }
 0x143   : > { %2640 = vmatmul.mubr.msk.f32.gmra.mrb[70].mxu0 %vm510_vm3, %v465_v56  ;;  %2706 = vmatmul.mubr.msk.f32.gmra.mrb[70].mxu1 %vm510_vm3, %v465_v56 }
 0x144   : > { %996 = vmatprep.mubr.f32.mxu0 %v3360_v11  ;;  %1445 = vmatprep.mubr.f32.mxu1 %v3360_v11 }
 0x147   : > { %2641 = vmatmul.mubr.msk.f32.gmra.mrb[72].mxu0 %vm510_vm3, %v466_v58  ;;  %2707 = vmatmul.mubr.msk.f32.gmra.mrb[72].mxu1 %vm510_vm3, %v466_v58 }
 0x148   : > { %1002 = vmatprep.mubr.f32.mxu0 %v3360_v11  ;;  %1451 = vmatprep.mubr.f32.mxu1 %v3360_v11 }
 0x14b   : > { %2642 = vmatmul.mubr.msk.f32.gmra.mrb[74].mxu0 %vm510_vm3, %v467_v60  ;;  %2708 = vmatmul.mubr.msk.f32.gmra.mrb[74].mxu1 %vm510_vm3, %v467_v60 }
 0x14c   : > { %1008 = vmatprep.mubr.f32.mxu0 %v3360_v11  ;;  %1457 = vmatprep.mubr.f32.mxu1 %v3360_v11 }
 0x14f   : > { %2643 = vmatmul.mubr.msk.f32.gmra.mrb[76].mxu0 %vm510_vm3, %v468_v61  ;;  %2709 = vmatmul.mubr.msk.f32.gmra.mrb[76].mxu1 %vm510_vm3, %v468_v61 }
 0x150   : > { %1014 = vmatprep.mubr.f32.mxu0 %v3360_v11  ;;  %1463 = vmatprep.mubr.f32.mxu1 %v3360_v11 }
 0x153   : > { %2644 = vmatmul.mubr.msk.f32.gmra.mrb[78].mxu0 %vm510_vm3, %v469_v62  ;;  %2710 = vmatmul.mubr.msk.f32.gmra.mrb[78].mxu1 %vm510_vm3, %v469_v62 }
 0x154   : > { %1020 = vmatprep.mubr.f32.mxu0 %v3360_v11  ;;  %1469 = vmatprep.mubr.f32.mxu1 %v3360_v11 }
 0x157   : > { %2645 = vmatmul.mubr.msk.f32.gmra.mrb[80].mxu0 %vm510_vm3, %v470_v63  ;;  %2711 = vmatmul.mubr.msk.f32.gmra.mrb[80].mxu1 %vm510_vm3, %v470_v63 }
 0x158   : > { %1026 = vmatprep.mubr.f32.mxu0 %v3360_v11  ;;  %1475 = vmatprep.mubr.f32.mxu1 %v3360_v11 }
 0x15b   : > { %2646 = vmatmul.mubr.msk.f32.gmra.mrb[82].mxu0 %vm510_vm3, %v471_v0  ;;  %2712 = vmatmul.mubr.msk.f32.gmra.mrb[82].mxu1 %vm510_vm3, %v471_v0 }
 0x15c   : > { %1032 = vmatprep.mubr.f32.mxu0 %v3360_v11  ;;  %1481 = vmatprep.mubr.f32.mxu1 %v3360_v11 }
 0x15f   : > { %2647 = vmatmul.mubr.msk.f32.gmra.mrb[84].mxu0 %vm510_vm3, %v472_v2  ;;  %2713 = vmatmul.mubr.msk.f32.gmra.mrb[84].mxu1 %vm510_vm3, %v472_v2 }
 0x160   : > { %1038 = vmatprep.mubr.f32.mxu0 %v3360_v11  ;;  %1487 = vmatprep.mubr.f32.mxu1 %v3360_v11 }
 0x163   : > { %2648 = vmatmul.mubr.msk.f32.gmra.mrb[86].mxu0 %vm510_vm3, %v473_v4  ;;  %2714 = vmatmul.mubr.msk.f32.gmra.mrb[86].mxu1 %vm510_vm3, %v473_v4 }
 0x164   : > { %1044 = vmatprep.mubr.f32.mxu0 %v3360_v11  ;;  %1493 = vmatprep.mubr.f32.mxu1 %v3360_v11 }
 0x167   : > { %2649 = vmatmul.mubr.msk.f32.gmra.mrb[88].mxu0 %vm510_vm3, %v474_v6  ;;  %2715 = vmatmul.mubr.msk.f32.gmra.mrb[88].mxu1 %vm510_vm3, %v474_v6 }
 0x168   : > { %1050 = vmatprep.mubr.f32.mxu0 %v3360_v11  ;;  %1499 = vmatprep.mubr.f32.mxu1 %v3360_v11 }
 0x16b   : > { %2650 = vmatmul.mubr.msk.f32.gmra.mrb[90].mxu0 %vm510_vm3, %v475_v8  ;;  %2716 = vmatmul.mubr.msk.f32.gmra.mrb[90].mxu1 %vm510_vm3, %v475_v8 }
 0x16c   : > { %1056 = vmatprep.mubr.f32.mxu0 %v3360_v11  ;;  %1505 = vmatprep.mubr.f32.mxu1 %v3360_v11 }
 0x16f   : > { %2651 = vmatmul.mubr.msk.f32.gmra.mrb[92].mxu0 %vm510_vm3, %v476_v10  ;;  %2717 = vmatmul.mubr.msk.f32.gmra.mrb[92].mxu1 %vm510_vm3, %v476_v10  ;;  %v3361_v10 = vmov 1983009808  }
 0x170   : > { %1062 = vmatprep.mubr.f32.mxu0 %v3360_v11  ;;  %1511 = vmatprep.mubr.f32.mxu1 %v3360_v11 }
 0x173   : > { %2652 = vmatmul.mubr.msk.f32.gmra.mrb[94].mxu0 %vm510_vm3, %v477_v13  ;;  %2718 = vmatmul.mubr.msk.f32.gmra.mrb[94].mxu1 %vm510_vm3, %v477_v13  ;;  %v2262_v13 = vlaneseq }
 0x174   : > { %1068 = vmatprep.mubr.f32.mxu0 %v3360_v11  ;;  %1517 = vmatprep.mubr.f32.mxu1 %v3360_v11 }
 0x177   : > { %2653 = vmatmul.mubr.msk.f32.gmra.mrb[96].mxu0 %vm510_vm3, %v494_v1  ;;  %2719 = vmatmul.mubr.msk.f32.gmra.mrb[96].mxu1 %vm510_vm3, %v494_v1 }
 0x178   : > { %1074 = vmatprep.mubr.f32.mxu0 %v3360_v11  ;;  %1523 = vmatprep.mubr.f32.mxu1 %v3360_v11 }
 0x17b   : > { %2654 = vmatmul.mubr.msk.f32.gmra.mrb[98].mxu0 %vm510_vm3, %v495_v3  ;;  %2720 = vmatmul.mubr.msk.f32.gmra.mrb[98].mxu1 %vm510_vm3, %v495_v3 }
 0x17c   : > { %1080 = vmatprep.mubr.f32.mxu0 %v3360_v11  ;;  %1529 = vmatprep.mubr.f32.mxu1 %v3360_v11 }
 0x17f   : > { %2655 = vmatmul.mubr.msk.f32.gmra.mrb[100].mxu0 %vm510_vm3, %v496_v5  ;;  %2721 = vmatmul.mubr.msk.f32.gmra.mrb[100].mxu1 %vm510_vm3, %v496_v5 }
 0x180   : > { %1086 = vmatprep.mubr.f32.mxu0 %v3360_v11  ;;  %1535 = vmatprep.mubr.f32.mxu1 %v3360_v11 }
 0x183   : > { %2656 = vmatmul.mubr.msk.f32.gmra.mrb[102].mxu0 %vm510_vm3, %v497_v7  ;;  %2722 = vmatmul.mubr.msk.f32.gmra.mrb[102].mxu1 %vm510_vm3, %v497_v7 }
 0x184   : > { %1092 = vmatprep.mubr.f32.mxu0 %v3360_v11  ;;  %1541 = vmatprep.mubr.f32.mxu1 %v3360_v11 }
 0x187   : > { %2657 = vmatmul.mubr.msk.f32.gmra.mrb[104].mxu0 %vm510_vm3, %v498_v9  ;;  %2723 = vmatmul.mubr.msk.f32.gmra.mrb[104].mxu1 %vm510_vm3, %v498_v9 }
 0x188   : > { %1098 = vmatprep.mubr.f32.mxu0 %v3360_v11  ;;  %1547 = vmatprep.mubr.f32.mxu1 %v3360_v11 }
 0x18a   : > { %v782_v19 = vpop.f32.mrb[0].mxu0  ;;  %v1231_v20 = vpop.f32.mrb[0].mxu1 }
 0x18b   : > { %v1614_v21 = vmul.f32 1.442695, %v782_v19  ;;  %v1618_v22 = vmul.f32 1.442695, %v1231_v20  ;;  %v784_v23 = vpop.f32.mrb[1].mxu0  ;;  %v1233_v24 = vpop.f32.mrb[1].mxu1  ;;  %2658 = vmatmul.mubr.msk.f32.gmra.mrb[106].mxu0 %vm510_vm3, %v499_v12  ;;  %2724 = vmatmul.mubr.msk.f32.gmra.mrb[106].mxu1 %vm510_vm3, %v499_v12  ;;  %v2260_v12 = vunpack.c.l.s4 %v3361_v10 }
 0x18c   : > { %v1616_v25 = vmul.f32 1.442695, %v784_v23  ;;  %v1620_v26 = vmul.f32 1.442695, %v1233_v24  ;;  %1104 = vmatprep.mubr.f32.mxu0 %v3360_v11  ;;  %1553 = vmatprep.mubr.f32.mxu1 %v3360_v11 }
 0x18d   : > { %2792 = vpow2.f32 %v1614_v21 }
 0x18e   : > { %2794 = vpow2.f32 %v1618_v22  ;;  %v788_v27 = vpop.f32.mrb[2].mxu0  ;;  %v1237_v28 = vpop.f32.mrb[2].mxu1 }
 0x18f   : > { %2796 = vpow2.f32 %v1616_v25  ;;  %v1622_v29 = vmul.f32 1.442695, %v788_v27  ;;  %v1626_v30 = vmul.f32 1.442695, %v1237_v28  ;;  %v790_v31 = vpop.f32.mrb[3].mxu0  ;;  %v1239_v32 = vpop.f32.mrb[3].mxu1  ;;  %2659 = vmatmul.mubr.msk.f32.gmra.mrb[108].mxu0 %vm510_vm3, %v500_v14  ;;  %2725 = vmatmul.mubr.msk.f32.gmra.mrb[108].mxu1 %vm510_vm3, %v500_v14  ;;  %v2261_v28 = vunpack.c.0.s8 %v2260_v12 }
 0x190   : > { %2798 = vpow2.f32 %v1620_v26  ;;  %v1624_v33 = vmul.f32 1.442695, %v790_v31  ;;  %v1628_v34 = vmul.f32 1.442695, %v1239_v32  ;;  %1110 = vmatprep.mubr.f32.mxu0 %v3360_v11  ;;  %1559 = vmatprep.mubr.f32.mxu1 %v3360_v11  ;;  %v507_v25 = vpop.trf.xlu1 }
 0x191   : > { %2800 = vpow2.f32 %v1622_v29  ;;  %v2263_v29 = vshrl.u32 %v2262_v13, 7 }
 0x192   : > { %2802 = vpow2.f32 %v1626_v30  ;;  %v794_v36 = vpop.f32.mrb[4].mxu0  ;;  %v1243_v37 = vpop.f32.mrb[4].mxu1 }
 0x193   : > { %2804 = vpow2.f32 %v1624_v33  ;;  %2660 = vmatmul.mubr.msk.f32.gmra.mrb[110].mxu0 %vm510_vm3, %v501_v15  ;;  %2726 = vmatmul.mubr.msk.f32.gmra.mrb[110].mxu1 %vm510_vm3, %v501_v15  ;;  %v1630_v38 = vmul.f32 1.442695, %v794_v36  ;;  %v1634_v39 = vmul.f32 1.442695, %v1243_v37  ;;  %v796_v40 = vpop.f32.mrb[5].mxu0  ;;  %v1245_v41 = vpop.f32.mrb[5].mxu1 }
 0x194   : > { %2806 = vpow2.f32 %v1628_v34  ;;  %v1632_v42 = vmul.f32 1.442695, %v796_v40  ;;  %v1636_v43 = vmul.f32 1.442695, %v1245_v41  ;;  %1116 = vmatprep.mubr.f32.mxu0 %v3360_v11  ;;  %1565 = vmatprep.mubr.f32.mxu1 %v3360_v11 }
 0x195   : > { %2808 = vpow2.f32 %v1630_v38 }
 0x196   : > { %2810 = vpow2.f32 %v1634_v39  ;;  %v800_v44 = vpop.f32.mrb[6].mxu0  ;;  %v1249_v45 = vpop.f32.mrb[6].mxu1 }
 0x197   : > { %v3700_v46 = vpop.eup %2792  ;;  %2812 = vpow2.f32 %v1632_v42  ;;  %v1638_v47 = vmul.f32 1.442695, %v800_v44  ;;  %v1642_v48 = vmul.f32 1.442695, %v1249_v45  ;;  %v802_v49 = vpop.f32.mrb[7].mxu0  ;;  %2661 = vmatmul.mubr.msk.f32.gmra.mrb[112].mxu0 %vm510_vm3, %v3668_v16  ;;  %2727 = vmatmul.mubr.msk.f32.gmra.mrb[112].mxu1 %vm510_vm3, %v3668_v16  ;;  %v3735_v45 = vsub.s32 %v2261_v28, %v2263_v29 }
 0x198   : > { %v1251_v50 = vpop.f32.mrb[7].mxu1  ;;  %v2795_v51 = vpop.eup %2794  ;;  %2814 = vpow2.f32 %v1636_v43  ;;  %v1640_v52 = vmul.f32 1.442695, %v802_v49  ;;  %1122 = vmatprep.mubr.f32.mxu0 %v3360_v11  ;;  %1571 = vmatprep.mubr.f32.mxu1 %v3360_v11 }
 0x199   : > { %v1644_v53 = vmul.f32 1.442695, %v1251_v50  ;;  %v2797_v54 = vpop.eup %2796  ;;  %2816 = vpow2.f32 %v1638_v47 }
 0x19a   : > { %v2799_v56 = vpop.eup %2798  ;;  %2818 = vpow2.f32 %v1642_v48  ;;  %v806_v57 = vpop.f32.mrb[8].mxu0 }
 0x19b   : > { %v1255_v58 = vpop.f32.mrb[8].mxu1  ;;  %v2801_v59 = vpop.eup %2800  ;;  %2820 = vpow2.f32 %v1640_v52  ;;  %2662 = vmatmul.mubr.msk.f32.gmra.mrb[114].mxu0 %vm510_vm3, %v3676_v17  ;;  %2728 = vmatmul.mubr.msk.f32.gmra.mrb[114].mxu1 %vm510_vm3, %v3676_v17  ;;  %v1646_v60 = vmul.f32 1.442695, %v806_v57 }
 0x19c   : > { %v1650_v61 = vmul.f32 1.442695, %v1255_v58  ;;  %v808_v62 = vpop.f32.mrb[9].mxu0  ;;  %v1257_v63 = vpop.f32.mrb[9].mxu1  ;;  %2822 = vpow2.f32 %v1644_v53  ;;  %1128 = vmatprep.mubr.f32.mxu0 %v3360_v11  ;;  %1577 = vmatprep.mubr.f32.mxu1 %v3360_v11  ;;  %v2126_v1 = vpack.c.bf16 %v2801_v59, %v3700_v46 }
 0x19d   : > { %v2803_v0 = vpop.eup %2802  ;;  %v1648_v2 = vmul.f32 1.442695, %v808_v62  ;;  %v1652_v3 = vmul.f32 1.442695, %v1257_v63  ;;  %2824 = vpow2.f32 %v1646_v60 }
 0x19e   : > { %v2805_v4 = vpop.eup %2804  ;;  %v2128_v5 = vpack.c.bf16 %v2803_v0, %v2795_v51  ;;  %2826 = vpow2.f32 %v1650_v61  ;;  %v812_v8 = vpop.f32.mrb[10].mxu0 }
 0x19f   : > { %v2807_v6 = vpop.eup %2806  ;;  %v2127_v7 = vpack.c.bf16 %v2805_v4, %v2797_v54  ;;  %v1261_v9 = vpop.f32.mrb[10].mxu1  ;;  %2663 = vmatmul.mubr.msk.f32.gmra.mrb[116].mxu0 %vm510_vm3, %v3684_v18  ;;  %2729 = vmatmul.mubr.msk.f32.gmra.mrb[116].mxu1 %vm510_vm3, %v3684_v18  ;;  %2828 = vpow2.f32 %v1648_v2  ;;  %v1654_v16 = vmul.f32 1.442695, %v812_v8 }
 0x1a0   : > { %v3717_v14 = vpop.eup %2808  ;;  %v2129_v15 = vpack.c.bf16 %v2807_v6, %v2799_v56  ;;  %v1658_v17 = vmul.f32 1.442695, %v1261_v9  ;;  %v814_v19 = vpop.f32.mrb[11].mxu0  ;;  %1134 = vmatprep.mubr.f32.mxu0 %v3360_v11  ;;  %2830 = vpow2.f32 %v1652_v3  ;;  %1583 = vmatprep.mubr.f32.mxu1 %v3360_v11  ;;  %v3747_v56 = vld.sshfl [vmem:[%s3429_s20] sm:$0xff pattern:$0x76325410] }
 0x1a1   : > { %v1263_v20 = vpop.f32.mrb[11].mxu1  ;;  %v3723_v21 = vpop.eup %2810  ;;  %2279 = vmatprep.subr.bf16.mxu0 %v2127_v7  ;;  %v1656_v22 = vmul.f32 1.442695, %v814_v19  ;;  %2832 = vpow2.f32 %v1654_v16 }
 0x1a2   : > { %v1660_v23 = vmul.f32 1.442695, %v1263_v20  ;;  %v2813_v24 = vpop.eup %2812  ;;  %2361 = vmatprep.subr.bf16.mxu1 %v2129_v15  ;;  %2280 = vmatpush1.bf16.msra.mxu0 %v2126_v1  ;;  %2834 = vpow2.f32 %v1658_v17  ;;  %v818_v18 = vpop.f32.mrb[12].mxu0 }
 0x1a3   : > { %v2815_v26 = vpop.eup %2814  ;;  %2362 = vmatpush1.bf16.msra.mxu1 %v2128_v5  ;;  %v1267_v27 = vpop.f32.mrb[12].mxu1  ;;  %2664 = vmatmul.mubr.msk.f32.gmra.mrb[118].mxu0 %vm510_vm3, %v3694_v35  ;;  %2836 = vpow2.f32 %v1656_v22  ;;  %v1662_v31 = vmul.f32 1.442695, %v818_v18 }
 0x1a4   : > { %v2817_v30 = vpop.eup %2816  ;;  %2730 = vmatmul.mubr.msk.f32.gmra.mrb[118].mxu1 %vm510_vm3, %v3694_v35  ;;  %v1666_v32 = vmul.f32 1.442695, %v1267_v27  ;;  %v820_v33 = vpop.f32.mrb[13].mxu0  ;;  %1140 = vmatprep.mubr.f32.mxu0 %v3360_v11  ;;  %2838 = vpow2.f32 %v1660_v23 }
 0x1a5   : > { %v1269_v34 = vpop.f32.mrb[13].mxu1  ;;  %v2819_v36 = vpop.eup %2818  ;;  %1589 = vmatprep.mubr.f32.mxu1 %v3360_v11  ;;  %v2130_v37 = vpack.c.bf16 %v2817_v30, %v3717_v14  ;;  %v1664_v38 = vmul.f32 1.442695, %v820_v33  ;;  %2840 = vpow2.f32 %v1662_v31 }
 0x1a6   : > { %v1668_v39 = vmul.f32 1.442695, %v1269_v34  ;;  %v2821_v40 = vpop.eup %2820  ;;  %v2132_v41 = vpack.c.bf16 %v2819_v36, %v3723_v21  ;;  %2842 = vpow2.f32 %v1666_v32  ;;  %v824_v43 = vpop.f32.mrb[14].mxu0 }
 0x1a7   : > { %v2823_v35 = vpop.eup %2822  ;;  %v2131_v42 = vpack.c.bf16 %v2821_v40, %v2813_v24  ;;  %v1273_v44 = vpop.f32.mrb[14].mxu1  ;;  %2665 = vmatmul.mubr.msk.f32.gmra.mrb[120].mxu0 %vm510_vm3, %v3708_v55  ;;  %2844 = vpow2.f32 %v1664_v38  ;;  %v1670_v48 = vmul.f32 1.442695, %v824_v43  ;;  %v2273_v24 = vcombine.high %v3747_v56, %v3747_v56 }
 0x1a8   : > { %v3737_v46 = vpop.eup %2824  ;;  %2731 = vmatmul.mubr.msk.f32.gmra.mrb[120].mxu1 %vm510_vm3, %v3708_v55  ;;  %v2133_v47 = vpack.c.bf16 %v2823_v35, %v2815_v26  ;;  %v1674_v49 = vmul.f32 1.442695, %v1273_v44  ;;  %v826_v50 = vpop.f32.mrb[15].mxu0  ;;  %1146 = vmatprep.mubr.f32.mxu0 %v3360_v11  ;;  %2846 = vpow2.f32 %v1668_v39 }
 0x1a9   : > { %v1275_v51 = vpop.f32.mrb[15].mxu1  ;;  %v3743_v52 = vpop.eup %2826  ;;  %2281 = vmatprep.subr.bf16.mxu0 %v2131_v42  ;;  %v1672_v53 = vmul.f32 1.442695, %v826_v50  ;;  %2848 = vpow2.f32 %v1670_v48  ;;  %1595 = vmatprep.mubr.f32.mxu1 %v3360_v11 }
 0x1aa   : > { %v1676_v54 = vmul.f32 1.442695, %v1275_v51  ;;  %v2829_v57 = vpop.eup %2828  ;;  %2363 = vmatprep.subr.bf16.mxu1 %v2133_v47  ;;  %2282 = vmatpush1.bf16.msra.mxu0 %v2130_v37  ;;  %v508_v55 = vpop.trf.xlu1  ;;  %2850 = vpow2.f32 %v1674_v49 }
 0x1ab   : > { %v2831_v58 = vpop.eup %2830  ;;  %2364 = vmatpush1.bf16.msra.mxu1 %v2132_v41  ;;  %v830_v59 = vpop.f32.mrb[16].mxu0  ;;  %2666 = vmatmul.mubr.msk.f32.gmra.mrb[122].mxu0 %vm510_vm3, %v507_v25  ;;  %2852 = vpow2.f32 %v1672_v53 }
 0x1ac   : > { %v1279_v60 = vpop.f32.mrb[16].mxu1  ;;  %v2833_v61 = vpop.eup %2832  ;;  %2732 = vmatmul.mubr.msk.f32.gmra.mrb[122].mxu1 %vm510_vm3, %v507_v25  ;;  %v1678_v62 = vmul.f32 1.442695, %v830_v59  ;;  %1152 = vmatprep.mubr.f32.mxu0 %v3360_v11  ;;  %2854 = vpow2.f32 %v1676_v54 }
 0x1ad   : > { %v1682_v63 = vmul.f32 1.442695, %v1279_v60  ;;  %v832_v0 = vpop.f32.mrb[17].mxu0  ;;  %v1281_v1 = vpop.f32.mrb[17].mxu1  ;;  %1601 = vmatprep.mubr.f32.mxu1 %v3360_v11  ;;  %v2134_v3 = vpack.c.bf16 %v2833_v61, %v3737_v46 }
 0x1ae   : > { %v2835_v2 = vpop.eup %2834  ;;  %v1680_v4 = vmul.f32 1.442695, %v832_v0  ;;  %v1684_v5 = vmul.f32 1.442695, %v1281_v1  ;;  %2856 = vpow2.f32 %v1678_v62  ;;  %v836_v10 = vpop.f32.mrb[18].mxu0 }
 0x1af   : > { %v2837_v6 = vpop.eup %2836  ;;  %v2136_v7 = vpack.c.bf16 %v2835_v2, %v3743_v52  ;;  %2858 = vpow2.f32 %v1682_v63  ;;  %v1285_v12 = vpop.f32.mrb[18].mxu1  ;;  %2667 = vmatmul.mubr.msk.f32.gmra.mrb[124].mxu0 %vm510_vm3, %v508_v55  ;;  %v1686_v15 = vmul.f32 1.442695, %v836_v10 }
 0x1b0   : > { %v2839_v8 = vpop.eup %2838  ;;  %v2135_v9 = vpack.c.bf16 %v2837_v6, %v2829_v57  ;;  %2733 = vmatmul.mubr.msk.f32.gmra.mrb[124].mxu1 %vm510_vm3, %v508_v55  ;;  %2860 = vpow2.f32 %v1680_v4  ;;  %v1690_v16 = vmul.f32 1.442695, %v1285_v12  ;;  %v838_v17 = vpop.f32.mrb[19].mxu0  ;;  %1158 = vmatprep.mubr.f32.mxu0 %v3360_v11 }
 0x1b1   : > { %v3756_v13 = vpop.eup %2840  ;;  %v2137_v14 = vpack.c.bf16 %v2839_v8, %v2831_v58  ;;  %v1287_v19 = vpop.f32.mrb[19].mxu1  ;;  %1607 = vmatprep.mubr.f32.mxu1 %v3360_v11  ;;  %2862 = vpow2.f32 %v1684_v5  ;;  %v1688_v22 = vmul.f32 1.442695, %v838_v17 }
 0x1b2   : > { %v2843_v20 = vpop.eup %2842  ;;  %v509_v21 = vpop.trf.xlu1  ;;  %v1692_v23 = vmul.f32 1.442695, %v1287_v19  ;;  %2283 = vmatprep.subr.bf16.mxu0 %v2135_v9  ;;  %2864 = vpow2.f32 %v1686_v15 }
 0x1b3   : > { %v2845_v25 = vpop.eup %2844  ;;  %2365 = vmatprep.subr.bf16.mxu1 %v2137_v14  ;;  %2284 = vmatpush1.bf16.msra.mxu0 %v2134_v3  ;;  %2866 = vpow2.f32 %v1690_v16  ;;  %v842_v18 = vpop.f32.mrb[20].mxu0 }
 0x1b4   : > { %v2847_v26 = vpop.eup %2846  ;;  %2366 = vmatpush1.bf16.msra.mxu1 %v2136_v7  ;;  %v1291_v27 = vpop.f32.mrb[20].mxu1  ;;  %2668 = vmatmul.mubr.msk.f32.gmra.mrb[126].mxu0 %vm510_vm3, %v509_v21  ;;  %2868 = vpow2.f32 %v1688_v22  ;;  %v1694_v11 = vmul.f32 1.442695, %v842_v18 }
 0x1b5   : > { %v2849_v28 = vpop.eup %2848  ;;  %2734 = vmatmul.mubr.msk.f32.gmra.mrb[126].mxu1 %vm510_vm3, %v509_v21  ;;  %v1698_v29 = vmul.f32 1.442695, %v1291_v27  ;;  %v844_v30 = vpop.f32.mrb[21].mxu0  ;;  %2870 = vpow2.f32 %v1692_v23  ;;  %2311 = vmatprep.mubr.bf16.mxu0 %v2273_v24 }
 0x1b6   : > { %v1293_v31 = vpop.f32.mrb[21].mxu1  ;;  %v2851_v32 = vpop.eup %2850  ;;  %v2138_v33 = vpack.c.bf16 %v2849_v28, %v3756_v13  ;;  %v1696_v34 = vmul.f32 1.442695, %v844_v30  ;;  %2393 = vmatprep.mubr.bf16.mxu1 %v2273_v24  ;;  %2872 = vpow2.f32 %v1694_v11 }
 0x1b7   : > { %v1700_v36 = vmul.f32 1.442695, %v1293_v31  ;;  %v2853_v37 = vpop.eup %2852  ;;  %v2140_v38 = vpack.c.bf16 %v2851_v32, %v2843_v20  ;;  %2874 = vpow2.f32 %v1698_v29  ;;  %v848_v41 = vpop.f32.mrb[22].mxu0 }
 0x1b8   : > { %v2855_v39 = vpop.eup %2854  ;;  %v2139_v40 = vpack.c.bf16 %v2853_v37, %v2845_v25  ;;  %v1297_v35 = vpop.f32.mrb[22].mxu1  ;;  %2876 = vpow2.f32 %v1696_v34  ;;  %v1702_v44 = vmul.f32 1.442695, %v848_v41 }
 0x1b9   : > { %v2857_v42 = vpop.eup %2856  ;;  %v2141_v43 = vpack.c.bf16 %v2855_v39, %v2847_v26  ;;  %v1706_v46 = vmul.f32 1.442695, %v1297_v35  ;;  %v850_v47 = vpop.f32.mrb[23].mxu0  ;;  %2878 = vpow2.f32 %v1700_v36 }
 0x1ba   : > { %v1299_v48 = vpop.f32.mrb[23].mxu1  ;;  %v2859_v49 = vpop.eup %2858  ;;  %2285 = vmatprep.subr.bf16.mxu0 %v2139_v40  ;;  %v1704_v50 = vmul.f32 1.442695, %v850_v47  ;;  %2880 = vpow2.f32 %v1702_v44 }
 0x1bb   : > { %v1708_v51 = vmul.f32 1.442695, %v1299_v48  ;;  %v2861_v52 = vpop.eup %2860  ;;  %2367 = vmatprep.subr.bf16.mxu1 %v2141_v43  ;;  %2286 = vmatpush1.bf16.msra.mxu0 %v2138_v33  ;;  %2882 = vpow2.f32 %v1706_v46  ;;  %v854_v54 = vpop.f32.mrb[24].mxu0 }
 0x1bc   : > { %v2863_v53 = vpop.eup %2862  ;;  %2368 = vmatpush1.bf16.msra.mxu1 %v2140_v38  ;;  %v1303_v57 = vpop.f32.mrb[24].mxu1  ;;  %2884 = vpow2.f32 %v1704_v50  ;;  %v1710_v58 = vmul.f32 1.442695, %v854_v54 }
 0x1bd   : > { %v2865_v55 = vpop.eup %2864  ;;  %v1714_v59 = vmul.f32 1.442695, %v1303_v57  ;;  %v856_v60 = vpop.f32.mrb[25].mxu0  ;;  %2886 = vpow2.f32 %v1708_v51 }
 0x1be   : > { %v1305_v61 = vpop.f32.mrb[25].mxu1  ;;  %v2867_v62 = vpop.eup %2866  ;;  %v2142_v63 = vpack.c.bf16 %v2865_v55, %v2857_v42  ;;  %v1712_v0 = vmul.f32 1.442695, %v856_v60  ;;  %2888 = vpow2.f32 %v1710_v58 }
 0x1bf   : > { %v1716_v1 = vmul.f32 1.442695, %v1305_v61  ;;  %v2869_v2 = vpop.eup %2868  ;;  %v2144_v3 = vpack.c.bf16 %v2867_v62, %v2859_v49  ;;  %2890 = vpow2.f32 %v1714_v59  ;;  %v860_v6 = vpop.f32.mrb[26].mxu0 }
 0x1c0   : > { %v2871_v4 = vpop.eup %2870  ;;  %v2143_v5 = vpack.c.bf16 %v2869_v2, %v2861_v52  ;;  %v1309_v7 = vpop.f32.mrb[26].mxu1  ;;  %2892 = vpow2.f32 %v1712_v0  ;;  %v1718_v10 = vmul.f32 1.442695, %v860_v6 }
 0x1c1   : > { %v2873_v8 = vpop.eup %2872  ;;  %v2145_v9 = vpack.c.bf16 %v2871_v4, %v2863_v53  ;;  %v1722_v12 = vmul.f32 1.442695, %v1309_v7  ;;  %v862_v13 = vpop.f32.mrb[27].mxu0  ;;  %2894 = vpow2.f32 %v1716_v1 }
 0x1c2   : > { %v1311_v14 = vpop.f32.mrb[27].mxu1  ;;  %v2875_v15 = vpop.eup %2874  ;;  %2287 = vmatprep.subr.bf16.mxu0 %v2143_v5  ;;  %v1720_v16 = vmul.f32 1.442695, %v862_v13  ;;  %2896 = vpow2.f32 %v1718_v10 }
 0x1c3   : > { %v1724_v17 = vmul.f32 1.442695, %v1311_v14  ;;  %v2877_v19 = vpop.eup %2876  ;;  %2369 = vmatprep.subr.bf16.mxu1 %v2145_v9  ;;  %2288 = vmatpush1.bf16.msra.mxu0 %v2142_v63  ;;  %2898 = vpow2.f32 %v1722_v12  ;;  %v866_v21 = vpop.f32.mrb[28].mxu0 }
 0x1c4   : > { %v2879_v20 = vpop.eup %2878  ;;  %2370 = vmatpush1.bf16.msra.mxu1 %v2144_v3  ;;  %v1315_v22 = vpop.f32.mrb[28].mxu1  ;;  %2900 = vpow2.f32 %v1720_v16  ;;  %v1726_v24 = vmul.f32 1.442695, %v866_v21 }
 0x1c5   : > { %v2881_v23 = vpop.eup %2880  ;;  %v1730_v25 = vmul.f32 1.442695, %v1315_v22  ;;  %v868_v26 = vpop.f32.mrb[29].mxu0  ;;  %2902 = vpow2.f32 %v1724_v17 }
 0x1c6   : > { %v1317_v18 = vpop.f32.mrb[29].mxu1  ;;  %v2883_v27 = vpop.eup %2882  ;;  %v2146_v28 = vpack.c.bf16 %v2881_v23, %v2873_v8  ;;  %v1728_v11 = vmul.f32 1.442695, %v868_v26  ;;  %2904 = vpow2.f32 %v1726_v24 }
 0x1c7   : > { %v1732_v29 = vmul.f32 1.442695, %v1317_v18  ;;  %v2885_v30 = vpop.eup %2884  ;;  %v2148_v31 = vpack.c.bf16 %v2883_v27, %v2875_v15  ;;  %2906 = vpow2.f32 %v1730_v25  ;;  %v872_v34 = vpop.f32.mrb[30].mxu0 }
 0x1c8   : > { %v2887_v32 = vpop.eup %2886  ;;  %v2147_v33 = vpack.c.bf16 %v2885_v30, %v2877_v19  ;;  %v1321_v36 = vpop.f32.mrb[30].mxu1  ;;  %2908 = vpow2.f32 %v1728_v11  ;;  %v1734_v39 = vmul.f32 1.442695, %v872_v34 }
 0x1c9   : > { %v2889_v37 = vpop.eup %2888  ;;  %v2149_v38 = vpack.c.bf16 %v2887_v32, %v2879_v20  ;;  %v1738_v40 = vmul.f32 1.442695, %v1321_v36  ;;  %v874_v41 = vpop.f32.mrb[31].mxu0  ;;  %2910 = vpow2.f32 %v1732_v29 }
 0x1ca   : > { %v1323_v35 = vpop.f32.mrb[31].mxu1  ;;  %v2891_v42 = vpop.eup %2890  ;;  %2289 = vmatprep.subr.bf16.mxu0 %v2147_v33  ;;  %v1736_v43 = vmul.f32 1.442695, %v874_v41  ;;  %2912 = vpow2.f32 %v1734_v39 }
 0x1cb   : > { %v1740_v44 = vmul.f32 1.442695, %v1323_v35  ;;  %v2893_v46 = vpop.eup %2892  ;;  %2371 = vmatprep.subr.bf16.mxu1 %v2149_v38  ;;  %2290 = vmatpush1.bf16.msra.mxu0 %v2146_v28  ;;  %2914 = vpow2.f32 %v1738_v40  ;;  %v878_v48 = vpop.f32.mrb[32].mxu0 }
 0x1cc   : > { %v2895_v47 = vpop.eup %2894  ;;  %2372 = vmatpush1.bf16.msra.mxu1 %v2148_v31  ;;  %v1327_v49 = vpop.f32.mrb[32].mxu1  ;;  %2916 = vpow2.f32 %v1736_v43  ;;  %v1742_v51 = vmul.f32 1.442695, %v878_v48 }
 0x1cd   : > { %v2897_v50 = vpop.eup %2896  ;;  %v1746_v52 = vmul.f32 1.442695, %v1327_v49  ;;  %v880_v53 = vpop.f32.mrb[33].mxu0  ;;  %2918 = vpow2.f32 %v1740_v44 }
 0x1ce   : > { %v1329_v54 = vpop.f32.mrb[33].mxu1  ;;  %v2899_v57 = vpop.eup %2898  ;;  %v2150_v55 = vpack.c.bf16 %v2897_v50, %v2889_v37  ;;  %v1744_v58 = vmul.f32 1.442695, %v880_v53  ;;  %2920 = vpow2.f32 %v1742_v51 }
 0x1cf   : > { %v1748_v59 = vmul.f32 1.442695, %v1329_v54  ;;  %v2901_v60 = vpop.eup %2900  ;;  %v2152_v61 = vpack.c.bf16 %v2899_v57, %v2891_v42  ;;  %2922 = vpow2.f32 %v1746_v52  ;;  %v884_v0 = vpop.f32.mrb[34].mxu0 }
 0x1d0   : > { %v2903_v62 = vpop.eup %2902  ;;  %v2151_v63 = vpack.c.bf16 %v2901_v60, %v2893_v46  ;;  %v1333_v1 = vpop.f32.mrb[34].mxu1  ;;  %2924 = vpow2.f32 %v1744_v58  ;;  %v1750_v4 = vmul.f32 1.442695, %v884_v0 }
 0x1d1   : > { %v2905_v2 = vpop.eup %2904  ;;  %v2153_v3 = vpack.c.bf16 %v2903_v62, %v2895_v47  ;;  %v1754_v5 = vmul.f32 1.442695, %v1333_v1  ;;  %v886_v6 = vpop.f32.mrb[35].mxu0  ;;  %2926 = vpow2.f32 %v1748_v59 }
 0x1d2   : > { %v1335_v7 = vpop.f32.mrb[35].mxu1  ;;  %v2907_v8 = vpop.eup %2906  ;;  %2291 = vmatprep.subr.bf16.mxu0 %v2151_v63  ;;  %v1752_v9 = vmul.f32 1.442695, %v886_v6  ;;  %2928 = vpow2.f32 %v1750_v4 }
 0x1d3   : > { %v1756_v10 = vmul.f32 1.442695, %v1335_v7  ;;  %v2909_v12 = vpop.eup %2908  ;;  %2373 = vmatprep.subr.bf16.mxu1 %v2153_v3  ;;  %2292 = vmatpush1.bf16.msra.mxu0 %v2150_v55  ;;  %2930 = vpow2.f32 %v1754_v5  ;;  %v890_v14 = vpop.f32.mrb[36].mxu0 }
 0x1d4   : > { %v2911_v13 = vpop.eup %2910  ;;  %2374 = vmatpush1.bf16.msra.mxu1 %v2152_v61  ;;  %v1339_v15 = vpop.f32.mrb[36].mxu1  ;;  %2932 = vpow2.f32 %v1752_v9  ;;  %v1758_v17 = vmul.f32 1.442695, %v890_v14 }
 0x1d5   : > { %v2913_v16 = vpop.eup %2912  ;;  %v1762_v19 = vmul.f32 1.442695, %v1339_v15  ;;  %v892_v20 = vpop.f32.mrb[37].mxu0  ;;  %2934 = vpow2.f32 %v1756_v10 }
 0x1d6   : > { %v1341_v21 = vpop.f32.mrb[37].mxu1  ;;  %v2915_v22 = vpop.eup %2914  ;;  %v2154_v23 = vpack.c.bf16 %v2913_v16, %v2905_v2  ;;  %v1760_v24 = vmul.f32 1.442695, %v892_v20  ;;  %2936 = vpow2.f32 %v1758_v17 }
 0x1d7   : > { %v1764_v25 = vmul.f32 1.442695, %v1341_v21  ;;  %v2917_v26 = vpop.eup %2916  ;;  %v2156_v18 = vpack.c.bf16 %v2915_v22, %v2907_v8  ;;  %2938 = vpow2.f32 %v1762_v19  ;;  %v896_v11 = vpop.f32.mrb[38].mxu0 }
 0x1d8   : > { %v2919_v27 = vpop.eup %2918  ;;  %v2155_v28 = vpack.c.bf16 %v2917_v26, %v2909_v12  ;;  %v1345_v29 = vpop.f32.mrb[38].mxu1  ;;  %2940 = vpow2.f32 %v1760_v24  ;;  %v1766_v32 = vmul.f32 1.442695, %v896_v11 }
 0x1d9   : > { %v2921_v30 = vpop.eup %2920  ;;  %v2157_v31 = vpack.c.bf16 %v2919_v27, %v2911_v13  ;;  %v1770_v33 = vmul.f32 1.442695, %v1345_v29  ;;  %v898_v34 = vpop.f32.mrb[39].mxu0  ;;  %2942 = vpow2.f32 %v1764_v25 }
 0x1da   : > { %v1347_v36 = vpop.f32.mrb[39].mxu1  ;;  %v2923_v37 = vpop.eup %2922  ;;  %2293 = vmatprep.subr.bf16.mxu0 %v2155_v28  ;;  %v1768_v38 = vmul.f32 1.442695, %v898_v34  ;;  %2944 = vpow2.f32 %v1766_v32 }
 0x1db   : > { %v1772_v39 = vmul.f32 1.442695, %v1347_v36  ;;  %v2925_v40 = vpop.eup %2924  ;;  %2375 = vmatprep.subr.bf16.mxu1 %v2157_v31  ;;  %2294 = vmatpush1.bf16.msra.mxu0 %v2154_v23  ;;  %2946 = vpow2.f32 %v1770_v33  ;;  %v902_v35 = vpop.f32.mrb[40].mxu0 }
 0x1dc   : > { %v2927_v41 = vpop.eup %2926  ;;  %2376 = vmatpush1.bf16.msra.mxu1 %v2156_v18  ;;  %v1351_v42 = vpop.f32.mrb[40].mxu1  ;;  %2948 = vpow2.f32 %v1768_v38  ;;  %v1774_v44 = vmul.f32 1.442695, %v902_v35 }
 0x1dd   : > { %v2929_v43 = vpop.eup %2928  ;;  %v1778_v46 = vmul.f32 1.442695, %v1351_v42  ;;  %v904_v47 = vpop.f32.mrb[41].mxu0  ;;  %2950 = vpow2.f32 %v1772_v39 }
 0x1de   : > { %v1353_v48 = vpop.f32.mrb[41].mxu1  ;;  %v2931_v49 = vpop.eup %2930  ;;  %v2158_v50 = vpack.c.bf16 %v2929_v43, %v2921_v30  ;;  %v1776_v51 = vmul.f32 1.442695, %v904_v47  ;;  %2952 = vpow2.f32 %v1774_v44 }
 0x1df   : > { %v1780_v52 = vmul.f32 1.442695, %v1353_v48  ;;  %v2933_v53 = vpop.eup %2932  ;;  %v2160_v54 = vpack.c.bf16 %v2931_v49, %v2923_v37  ;;  %2954 = vpow2.f32 %v1778_v46  ;;  %v908_v58 = vpop.f32.mrb[42].mxu0 }
 0x1e0   : > { %v2935_v57 = vpop.eup %2934  ;;  %v2159_v55 = vpack.c.bf16 %v2933_v53, %v2925_v40  ;;  %v1357_v59 = vpop.f32.mrb[42].mxu1  ;;  %2956 = vpow2.f32 %v1776_v51  ;;  %v1782_v62 = vmul.f32 1.442695, %v908_v58 }
 0x1e1   : > { %v2937_v60 = vpop.eup %2936  ;;  %v2161_v61 = vpack.c.bf16 %v2935_v57, %v2927_v41  ;;  %v1786_v63 = vmul.f32 1.442695, %v1357_v59  ;;  %v910_v0 = vpop.f32.mrb[43].mxu0  ;;  %2958 = vpow2.f32 %v1780_v52 }
 0x1e2   : > { %v1359_v1 = vpop.f32.mrb[43].mxu1  ;;  %v2939_v2 = vpop.eup %2938  ;;  %2295 = vmatprep.subr.bf16.mxu0 %v2159_v55  ;;  %v1784_v3 = vmul.f32 1.442695, %v910_v0  ;;  %2960 = vpow2.f32 %v1782_v62 }
 0x1e3   : > { %v1788_v4 = vmul.f32 1.442695, %v1359_v1  ;;  %v2941_v5 = vpop.eup %2940  ;;  %2377 = vmatprep.subr.bf16.mxu1 %v2161_v61  ;;  %2296 = vmatpush1.bf16.msra.mxu0 %v2158_v50  ;;  %2962 = vpow2.f32 %v1786_v63  ;;  %v914_v7 = vpop.f32.mrb[44].mxu0 }
 0x1e4   : > { %v2943_v6 = vpop.eup %2942  ;;  %2378 = vmatpush1.bf16.msra.mxu1 %v2160_v54  ;;  %v1363_v8 = vpop.f32.mrb[44].mxu1  ;;  %2964 = vpow2.f32 %v1784_v3  ;;  %v1790_v10 = vmul.f32 1.442695, %v914_v7 }
 0x1e5   : > { %v2945_v9 = vpop.eup %2944  ;;  %v1794_v12 = vmul.f32 1.442695, %v1363_v8  ;;  %v916_v13 = vpop.f32.mrb[45].mxu0  ;;  %2966 = vpow2.f32 %v1788_v4 }
 0x1e6   : > { %v1365_v14 = vpop.f32.mrb[45].mxu1  ;;  %v2947_v15 = vpop.eup %2946  ;;  %v1792_v16 = vmul.f32 1.442695, %v916_v13  ;;  %v2162_v19 = vpack.c.bf16 %v2945_v9, %v2937_v60  ;;  %2968 = vpow2.f32 %v1790_v10 }
 0x1e7   : > { %v1796_v17 = vmul.f32 1.442695, %v1365_v14  ;;  %v2949_v20 = vpop.eup %2948  ;;  %v2164_v21 = vpack.c.bf16 %v2947_v15, %v2939_v2  ;;  %2970 = vpow2.f32 %v1794_v12  ;;  %v920_v23 = vpop.f32.mrb[46].mxu0 }
 0x1e8   : > { %v2951_v22 = vpop.eup %2950  ;;  %v1369_v24 = vpop.f32.mrb[46].mxu1  ;;  %v2163_v25 = vpack.c.bf16 %v2949_v20, %v2941_v5  ;;  %2972 = vpow2.f32 %v1792_v16  ;;  %v1798_v18 = vmul.f32 1.442695, %v920_v23 }
 0x1e9   : > { %v2953_v26 = vpop.eup %2952  ;;  %v1802_v27 = vmul.f32 1.442695, %v1369_v24  ;;  %v922_v28 = vpop.f32.mrb[47].mxu0  ;;  %v2165_v29 = vpack.c.bf16 %v2951_v22, %v2943_v6  ;;  %2974 = vpow2.f32 %v1796_v17 }
 0x1ea   : > { %v1371_v11 = vpop.f32.mrb[47].mxu1  ;;  %v2955_v30 = vpop.eup %2954  ;;  %v1800_v31 = vmul.f32 1.442695, %v922_v28  ;;  %2297 = vmatprep.subr.bf16.mxu0 %v2163_v25  ;;  %2976 = vpow2.f32 %v1798_v18 }
 0x1eb   : > { %v1804_v32 = vmul.f32 1.442695, %v1371_v11  ;;  %v2957_v33 = vpop.eup %2956  ;;  %2379 = vmatprep.subr.bf16.mxu1 %v2165_v29  ;;  %2298 = vmatpush1.bf16.msra.mxu0 %v2162_v19  ;;  %2978 = vpow2.f32 %v1802_v27  ;;  %v926_v36 = vpop.f32.mrb[48].mxu0 }
 0x1ec   : > { %v2959_v34 = vpop.eup %2958  ;;  %2380 = vmatpush1.bf16.msra.mxu1 %v2164_v21  ;;  %v1375_v37 = vpop.f32.mrb[48].mxu1  ;;  %2980 = vpow2.f32 %v1800_v31  ;;  %v1806_v39 = vmul.f32 1.442695, %v926_v36 }
 0x1ed   : > { %v2961_v38 = vpop.eup %2960  ;;  %v1810_v40 = vmul.f32 1.442695, %v1375_v37  ;;  %v928_v41 = vpop.f32.mrb[49].mxu0  ;;  %2982 = vpow2.f32 %v1804_v32 }
 0x1ee   : > { %v1377_v35 = vpop.f32.mrb[49].mxu1  ;;  %v2963_v42 = vpop.eup %2962  ;;  %v1808_v43 = vmul.f32 1.442695, %v928_v41  ;;  %v2166_v46 = vpack.c.bf16 %v2961_v38, %v2953_v26  ;;  %2984 = vpow2.f32 %v1806_v39 }
 0x1ef   : > { %v1812_v44 = vmul.f32 1.442695, %v1377_v35  ;;  %v2965_v47 = vpop.eup %2964  ;;  %v2168_v48 = vpack.c.bf16 %v2963_v42, %v2955_v30  ;;  %2986 = vpow2.f32 %v1810_v40  ;;  %v932_v50 = vpop.f32.mrb[50].mxu0 }
 0x1f0   : > { %v2967_v49 = vpop.eup %2966  ;;  %v1381_v51 = vpop.f32.mrb[50].mxu1  ;;  %v2167_v52 = vpack.c.bf16 %v2965_v47, %v2957_v33  ;;  %2988 = vpow2.f32 %v1808_v43  ;;  %v1814_v54 = vmul.f32 1.442695, %v932_v50 }
 0x1f1   : > { %v2969_v53 = vpop.eup %2968  ;;  %v1818_v57 = vmul.f32 1.442695, %v1381_v51  ;;  %v934_v55 = vpop.f32.mrb[51].mxu0  ;;  %v2169_v59 = vpack.c.bf16 %v2967_v49, %v2959_v34  ;;  %2990 = vpow2.f32 %v1812_v44 }
 0x1f2   : > { %v1383_v58 = vpop.f32.mrb[51].mxu1  ;;  %v2971_v60 = vpop.eup %2970  ;;  %v1816_v61 = vmul.f32 1.442695, %v934_v55  ;;  %2299 = vmatprep.subr.bf16.mxu0 %v2167_v52  ;;  %2992 = vpow2.f32 %v1814_v54 }
 0x1f3   : > { %v1820_v62 = vmul.f32 1.442695, %v1383_v58  ;;  %v2973_v63 = vpop.eup %2972  ;;  %2381 = vmatprep.subr.bf16.mxu1 %v2169_v59  ;;  %2300 = vmatpush1.bf16.msra.mxu0 %v2166_v46  ;;  %2994 = vpow2.f32 %v1818_v57  ;;  %v938_v1 = vpop.f32.mrb[52].mxu0 }
 0x1f4   : > { %v2975_v0 = vpop.eup %2974  ;;  %2382 = vmatpush1.bf16.msra.mxu1 %v2168_v48  ;;  %v1387_v2 = vpop.f32.mrb[52].mxu1  ;;  %2996 = vpow2.f32 %v1816_v61  ;;  %v1822_v4 = vmul.f32 1.442695, %v938_v1 }
 0x1f5   : > { %v2977_v3 = vpop.eup %2976  ;;  %v1826_v5 = vmul.f32 1.442695, %v1387_v2  ;;  %v940_v6 = vpop.f32.mrb[53].mxu0  ;;  %2998 = vpow2.f32 %v1820_v62 }
 0x1f6   : > { %v1389_v7 = vpop.f32.mrb[53].mxu1  ;;  %v2979_v8 = vpop.eup %2978  ;;  %v1824_v9 = vmul.f32 1.442695, %v940_v6  ;;  %v2170_v12 = vpack.c.bf16 %v2977_v3, %v2969_v53  ;;  %3000 = vpow2.f32 %v1822_v4 }
 0x1f7   : > { %v1828_v10 = vmul.f32 1.442695, %v1389_v7  ;;  %v2981_v13 = vpop.eup %2980  ;;  %v2172_v14 = vpack.c.bf16 %v2979_v8, %v2971_v60  ;;  %3002 = vpow2.f32 %v1826_v5  ;;  %v944_v16 = vpop.f32.mrb[54].mxu0 }
 0x1f8   : > { %v2983_v15 = vpop.eup %2982  ;;  %v1393_v17 = vpop.f32.mrb[54].mxu1  ;;  %v2171_v19 = vpack.c.bf16 %v2981_v13, %v2973_v63  ;;  %3004 = vpow2.f32 %v1824_v9  ;;  %v1830_v21 = vmul.f32 1.442695, %v944_v16 }
 0x1f9   : > { %v2985_v20 = vpop.eup %2984  ;;  %v1834_v22 = vmul.f32 1.442695, %v1393_v17  ;;  %v946_v23 = vpop.f32.mrb[55].mxu0  ;;  %v2173_v25 = vpack.c.bf16 %v2983_v15, %v2975_v0  ;;  %3006 = vpow2.f32 %v1828_v10 }
 0x1fa   : > { %v1395_v24 = vpop.f32.mrb[55].mxu1  ;;  %v2987_v26 = vpop.eup %2986  ;;  %v1832_v18 = vmul.f32 1.442695, %v946_v23  ;;  %2301 = vmatprep.subr.bf16.mxu0 %v2171_v19  ;;  %3008 = vpow2.f32 %v1830_v21 }
 0x1fb   : > { %v1836_v27 = vmul.f32 1.442695, %v1395_v24  ;;  %v2989_v28 = vpop.eup %2988  ;;  %2383 = vmatprep.subr.bf16.mxu1 %v2173_v25  ;;  %2302 = vmatpush1.bf16.msra.mxu0 %v2170_v12  ;;  %3010 = vpow2.f32 %v1834_v22  ;;  %v950_v29 = vpop.f32.mrb[56].mxu0 }
 0x1fc   : > { %v2991_v11 = vpop.eup %2990  ;;  %2384 = vmatpush1.bf16.msra.mxu1 %v2172_v14  ;;  %v1399_v30 = vpop.f32.mrb[56].mxu1  ;;  %3012 = vpow2.f32 %v1832_v18  ;;  %v1838_v32 = vmul.f32 1.442695, %v950_v29 }
 0x1fd   : > { %v2993_v31 = vpop.eup %2992  ;;  %v1842_v33 = vmul.f32 1.442695, %v1399_v30  ;;  %v952_v34 = vpop.f32.mrb[57].mxu0  ;;  %3014 = vpow2.f32 %v1836_v27 }
 0x1fe   : > { %v1401_v36 = vpop.f32.mrb[57].mxu1  ;;  %v2995_v37 = vpop.eup %2994  ;;  %v1840_v38 = vmul.f32 1.442695, %v952_v34  ;;  %v2174_v40 = vpack.c.bf16 %v2993_v31, %v2985_v20  ;;  %3016 = vpow2.f32 %v1838_v32 }
 0x1ff   : > { %v1844_v39 = vmul.f32 1.442695, %v1401_v36  ;;  %v2997_v41 = vpop.eup %2996  ;;  %v2176_v35 = vpack.c.bf16 %v2995_v37, %v2987_v26  ;;  %3018 = vpow2.f32 %v1842_v33  ;;  %v956_v43 = vpop.f32.mrb[58].mxu0 }
 0x200   : > { %v2999_v42 = vpop.eup %2998  ;;  %v1405_v44 = vpop.f32.mrb[58].mxu1  ;;  %v2175_v46 = vpack.c.bf16 %v2997_v41, %v2989_v28  ;;  %3020 = vpow2.f32 %v1840_v38  ;;  %v1846_v48 = vmul.f32 1.442695, %v956_v43 }
 0x201   : > { %v3001_v47 = vpop.eup %3000  ;;  %v1850_v49 = vmul.f32 1.442695, %v1405_v44  ;;  %v958_v50 = vpop.f32.mrb[59].mxu0  ;;  %v2177_v52 = vpack.c.bf16 %v2999_v42, %v2991_v11  ;;  %3022 = vpow2.f32 %v1844_v39 }
 0x202   : > { %v1407_v51 = vpop.f32.mrb[59].mxu1  ;;  %v3003_v53 = vpop.eup %3002  ;;  %v1848_v54 = vmul.f32 1.442695, %v958_v50  ;;  %2303 = vmatprep.subr.bf16.mxu0 %v2175_v46  ;;  %3024 = vpow2.f32 %v1846_v48 }
 0x203   : > { %v1852_v57 = vmul.f32 1.442695, %v1407_v51  ;;  %v3005_v55 = vpop.eup %3004  ;;  %2385 = vmatprep.subr.bf16.mxu1 %v2177_v52  ;;  %2304 = vmatpush1.bf16.msra.mxu0 %v2174_v40  ;;  %3026 = vpow2.f32 %v1850_v49  ;;  %v962_v59 = vpop.f32.mrb[60].mxu0 }
 0x204   : > { %v3007_v58 = vpop.eup %3006  ;;  %2386 = vmatpush1.bf16.msra.mxu1 %v2176_v35  ;;  %v1411_v60 = vpop.f32.mrb[60].mxu1  ;;  %3028 = vpow2.f32 %v1848_v54  ;;  %v1854_v62 = vmul.f32 1.442695, %v962_v59 }
 0x205   : > { %v3009_v61 = vpop.eup %3008  ;;  %v1858_v63 = vmul.f32 1.442695, %v1411_v60  ;;  %v964_v0 = vpop.f32.mrb[61].mxu0  ;;  %3030 = vpow2.f32 %v1852_v57 }
 0x206   : > { %v1413_v1 = vpop.f32.mrb[61].mxu1  ;;  %v3011_v2 = vpop.eup %3010  ;;  %v1856_v3 = vmul.f32 1.442695, %v964_v0  ;;  %v2178_v5 = vpack.c.bf16 %v3009_v61, %v3001_v47  ;;  %3032 = vpow2.f32 %v1854_v62 }
 0x207   : > { %v1860_v4 = vmul.f32 1.442695, %v1413_v1  ;;  %v3013_v6 = vpop.eup %3012  ;;  %v2180_v7 = vpack.c.bf16 %v3011_v2, %v3003_v53  ;;  %3034 = vpow2.f32 %v1858_v63  ;;  %v968_v9 = vpop.f32.mrb[62].mxu0 }
 0x208   : > { %v3015_v8 = vpop.eup %3014  ;;  %v1417_v10 = vpop.f32.mrb[62].mxu1  ;;  %v2179_v12 = vpack.c.bf16 %v3013_v6, %v3005_v55  ;;  %3036 = vpow2.f32 %v1856_v3  ;;  %v1862_v14 = vmul.f32 1.442695, %v968_v9  ;;  %v3304_v6 = vld [vmem:[%s3429_s20] sm:$0xff] }
 0x209   : > { %v3017_v13 = vpop.eup %3016  ;;  %v1866_v15 = vmul.f32 1.442695, %v1417_v10  ;;  %v970_v16 = vpop.f32.mrb[63].mxu0  ;;  %v2181_v19 = vpack.c.bf16 %v3015_v8, %v3007_v58  ;;  %3038 = vpow2.f32 %v1860_v4 }
 0x20a   : > { %v1419_v17 = vpop.f32.mrb[63].mxu1  ;;  %v3019_v20 = vpop.eup %3018  ;;  %v1864_v21 = vmul.f32 1.442695, %v970_v16  ;;  %2305 = vmatprep.subr.bf16.mxu0 %v2179_v12  ;;  %3040 = vpow2.f32 %v1862_v14 }
 0x20b   : > { %v1868_v22 = vmul.f32 1.442695, %v1419_v17  ;;  %v3021_v23 = vpop.eup %3020  ;;  %2387 = vmatprep.subr.bf16.mxu1 %v2181_v19  ;;  %2306 = vmatpush1.bf16.msra.mxu0 %v2178_v5  ;;  %3042 = vpow2.f32 %v1866_v15  ;;  %v974_v25 = vpop.f32.mrb[64].mxu0 }
 0x20c   : > { %v3023_v24 = vpop.eup %3022  ;;  %2388 = vmatpush1.bf16.msra.mxu1 %v2180_v7  ;;  %v1423_v26 = vpop.f32.mrb[64].mxu1  ;;  %3044 = vpow2.f32 %v1864_v21  ;;  %v1870_v27 = vmul.f32 1.442695, %v974_v25  ;;  %v2258_v7 = vcombine.high %v3304_v6, %v3304_v6 }
 0x20d   : > { %v3025_v18 = vpop.eup %3024  ;;  %v1874_v28 = vmul.f32 1.442695, %v1423_v26  ;;  %v976_v11 = vpop.f32.mrb[65].mxu0  ;;  %3046 = vpow2.f32 %v1868_v22 }
 0x20e   : > { %v1425_v29 = vpop.f32.mrb[65].mxu1  ;;  %v3027_v30 = vpop.eup %3026  ;;  %v1872_v31 = vmul.f32 1.442695, %v976_v11  ;;  %v2182_v33 = vpack.c.bf16 %v3025_v18, %v3017_v13  ;;  %3048 = vpow2.f32 %v1870_v27  ;;  %v3769_v19 = vrot.slane %v2258_v7, %v3735_v45 }
 0x20f   : > { %v1876_v32 = vmul.f32 1.442695, %v1425_v29  ;;  %v3029_v34 = vpop.eup %3028  ;;  %v2184_v36 = vpack.c.bf16 %v3027_v30, %v3019_v20  ;;  %3050 = vpow2.f32 %v1874_v28  ;;  %v980_v38 = vpop.f32.mrb[66].mxu0 }
 0x210   : > { %v3031_v37 = vpop.eup %3030  ;;  %v1429_v39 = vpop.f32.mrb[66].mxu1  ;;  %v2183_v40 = vpack.c.bf16 %v3029_v34, %v3021_v23  ;;  %3052 = vpow2.f32 %v1872_v31  ;;  %v1878_v35 = vmul.f32 1.442695, %v980_v38 }
 0x211   : > { %v3033_v41 = vpop.eup %3032  ;;  %v1882_v42 = vmul.f32 1.442695, %v1429_v39  ;;  %v982_v43 = vpop.f32.mrb[67].mxu0  ;;  %v2185_v46 = vpack.c.bf16 %v3031_v37, %v3023_v24  ;;  %3054 = vpow2.f32 %v1876_v32  ;;  %v2274_v24 = vcombine.high %v3769_v19, %v3769_v19 }
 0x212   : > { %v1431_v44 = vpop.f32.mrb[67].mxu1  ;;  %v3035_v47 = vpop.eup %3034  ;;  %v1880_v48 = vmul.f32 1.442695, %v982_v43  ;;  %2307 = vmatprep.subr.bf16.mxu0 %v2183_v40  ;;  %3056 = vpow2.f32 %v1878_v35 }
 0x213   : > { %v1884_v49 = vmul.f32 1.442695, %v1431_v44  ;;  %v3037_v50 = vpop.eup %3036  ;;  %2389 = vmatprep.subr.bf16.mxu1 %v2185_v46  ;;  %2308 = vmatpush1.bf16.msra.mxu0 %v2182_v33  ;;  %3058 = vpow2.f32 %v1882_v42  ;;  %v986_v52 = vpop.f32.mrb[68].mxu0 }
 0x214   : > { %v3039_v51 = vpop.eup %3038  ;;  %v1435_v53 = vpop.f32.mrb[68].mxu1  ;;  %2390 = vmatpush1.bf16.msra.mxu1 %v2184_v36  ;;  %3060 = vpow2.f32 %v1880_v48  ;;  %v1886_v57 = vmul.f32 1.442695, %v986_v52 }
 0x215   : > { %v3041_v54 = vpop.eup %3040  ;;  %v1890_v55 = vmul.f32 1.442695, %v1435_v53  ;;  %v988_v58 = vpop.f32.mrb[69].mxu0  ;;  %3062 = vpow2.f32 %v1884_v49 }
 0x216   : > { %v1437_v59 = vpop.f32.mrb[69].mxu1  ;;  %v3043_v60 = vpop.eup %3042  ;;  %v1888_v61 = vmul.f32 1.442695, %v988_v58  ;;  %v2186_v63 = vpack.c.bf16 %v3041_v54, %v3033_v41  ;;  %3064 = vpow2.f32 %v1886_v57 }
 0x217   : > { %v1892_v62 = vmul.f32 1.442695, %v1437_v59  ;;  %v3045_v0 = vpop.eup %3044  ;;  %v2188_v1 = vpack.c.bf16 %v3043_v60, %v3035_v47  ;;  %3066 = vpow2.f32 %v1890_v55  ;;  %v992_v3 = vpop.f32.mrb[70].mxu0 }
 0x218   : > { %v3047_v2 = vpop.eup %3046  ;;  %v1441_v4 = vpop.f32.mrb[70].mxu1  ;;  %v2187_v5 = vpack.c.bf16 %v3045_v0, %v3037_v50  ;;  %3068 = vpow2.f32 %v1888_v61  ;;  %v1894_v9 = vmul.f32 1.442695, %v992_v3 }
 0x219   : > { %v3049_v8 = vpop.eup %3048  ;;  %v1898_v10 = vmul.f32 1.442695, %v1441_v4  ;;  %v994_v12 = vpop.f32.mrb[71].mxu0  ;;  %v2189_v14 = vpack.c.bf16 %v3047_v2, %v3039_v51  ;;  %3070 = vpow2.f32 %v1892_v62 }
 0x21a   : > { %v1443_v13 = vpop.f32.mrb[71].mxu1  ;;  %v3051_v15 = vpop.eup %3050  ;;  %v1896_v16 = vmul.f32 1.442695, %v994_v12  ;;  %2309 = vmatprep.subr.bf16.mxu0 %v2187_v5  ;;  %3072 = vpow2.f32 %v1894_v9 }
 0x21b   : > { %v1900_v17 = vmul.f32 1.442695, %v1443_v13  ;;  %v3053_v20 = vpop.eup %3052  ;;  %2391 = vmatprep.subr.bf16.mxu1 %v2189_v14  ;;  %2310 = vmatpush1.bf16.msra.mxu0 %v2186_v63  ;;  %3074 = vpow2.f32 %v1898_v10  ;;  %v998_v22 = vpop.f32.mrb[72].mxu0 }
 0x21c   : > { %v3055_v21 = vpop.eup %3054  ;;  %v1447_v23 = vpop.f32.mrb[72].mxu1  ;;  %2392 = vmatpush1.bf16.msra.mxu1 %v2188_v1  ;;  %3076 = vpow2.f32 %v1896_v16  ;;  %v1902_v26 = vmul.f32 1.442695, %v998_v22 }
 0x21d   : > { %v3057_v25 = vpop.eup %3056  ;;  %v1906_v18 = vmul.f32 1.442695, %v1447_v23  ;;  %v1000_v27 = vpop.f32.mrb[73].mxu0  ;;  %3078 = vpow2.f32 %v1900_v17 }
 0x21e   : > { %v1449_v28 = vpop.f32.mrb[73].mxu1  ;;  %v3059_v45 = vpop.eup %3058  ;;  %v1904_v11 = vmul.f32 1.442695, %v1000_v27  ;;  %2312 = vmatmul.mubr.bf16.vlgmr.msra.gmra.mrb[128].mxu0 %v3747_v56  ;;  %v2190_v30 = vpack.c.bf16 %v3057_v25, %v3049_v8  ;;  %3080 = vpow2.f32 %v1902_v26 }
 0x21f   : > { %v1908_v29 = vmul.f32 1.442695, %v1449_v28  ;;  %v3061_v31 = vpop.eup %3060  ;;  %2394 = vmatmul.mubr.bf16.vlgmr.msra.gmra.mrb[128].mxu1 %v3747_v56  ;;  %v2192_v32 = vpack.c.bf16 %v3059_v45, %v3051_v15  ;;  %2352 = vmatprep.mubr.bf16.mxu0 %v2274_v24  ;;  %3082 = vpow2.f32 %v1906_v18  ;;  %v1004_v34 = vpop.f32.mrb[74].mxu0 }
 0x220   : > { %v3063_v33 = vpop.eup %3062  ;;  %v1453_v36 = vpop.f32.mrb[74].mxu1  ;;  %v2191_v37 = vpack.c.bf16 %v3061_v31, %v3053_v20  ;;  %2434 = vmatprep.mubr.bf16.mxu1 %v2274_v24  ;;  %3084 = vpow2.f32 %v1904_v11  ;;  %v1910_v39 = vmul.f32 1.442695, %v1004_v34 }
 0x221   : > { %v3065_v38 = vpop.eup %3064  ;;  %v1914_v40 = vmul.f32 1.442695, %v1453_v36  ;;  %v1006_v41 = vpop.f32.mrb[75].mxu0  ;;  %v2193_v42 = vpack.c.bf16 %v3063_v33, %v3055_v21  ;;  %3086 = vpow2.f32 %v1908_v29 }
 0x222   : > { %v1455_v35 = vpop.f32.mrb[75].mxu1  ;;  %v3067_v43 = vpop.eup %3066  ;;  %v1912_v44 = vmul.f32 1.442695, %v1006_v41  ;;  %2320 = vmatprep.subr.bf16.mxu0 %v2191_v37  ;;  %3088 = vpow2.f32 %v1910_v39 }
 0x223   : > { %v1916_v46 = vmul.f32 1.442695, %v1455_v35  ;;  %v3069_v56 = vpop.eup %3068  ;;  %2402 = vmatprep.subr.bf16.mxu1 %v2193_v42  ;;  %2321 = vmatpush1.bf16.msra.mxu0 %v2190_v30  ;;  %3090 = vpow2.f32 %v1914_v40  ;;  %v1010_v48 = vpop.f32.mrb[76].mxu0 }
 0x224   : > { %v3071_v47 = vpop.eup %3070  ;;  %v1459_v49 = vpop.f32.mrb[76].mxu1  ;;  %2403 = vmatpush1.bf16.msra.mxu1 %v2192_v32  ;;  %3092 = vpow2.f32 %v1912_v44  ;;  %v1918_v51 = vmul.f32 1.442695, %v1010_v48 }
 0x225   : > { %v3073_v50 = vpop.eup %3072  ;;  %v1922_v52 = vmul.f32 1.442695, %v1459_v49  ;;  %v1012_v53 = vpop.f32.mrb[77].mxu0  ;;  %3094 = vpow2.f32 %v1916_v46 }
 0x226   : > { %v1461_v54 = vpop.f32.mrb[77].mxu1  ;;  %v3075_v57 = vpop.eup %3074  ;;  %v1920_v55 = vmul.f32 1.442695, %v1012_v53  ;;  %v2194_v59 = vpack.c.bf16 %v3073_v50, %v3065_v38  ;;  %3096 = vpow2.f32 %v1918_v51 }
 0x227   : > { %v1924_v58 = vmul.f32 1.442695, %v1461_v54  ;;  %v3077_v60 = vpop.eup %3076  ;;  %v2196_v61 = vpack.c.bf16 %v3075_v57, %v3067_v43  ;;  %3098 = vpow2.f32 %v1922_v52  ;;  %v1016_v63 = vpop.f32.mrb[78].mxu0 }
 0x228   : > { %v3079_v62 = vpop.eup %3078  ;;  %v1465_v0 = vpop.f32.mrb[78].mxu1  ;;  %v2195_v1 = vpack.c.bf16 %v3077_v60, %v3069_v56  ;;  %3100 = vpow2.f32 %v1920_v55  ;;  %v1926_v3 = vmul.f32 1.442695, %v1016_v63 }
 0x229   : > { %v3081_v2 = vpop.eup %3080  ;;  %v1930_v4 = vmul.f32 1.442695, %v1465_v0  ;;  %v1018_v5 = vpop.f32.mrb[79].mxu0  ;;  %v2197_v7 = vpack.c.bf16 %v3079_v62, %v3071_v47  ;;  %3102 = vpow2.f32 %v1924_v58 }
 0x22a   : > { %v1467_v6 = vpop.f32.mrb[79].mxu1  ;;  %v3083_v8 = vpop.eup %3082  ;;  %v1928_v9 = vmul.f32 1.442695, %v1018_v5  ;;  %2322 = vmatprep.subr.bf16.mxu0 %v2195_v1  ;;  %3104 = vpow2.f32 %v1926_v3 }
 0x22b   : > { %v1932_v10 = vmul.f32 1.442695, %v1467_v6  ;;  %v3085_v12 = vpop.eup %3084  ;;  %2404 = vmatprep.subr.bf16.mxu1 %v2197_v7  ;;  %2323 = vmatpush1.bf16.msra.mxu0 %v2194_v59  ;;  %3106 = vpow2.f32 %v1930_v4  ;;  %v1022_v14 = vpop.f32.mrb[80].mxu0 }
 0x22c   : > { %v3087_v13 = vpop.eup %3086  ;;  %v1471_v15 = vpop.f32.mrb[80].mxu1  ;;  %2405 = vmatpush1.bf16.msra.mxu1 %v2196_v61  ;;  %3108 = vpow2.f32 %v1928_v9  ;;  %v1934_v17 = vmul.f32 1.442695, %v1022_v14 }
 0x22d   : > { %v3089_v16 = vpop.eup %3088  ;;  %v1938_v20 = vmul.f32 1.442695, %v1471_v15  ;;  %v1024_v21 = vpop.f32.mrb[81].mxu0  ;;  %3110 = vpow2.f32 %v1932_v10 }
 0x22e   : > { %v1473_v22 = vpop.f32.mrb[81].mxu1  ;;  %v3091_v23 = vpop.eup %3090  ;;  %v1936_v24 = vmul.f32 1.442695, %v1024_v21  ;;  %v2198_v26 = vpack.c.bf16 %v3089_v16, %v3081_v2  ;;  %3112 = vpow2.f32 %v1934_v17 }
 0x22f   : > { %v1940_v25 = vmul.f32 1.442695, %v1473_v22  ;;  %v3093_v18 = vpop.eup %3092  ;;  %v2200_v27 = vpack.c.bf16 %v3091_v23, %v3083_v8  ;;  %3114 = vpow2.f32 %v1938_v20  ;;  %v1028_v45 = vpop.f32.mrb[82].mxu0 }
 0x230   : > { %v3095_v28 = vpop.eup %3094  ;;  %v1477_v11 = vpop.f32.mrb[82].mxu1  ;;  %v2199_v29 = vpack.c.bf16 %v3093_v18, %v3085_v12  ;;  %3116 = vpow2.f32 %v1936_v24  ;;  %v1942_v31 = vmul.f32 1.442695, %v1028_v45 }
 0x231   : > { %v3097_v30 = vpop.eup %3096  ;;  %v1946_v32 = vmul.f32 1.442695, %v1477_v11  ;;  %v1030_v33 = vpop.f32.mrb[83].mxu0  ;;  %v2201_v36 = vpack.c.bf16 %v3095_v28, %v3087_v13  ;;  %3118 = vpow2.f32 %v1940_v25 }
 0x232   : > { %v1479_v34 = vpop.f32.mrb[83].mxu1  ;;  %v3099_v37 = vpop.eup %3098  ;;  %v1944_v38 = vmul.f32 1.442695, %v1030_v33  ;;  %2324 = vmatprep.subr.bf16.mxu0 %v2199_v29  ;;  %3120 = vpow2.f32 %v1942_v31 }
 0x233   : > { %v1948_v39 = vmul.f32 1.442695, %v1479_v34  ;;  %v3101_v40 = vpop.eup %3100  ;;  %2406 = vmatprep.subr.bf16.mxu1 %v2201_v36  ;;  %2325 = vmatpush1.bf16.msra.mxu0 %v2198_v26  ;;  %3122 = vpow2.f32 %v1946_v32  ;;  %v1034_v35 = vpop.f32.mrb[84].mxu0 }
 0x234   : > { %v3103_v41 = vpop.eup %3102  ;;  %v1483_v42 = vpop.f32.mrb[84].mxu1  ;;  %2407 = vmatpush1.bf16.msra.mxu1 %v2200_v27  ;;  %3124 = vpow2.f32 %v1944_v38  ;;  %v1950_v44 = vmul.f32 1.442695, %v1034_v35 }
 0x235   : > { %v3105_v43 = vpop.eup %3104  ;;  %v1954_v46 = vmul.f32 1.442695, %v1483_v42  ;;  %v1036_v56 = vpop.f32.mrb[85].mxu0  ;;  %3126 = vpow2.f32 %v1948_v39 }
 0x236   : > { %v1485_v47 = vpop.f32.mrb[85].mxu1  ;;  %v3107_v48 = vpop.eup %3106  ;;  %v1952_v49 = vmul.f32 1.442695, %v1036_v56  ;;  %v2202_v51 = vpack.c.bf16 %v3105_v43, %v3097_v30  ;;  %3128 = vpow2.f32 %v1950_v44 }
 0x237   : > { %v1956_v50 = vmul.f32 1.442695, %v1485_v47  ;;  %v3109_v52 = vpop.eup %3108  ;;  %v2204_v53 = vpack.c.bf16 %v3107_v48, %v3099_v37  ;;  %3130 = vpow2.f32 %v1954_v46  ;;  %v1040_v57 = vpop.f32.mrb[86].mxu0 }
 0x238   : > { %v3111_v54 = vpop.eup %3110  ;;  %v1489_v55 = vpop.f32.mrb[86].mxu1  ;;  %v2203_v58 = vpack.c.bf16 %v3109_v52, %v3101_v40  ;;  %3132 = vpow2.f32 %v1952_v49  ;;  %v1958_v60 = vmul.f32 1.442695, %v1040_v57 }
 0x239   : > { %v3113_v59 = vpop.eup %3112  ;;  %v1962_v61 = vmul.f32 1.442695, %v1489_v55  ;;  %v1042_v62 = vpop.f32.mrb[87].mxu0  ;;  %v2205_v0 = vpack.c.bf16 %v3111_v54, %v3103_v41  ;;  %3134 = vpow2.f32 %v1956_v50 }
 0x23a   : > { %v1491_v63 = vpop.f32.mrb[87].mxu1  ;;  %v3115_v1 = vpop.eup %3114  ;;  %v1960_v2 = vmul.f32 1.442695, %v1042_v62  ;;  %2326 = vmatprep.subr.bf16.mxu0 %v2203_v58  ;;  %3136 = vpow2.f32 %v1958_v60 }
 0x23b   : > { %v1964_v3 = vmul.f32 1.442695, %v1491_v63  ;;  %v3117_v4 = vpop.eup %3116  ;;  %2408 = vmatprep.subr.bf16.mxu1 %v2205_v0  ;;  %2327 = vmatpush1.bf16.msra.mxu0 %v2202_v51  ;;  %3138 = vpow2.f32 %v1962_v61  ;;  %v1046_v6 = vpop.f32.mrb[88].mxu0 }
 0x23c   : > { %v3119_v5 = vpop.eup %3118  ;;  %v1495_v7 = vpop.f32.mrb[88].mxu1  ;;  %2409 = vmatpush1.bf16.msra.mxu1 %v2204_v53  ;;  %3140 = vpow2.f32 %v1960_v2  ;;  %v1966_v9 = vmul.f32 1.442695, %v1046_v6 }
 0x23d   : > { %v3121_v8 = vpop.eup %3120  ;;  %v1970_v10 = vmul.f32 1.442695, %v1495_v7  ;;  %v1048_v12 = vpop.f32.mrb[89].mxu0  ;;  %3142 = vpow2.f32 %v1964_v3 }
 0x23e   : > { %v1497_v13 = vpop.f32.mrb[89].mxu1  ;;  %v3123_v14 = vpop.eup %3122  ;;  %v1968_v15 = vmul.f32 1.442695, %v1048_v12  ;;  %v2206_v17 = vpack.c.bf16 %v3121_v8, %v3113_v59  ;;  %3144 = vpow2.f32 %v1966_v9 }
 0x23f   : > { %v1972_v16 = vmul.f32 1.442695, %v1497_v13  ;;  %v3125_v20 = vpop.eup %3124  ;;  %v2208_v21 = vpack.c.bf16 %v3123_v14, %v3115_v1  ;;  %3146 = vpow2.f32 %v1970_v10  ;;  %v1052_v23 = vpop.f32.mrb[90].mxu0 }
 0x240   : > { %v3127_v22 = vpop.eup %3126  ;;  %v1501_v24 = vpop.f32.mrb[90].mxu1  ;;  %v2207_v25 = vpack.c.bf16 %v3125_v20, %v3117_v4  ;;  %3148 = vpow2.f32 %v1968_v15  ;;  %v1974_v18 = vmul.f32 1.442695, %v1052_v23 }
 0x241   : > { %v3129_v26 = vpop.eup %3128  ;;  %v1978_v27 = vmul.f32 1.442695, %v1501_v24  ;;  %v1054_v28 = vpop.f32.mrb[91].mxu0  ;;  %v2209_v11 = vpack.c.bf16 %v3127_v22, %v3119_v5  ;;  %3150 = vpow2.f32 %v1972_v16 }
 0x242   : > { %v1503_v45 = vpop.f32.mrb[91].mxu1  ;;  %v3131_v29 = vpop.eup %3130  ;;  %v1976_v30 = vmul.f32 1.442695, %v1054_v28  ;;  %2328 = vmatprep.subr.bf16.mxu0 %v2207_v25  ;;  %3152 = vpow2.f32 %v1974_v18 }
 0x243   : > { %v1980_v31 = vmul.f32 1.442695, %v1503_v45  ;;  %v3133_v32 = vpop.eup %3132  ;;  %2410 = vmatprep.subr.bf16.mxu1 %v2209_v11  ;;  %2329 = vmatpush1.bf16.msra.mxu0 %v2206_v17  ;;  %3154 = vpow2.f32 %v1978_v27  ;;  %v1058_v34 = vpop.f32.mrb[92].mxu0 }
 0x244   : > { %v3135_v33 = vpop.eup %3134  ;;  %v1507_v36 = vpop.f32.mrb[92].mxu1  ;;  %2411 = vmatpush1.bf16.msra.mxu1 %v2208_v21  ;;  %3156 = vpow2.f32 %v1976_v30  ;;  %v1982_v38 = vmul.f32 1.442695, %v1058_v34 }
 0x245   : > { %v3137_v37 = vpop.eup %3136  ;;  %v1986_v39 = vmul.f32 1.442695, %v1507_v36  ;;  %v1060_v40 = vpop.f32.mrb[93].mxu0  ;;  %3158 = vpow2.f32 %v1980_v31 }
 0x246   : > { %v1509_v41 = vpop.f32.mrb[93].mxu1  ;;  %v3139_v35 = vpop.eup %3138  ;;  %v1984_v42 = vmul.f32 1.442695, %v1060_v40  ;;  %v2210_v44 = vpack.c.bf16 %v3137_v37, %v3129_v26  ;;  %3160 = vpow2.f32 %v1982_v38 }
 0x247   : > { %v1988_v43 = vmul.f32 1.442695, %v1509_v41  ;;  %v3141_v46 = vpop.eup %3140  ;;  %v2212_v56 = vpack.c.bf16 %v3139_v35, %v3131_v29  ;;  %3162 = vpow2.f32 %v1986_v39  ;;  %v1064_v48 = vpop.f32.mrb[94].mxu0 }
 0x248   : > { %v3143_v47 = vpop.eup %3142  ;;  %v1513_v49 = vpop.f32.mrb[94].mxu1  ;;  %v2211_v50 = vpack.c.bf16 %v3141_v46, %v3133_v32  ;;  %3164 = vpow2.f32 %v1984_v42  ;;  %v1990_v52 = vmul.f32 1.442695, %v1064_v48 }
 0x249   : > { %v3145_v51 = vpop.eup %3144  ;;  %v1994_v53 = vmul.f32 1.442695, %v1513_v49  ;;  %v1066_v54 = vpop.f32.mrb[95].mxu0  ;;  %v2213_v55 = vpack.c.bf16 %v3143_v47, %v3135_v33  ;;  %3166 = vpow2.f32 %v1988_v43 }
 0x24a   : > { %v1515_v57 = vpop.f32.mrb[95].mxu1  ;;  %v3147_v58 = vpop.eup %3146  ;;  %v1992_v59 = vmul.f32 1.442695, %v1066_v54  ;;  %2330 = vmatprep.subr.bf16.mxu0 %v2211_v50  ;;  %3168 = vpow2.f32 %v1990_v52 }
 0x24b   : > { %v1996_v60 = vmul.f32 1.442695, %v1515_v57  ;;  %v3149_v61 = vpop.eup %3148  ;;  %2412 = vmatprep.subr.bf16.mxu1 %v2213_v55  ;;  %2331 = vmatpush1.bf16.msra.mxu0 %v2210_v44  ;;  %3170 = vpow2.f32 %v1994_v53  ;;  %v1070_v63 = vpop.f32.mrb[96].mxu0 }
 0x24c   : > { %v3151_v62 = vpop.eup %3150  ;;  %v1519_v0 = vpop.f32.mrb[96].mxu1  ;;  %2413 = vmatpush1.bf16.msra.mxu1 %v2212_v56  ;;  %3172 = vpow2.f32 %v1992_v59  ;;  %v1998_v2 = vmul.f32 1.442695, %v1070_v63 }
 0x24d   : > { %v3153_v1 = vpop.eup %3152  ;;  %v2002_v3 = vmul.f32 1.442695, %v1519_v0  ;;  %v1072_v4 = vpop.f32.mrb[97].mxu0  ;;  %3174 = vpow2.f32 %v1996_v60 }
 0x24e   : > { %v1521_v5 = vpop.f32.mrb[97].mxu1  ;;  %v3155_v6 = vpop.eup %3154  ;;  %v2000_v7 = vmul.f32 1.442695, %v1072_v4  ;;  %v2214_v9 = vpack.c.bf16 %v3153_v1, %v3145_v51  ;;  %3176 = vpow2.f32 %v1998_v2 }
 0x24f   : > { %v2004_v8 = vmul.f32 1.442695, %v1521_v5  ;;  %v3157_v10 = vpop.eup %3156  ;;  %v2216_v12 = vpack.c.bf16 %v3155_v6, %v3147_v58  ;;  %3178 = vpow2.f32 %v2002_v3  ;;  %v1076_v14 = vpop.f32.mrb[98].mxu0 }
 0x250   : > { %v3159_v13 = vpop.eup %3158  ;;  %v1525_v15 = vpop.f32.mrb[98].mxu1  ;;  %v2215_v16 = vpack.c.bf16 %v3157_v10, %v3149_v61  ;;  %3180 = vpow2.f32 %v2000_v7  ;;  %v2006_v20 = vmul.f32 1.442695, %v1076_v14 }
 0x251   : > { %v3161_v17 = vpop.eup %3160  ;;  %v2010_v21 = vmul.f32 1.442695, %v1525_v15  ;;  %v1078_v22 = vpop.f32.mrb[99].mxu0  ;;  %v2217_v24 = vpack.c.bf16 %v3159_v13, %v3151_v62  ;;  %3182 = vpow2.f32 %v2004_v8 }
 0x252   : > { %v1527_v23 = vpop.f32.mrb[99].mxu1  ;;  %v3163_v25 = vpop.eup %3162  ;;  %v2008_v26 = vmul.f32 1.442695, %v1078_v22  ;;  %2332 = vmatprep.subr.bf16.mxu0 %v2215_v16  ;;  %3184 = vpow2.f32 %v2006_v20 }
 0x253   : > { %v2012_v18 = vmul.f32 1.442695, %v1527_v23  ;;  %v3165_v27 = vpop.eup %3164  ;;  %2414 = vmatprep.subr.bf16.mxu1 %v2217_v24  ;;  %2333 = vmatpush1.bf16.msra.mxu0 %v2214_v9  ;;  %3186 = vpow2.f32 %v2010_v21  ;;  %v1082_v45 = vpop.f32.mrb[100].mxu0 }
 0x254   : > { %v3167_v28 = vpop.eup %3166  ;;  %v1531_v11 = vpop.f32.mrb[100].mxu1  ;;  %2415 = vmatpush1.bf16.msra.mxu1 %v2216_v12  ;;  %3188 = vpow2.f32 %v2008_v26  ;;  %v2014_v30 = vmul.f32 1.442695, %v1082_v45 }
 0x255   : > { %v3169_v29 = vpop.eup %3168  ;;  %v2018_v31 = vmul.f32 1.442695, %v1531_v11  ;;  %v1084_v32 = vpop.f32.mrb[101].mxu0  ;;  %3190 = vpow2.f32 %v2012_v18 }
 0x256   : > { %v1533_v33 = vpop.f32.mrb[101].mxu1  ;;  %v3171_v34 = vpop.eup %3170  ;;  %v2016_v36 = vmul.f32 1.442695, %v1084_v32  ;;  %v2218_v38 = vpack.c.bf16 %v3169_v29, %v3161_v17  ;;  %3192 = vpow2.f32 %v2014_v30 }
 0x257   : > { %v2020_v37 = vmul.f32 1.442695, %v1533_v33  ;;  %v3173_v39 = vpop.eup %3172  ;;  %v2220_v40 = vpack.c.bf16 %v3171_v34, %v3163_v25  ;;  %3194 = vpow2.f32 %v2018_v31  ;;  %v1088_v35 = vpop.f32.mrb[102].mxu0 }
 0x258   : > { %v3175_v41 = vpop.eup %3174  ;;  %v1537_v42 = vpop.f32.mrb[102].mxu1  ;;  %v2219_v43 = vpack.c.bf16 %v3173_v39, %v3165_v27  ;;  %3196 = vpow2.f32 %v2016_v36  ;;  %v2022_v46 = vmul.f32 1.442695, %v1088_v35 }
 0x259   : > { %v3177_v44 = vpop.eup %3176  ;;  %v2026_v56 = vmul.f32 1.442695, %v1537_v42  ;;  %v1090_v47 = vpop.f32.mrb[103].mxu0  ;;  %v2221_v49 = vpack.c.bf16 %v3175_v41, %v3167_v28  ;;  %3198 = vpow2.f32 %v2020_v37 }
 0x25a   : > { %v1539_v48 = vpop.f32.mrb[103].mxu1  ;;  %v3179_v50 = vpop.eup %3178  ;;  %v2024_v51 = vmul.f32 1.442695, %v1090_v47  ;;  %2334 = vmatprep.subr.bf16.mxu0 %v2219_v43  ;;  %3200 = vpow2.f32 %v2022_v46 }
 0x25b   : > { %v2028_v52 = vmul.f32 1.442695, %v1539_v48  ;;  %v3181_v53 = vpop.eup %3180  ;;  %2416 = vmatprep.subr.bf16.mxu1 %v2221_v49  ;;  %2335 = vmatpush1.bf16.msra.mxu0 %v2218_v38  ;;  %3202 = vpow2.f32 %v2026_v56  ;;  %v1094_v57 = vpop.f32.mrb[104].mxu0 }
 0x25c   : > { %v3183_v54 = vpop.eup %3182  ;;  %v1543_v55 = vpop.f32.mrb[104].mxu1  ;;  %2417 = vmatpush1.bf16.msra.mxu1 %v2220_v40  ;;  %3204 = vpow2.f32 %v2024_v51  ;;  %v2030_v59 = vmul.f32 1.442695, %v1094_v57 }
 0x25d   : > { %v3185_v58 = vpop.eup %3184  ;;  %v2034_v60 = vmul.f32 1.442695, %v1543_v55  ;;  %v1096_v61 = vpop.f32.mrb[105].mxu0  ;;  %3206 = vpow2.f32 %v2028_v52 }
 0x25e   : > { %v1545_v62 = vpop.f32.mrb[105].mxu1  ;;  %v3187_v63 = vpop.eup %3186  ;;  %v2032_v0 = vmul.f32 1.442695, %v1096_v61  ;;  %v2222_v2 = vpack.c.bf16 %v3185_v58, %v3177_v44  ;;  %3208 = vpow2.f32 %v2030_v59 }
 0x25f   : > { %v2036_v1 = vmul.f32 1.442695, %v1545_v62  ;;  %v3189_v3 = vpop.eup %3188  ;;  %v2224_v4 = vpack.c.bf16 %v3187_v63, %v3179_v50  ;;  %3210 = vpow2.f32 %v2034_v60  ;;  %v1100_v6 = vpop.f32.mrb[106].mxu0 }
 0x260   : > { %v3191_v5 = vpop.eup %3190  ;;  %v1549_v7 = vpop.f32.mrb[106].mxu1  ;;  %v2223_v8 = vpack.c.bf16 %v3189_v3, %v3181_v53  ;;  %3212 = vpow2.f32 %v2032_v0  ;;  %v2038_v10 = vmul.f32 1.442695, %v1100_v6 }
 0x261   : > { %v3193_v9 = vpop.eup %3192  ;;  %v2042_v12 = vmul.f32 1.442695, %v1549_v7  ;;  %v1102_v13 = vpop.f32.mrb[107].mxu0  ;;  %v2225_v15 = vpack.c.bf16 %v3191_v5, %v3183_v54  ;;  %3214 = vpow2.f32 %v2036_v1 }
 0x262   : > { %v1551_v14 = vpop.f32.mrb[107].mxu1  ;;  %v3195_v16 = vpop.eup %3194  ;;  %v2040_v17 = vmul.f32 1.442695, %v1102_v13  ;;  %2336 = vmatprep.subr.bf16.mxu0 %v2223_v8  ;;  %3216 = vpow2.f32 %v2038_v10 }
 0x263   : > { %v2044_v20 = vmul.f32 1.442695, %v1551_v14  ;;  %v3197_v21 = vpop.eup %3196  ;;  %2418 = vmatprep.subr.bf16.mxu1 %v2225_v15  ;;  %2337 = vmatpush1.bf16.msra.mxu0 %v2222_v2  ;;  %3218 = vpow2.f32 %v2042_v12  ;;  %v1106_v23 = vpop.f32.mrb[108].mxu0 }
 0x264   : > { %v3199_v22 = vpop.eup %3198  ;;  %v1555_v24 = vpop.f32.mrb[108].mxu1  ;;  %2419 = vmatpush1.bf16.msra.mxu1 %v2224_v4  ;;  %3220 = vpow2.f32 %v2040_v17  ;;  %v2046_v26 = vmul.f32 1.442695, %v1106_v23 }
 0x265   : > { %v3201_v25 = vpop.eup %3200  ;;  %v2050_v18 = vmul.f32 1.442695, %v1555_v24  ;;  %v1108_v27 = vpop.f32.mrb[109].mxu0  ;;  %3222 = vpow2.f32 %v2044_v20 }
 0x266   : > { %v1557_v28 = vpop.f32.mrb[109].mxu1  ;;  %v3203_v45 = vpop.eup %3202  ;;  %v2048_v11 = vmul.f32 1.442695, %v1108_v27  ;;  %v2226_v30 = vpack.c.bf16 %v3201_v25, %v3193_v9  ;;  %3224 = vpow2.f32 %v2046_v26 }
 0x267   : > { %v2052_v29 = vmul.f32 1.442695, %v1557_v28  ;;  %v3205_v31 = vpop.eup %3204  ;;  %v2228_v32 = vpack.c.bf16 %v3203_v45, %v3195_v16  ;;  %3226 = vpow2.f32 %v2050_v18  ;;  %v1112_v34 = vpop.f32.mrb[110].mxu0 }
 0x268   : > { %v3207_v33 = vpop.eup %3206  ;;  %v1561_v36 = vpop.f32.mrb[110].mxu1  ;;  %v2227_v37 = vpack.c.bf16 %v3205_v31, %v3197_v21  ;;  %3228 = vpow2.f32 %v2048_v11  ;;  %v2054_v39 = vmul.f32 1.442695, %v1112_v34 }
 0x269   : > { %v3209_v38 = vpop.eup %3208  ;;  %v2058_v40 = vmul.f32 1.442695, %v1561_v36  ;;  %v1114_v41 = vpop.f32.mrb[111].mxu0  ;;  %v2229_v42 = vpack.c.bf16 %v3207_v33, %v3199_v22  ;;  %3230 = vpow2.f32 %v2052_v29 }
 0x26a   : > { %v1563_v35 = vpop.f32.mrb[111].mxu1  ;;  %v3211_v43 = vpop.eup %3210  ;;  %v2056_v44 = vmul.f32 1.442695, %v1114_v41  ;;  %2338 = vmatprep.subr.bf16.mxu0 %v2227_v37  ;;  %3232 = vpow2.f32 %v2054_v39 }
 0x26b   : > { %v2060_v46 = vmul.f32 1.442695, %v1563_v35  ;;  %v3213_v56 = vpop.eup %3212  ;;  %2420 = vmatprep.subr.bf16.mxu1 %v2229_v42  ;;  %2339 = vmatpush1.bf16.msra.mxu0 %v2226_v30  ;;  %3234 = vpow2.f32 %v2058_v40  ;;  %v1118_v48 = vpop.f32.mrb[112].mxu0 }
 0x26c   : > { %v3215_v47 = vpop.eup %3214  ;;  %v1567_v49 = vpop.f32.mrb[112].mxu1  ;;  %2421 = vmatpush1.bf16.msra.mxu1 %v2228_v32  ;;  %3236 = vpow2.f32 %v2056_v44  ;;  %v2062_v51 = vmul.f32 1.442695, %v1118_v48 }
 0x26d   : > { %v3217_v50 = vpop.eup %3216  ;;  %v2066_v52 = vmul.f32 1.442695, %v1567_v49  ;;  %v1120_v53 = vpop.f32.mrb[113].mxu0  ;;  %3238 = vpow2.f32 %v2060_v46 }
 0x26e   : > { %v1569_v54 = vpop.f32.mrb[113].mxu1  ;;  %v3219_v57 = vpop.eup %3218  ;;  %v2064_v55 = vmul.f32 1.442695, %v1120_v53  ;;  %v2230_v59 = vpack.c.bf16 %v3217_v50, %v3209_v38  ;;  %3240 = vpow2.f32 %v2062_v51 }
 0x26f   : > { %v2068_v58 = vmul.f32 1.442695, %v1569_v54  ;;  %v3221_v60 = vpop.eup %3220  ;;  %v2232_v61 = vpack.c.bf16 %v3219_v57, %v3211_v43  ;;  %3242 = vpow2.f32 %v2066_v52  ;;  %v1124_v63 = vpop.f32.mrb[114].mxu0 }
 0x270   : > { %v3223_v62 = vpop.eup %3222  ;;  %v1573_v0 = vpop.f32.mrb[114].mxu1  ;;  %v2231_v1 = vpack.c.bf16 %v3221_v60, %v3213_v56  ;;  %3244 = vpow2.f32 %v2064_v55  ;;  %v2070_v3 = vmul.f32 1.442695, %v1124_v63 }
 0x271   : > { %v3225_v2 = vpop.eup %3224  ;;  %v2074_v4 = vmul.f32 1.442695, %v1573_v0  ;;  %v1126_v5 = vpop.f32.mrb[115].mxu0  ;;  %v2233_v7 = vpack.c.bf16 %v3223_v62, %v3215_v47  ;;  %3246 = vpow2.f32 %v2068_v58 }
 0x272   : > { %v1575_v6 = vpop.f32.mrb[115].mxu1  ;;  %v3227_v8 = vpop.eup %3226  ;;  %v2072_v9 = vmul.f32 1.442695, %v1126_v5  ;;  %2340 = vmatprep.subr.bf16.mxu0 %v2231_v1  ;;  %3248 = vpow2.f32 %v2070_v3 }
 0x273   : > { %v2076_v10 = vmul.f32 1.442695, %v1575_v6  ;;  %v3229_v12 = vpop.eup %3228  ;;  %2422 = vmatprep.subr.bf16.mxu1 %v2233_v7  ;;  %2341 = vmatpush1.bf16.msra.mxu0 %v2230_v59  ;;  %3250 = vpow2.f32 %v2074_v4  ;;  %v1130_v14 = vpop.f32.mrb[116].mxu0 }
 0x274   : > { %v3231_v13 = vpop.eup %3230  ;;  %v1579_v15 = vpop.f32.mrb[116].mxu1  ;;  %2423 = vmatpush1.bf16.msra.mxu1 %v2232_v61  ;;  %3252 = vpow2.f32 %v2072_v9  ;;  %v2078_v17 = vmul.f32 1.442695, %v1130_v14 }
 0x275   : > { %v3233_v16 = vpop.eup %3232  ;;  %v2082_v20 = vmul.f32 1.442695, %v1579_v15  ;;  %v1132_v21 = vpop.f32.mrb[117].mxu0  ;;  %3254 = vpow2.f32 %v2076_v10 }
 0x276   : > { %v1581_v22 = vpop.f32.mrb[117].mxu1  ;;  %v3235_v23 = vpop.eup %3234  ;;  %v2080_v24 = vmul.f32 1.442695, %v1132_v21  ;;  %v2234_v26 = vpack.c.bf16 %v3233_v16, %v3225_v2  ;;  %3256 = vpow2.f32 %v2078_v17 }
 0x277   : > { %v2084_v25 = vmul.f32 1.442695, %v1581_v22  ;;  %v3237_v18 = vpop.eup %3236  ;;  %v2236_v27 = vpack.c.bf16 %v3235_v23, %v3227_v8  ;;  %3258 = vpow2.f32 %v2082_v20  ;;  %v1136_v45 = vpop.f32.mrb[118].mxu0 }
 0x278   : > { %v3239_v28 = vpop.eup %3238  ;;  %v1585_v11 = vpop.f32.mrb[118].mxu1  ;;  %v2235_v29 = vpack.c.bf16 %v3237_v18, %v3229_v12  ;;  %3260 = vpow2.f32 %v2080_v24  ;;  %v2086_v31 = vmul.f32 1.442695, %v1136_v45 }
 0x279   : > { %v3241_v30 = vpop.eup %3240  ;;  %v2090_v32 = vmul.f32 1.442695, %v1585_v11  ;;  %v1138_v33 = vpop.f32.mrb[119].mxu0  ;;  %v2237_v36 = vpack.c.bf16 %v3239_v28, %v3231_v13  ;;  %3262 = vpow2.f32 %v2084_v25 }
 0x27a   : > { %v1587_v34 = vpop.f32.mrb[119].mxu1  ;;  %v3243_v37 = vpop.eup %3242  ;;  %v2088_v38 = vmul.f32 1.442695, %v1138_v33  ;;  %2342 = vmatprep.subr.bf16.mxu0 %v2235_v29  ;;  %3264 = vpow2.f32 %v2086_v31 }
 0x27b   : > { %v2092_v39 = vmul.f32 1.442695, %v1587_v34  ;;  %v3245_v40 = vpop.eup %3244  ;;  %2424 = vmatprep.subr.bf16.mxu1 %v2237_v36  ;;  %2343 = vmatpush1.bf16.msra.mxu0 %v2234_v26  ;;  %3266 = vpow2.f32 %v2090_v32  ;;  %v1142_v35 = vpop.f32.mrb[120].mxu0 }
 0x27c   : > { %v3247_v41 = vpop.eup %3246  ;;  %v1591_v42 = vpop.f32.mrb[120].mxu1  ;;  %2425 = vmatpush1.bf16.msra.mxu1 %v2236_v27  ;;  %3268 = vpow2.f32 %v2088_v38  ;;  %v2094_v44 = vmul.f32 1.442695, %v1142_v35 }
 0x27d   : > { %v3249_v43 = vpop.eup %3248  ;;  %v2098_v46 = vmul.f32 1.442695, %v1591_v42  ;;  %v1144_v56 = vpop.f32.mrb[121].mxu0  ;;  %3270 = vpow2.f32 %v2092_v39 }
 0x27e   : > { %v1593_v47 = vpop.f32.mrb[121].mxu1  ;;  %v3251_v48 = vpop.eup %3250  ;;  %v2096_v49 = vmul.f32 1.442695, %v1144_v56  ;;  %v2238_v51 = vpack.c.bf16 %v3249_v43, %v3241_v30  ;;  %3272 = vpow2.f32 %v2094_v44 }
 0x27f   : > { %v2100_v50 = vmul.f32 1.442695, %v1593_v47  ;;  %v3253_v52 = vpop.eup %3252  ;;  %v2240_v53 = vpack.c.bf16 %v3251_v48, %v3243_v37  ;;  %3274 = vpow2.f32 %v2098_v46  ;;  %v1148_v57 = vpop.f32.mrb[122].mxu0 }
 0x280   : > { %v3255_v54 = vpop.eup %3254  ;;  %v1597_v55 = vpop.f32.mrb[122].mxu1  ;;  %v2239_v58 = vpack.c.bf16 %v3253_v52, %v3245_v40  ;;  %3276 = vpow2.f32 %v2096_v49  ;;  %v2102_v60 = vmul.f32 1.442695, %v1148_v57 }
 0x281   : > { %v3257_v59 = vpop.eup %3256  ;;  %v2106_v61 = vmul.f32 1.442695, %v1597_v55  ;;  %v1150_v62 = vpop.f32.mrb[123].mxu0  ;;  %v2241_v0 = vpack.c.bf16 %v3255_v54, %v3247_v41  ;;  %3278 = vpow2.f32 %v2100_v50  ;;  %v2254_v55 = vld [vmem:[%s3434_s24] sm:$0x77] }
 0x282   : > { %v1599_v63 = vpop.f32.mrb[123].mxu1  ;;  %v3259_v1 = vpop.eup %3258  ;;  %v2104_v2 = vmul.f32 1.442695, %v1150_v62  ;;  %2344 = vmatprep.subr.bf16.mxu0 %v2239_v58  ;;  %3280 = vpow2.f32 %v2102_v60  ;;  %v2255_v60 = vld [vmem:[%s3434_s24 + $0x8] sm:$0x77] }
 0x283   : > { %v2108_v3 = vmul.f32 1.442695, %v1599_v63  ;;  %v3261_v4 = vpop.eup %3260  ;;  %2426 = vmatprep.subr.bf16.mxu1 %v2241_v0  ;;  %2345 = vmatpush1.bf16.msra.mxu0 %v2238_v51  ;;  %3282 = vpow2.f32 %v2106_v61  ;;  %v1154_v6 = vpop.f32.mrb[124].mxu0 }
 0x284   : > { %v3263_v5 = vpop.eup %3262  ;;  %v1603_v7 = vpop.f32.mrb[124].mxu1  ;;  %2427 = vmatpush1.bf16.msra.mxu1 %v2240_v53  ;;  %3284 = vpow2.f32 %v2104_v2  ;;  %v2110_v9 = vmul.f32 1.442695, %v1154_v6 }
 0x285   : > { %v3265_v8 = vpop.eup %3264  ;;  %v2114_v10 = vmul.f32 1.442695, %v1603_v7  ;;  %v1156_v12 = vpop.f32.mrb[125].mxu0  ;;  %3286 = vpow2.f32 %v2108_v3 }
 0x286   : > { %v1605_v13 = vpop.f32.mrb[125].mxu1  ;;  %v3267_v14 = vpop.eup %3266  ;;  %v2112_v15 = vmul.f32 1.442695, %v1156_v12  ;;  %v2242_v17 = vpack.c.bf16 %v3265_v8, %v3257_v59  ;;  %3288 = vpow2.f32 %v2110_v9 }
 0x287   : > { %v2116_v16 = vmul.f32 1.442695, %v1605_v13  ;;  %v3269_v20 = vpop.eup %3268  ;;  %v2244_v21 = vpack.c.bf16 %v3267_v14, %v3259_v1  ;;  %3290 = vpow2.f32 %v2114_v10  ;;  %v1160_v23 = vpop.f32.mrb[126].mxu0 }
 0x288   : > { %v3271_v22 = vpop.eup %3270  ;;  %v1609_v24 = vpop.f32.mrb[126].mxu1  ;;  %v2243_v25 = vpack.c.bf16 %v3269_v20, %v3261_v4  ;;  %3292 = vpow2.f32 %v2112_v15  ;;  %v2118_v18 = vmul.f32 1.442695, %v1160_v23 }
 0x289   : > { %v3273_v26 = vpop.eup %3272  ;;  %v2122_v27 = vmul.f32 1.442695, %v1609_v24  ;;  %v1162_v28 = vpop.f32.mrb[127].mxu0  ;;  %v2245_v11 = vpack.c.bf16 %v3271_v22, %v3263_v5  ;;  %3294 = vpow2.f32 %v2116_v16 }
 0x28a   : > { %v1611_v45 = vpop.f32.mrb[127].mxu1  ;;  %v3275_v29 = vpop.eup %3274  ;;  %v2120_v30 = vmul.f32 1.442695, %v1162_v28  ;;  %2346 = vmatprep.subr.bf16.mxu0 %v2243_v25  ;;  %3296 = vpow2.f32 %v2118_v18 }
 0x28b   : > { %v2124_v31 = vmul.f32 1.442695, %v1611_v45  ;;  %v3277_v32 = vpop.eup %3276  ;;  %2428 = vmatprep.subr.bf16.mxu1 %v2245_v11  ;;  %2347 = vmatpush1.bf16.msra.mxu0 %v2242_v17  ;;  %3298 = vpow2.f32 %v2122_v27 }
 0x28c   : > { %v3279_v33 = vpop.eup %3278  ;;  %2429 = vmatpush1.bf16.msra.mxu1 %v2244_v21  ;;  %3300 = vpow2.f32 %v2120_v30 }
 0x28d   : > { %v3281_v34 = vpop.eup %3280  ;;  %3302 = vpow2.f32 %v2124_v31 }
 0x28e   : > { %v3283_v36 = vpop.eup %3282  ;;  %v2246_v37 = vpack.c.bf16 %v3281_v34, %v3273_v26 }
 0x28f   : > { %v3285_v38 = vpop.eup %3284  ;;  %v2248_v39 = vpack.c.bf16 %v3283_v36, %v3275_v29 }
 0x290   : > { %v3287_v40 = vpop.eup %3286  ;;  %v2247_v41 = vpack.c.bf16 %v3285_v38, %v3277_v32 }
 0x291   : > { %v3289_v35 = vpop.eup %3288  ;;  %v2249_v42 = vpack.c.bf16 %v3287_v40, %v3279_v33 }
 0x292   : > { %v3291_v43 = vpop.eup %3290  ;;  %2348 = vmatprep.subr.bf16.mxu0 %v2247_v41 }
 0x293   : > { %v3293_v44 = vpop.eup %3292  ;;  %2430 = vmatprep.subr.bf16.mxu1 %v2249_v42  ;;  %2349 = vmatpush1.bf16.msra.mxu0 %v2246_v37 }
 0x294   : > { %v3295_v46 = vpop.eup %3294  ;;  %2431 = vmatpush1.bf16.msra.mxu1 %v2248_v39 }
 0x295   : > { %v3297_v56 = vpop.eup %3296 }
 0x296   : > { %v3299_v47 = vpop.eup %3298  ;;  %v2250_v48 = vpack.c.bf16 %v3297_v56, %v3289_v35 }
 0x297   : > { %v3301_v49 = vpop.eup %3300  ;;  %v2252_v50 = vpack.c.bf16 %v3299_v47, %v3291_v43 }
 0x298   : > { %v3303_v51 = vpop.eup %3302  ;;  %v2251_v52 = vpack.c.bf16 %v3301_v49, %v3293_v44 }
 0x299   : > { %v2253_v53 = vpack.c.bf16 %v3303_v51, %v3295_v46 }
 0x29a   : > { %2350 = vmatprep.subr.bf16.mxu0 %v2251_v52 }
 0x29b   : > { %2432 = vmatprep.subr.bf16.mxu1 %v2253_v53  ;;  %2351 = vmatpush1.bf16.msra.mxu0 %v2250_v48 }
 0x29c   : > { %2433 = vmatpush1.bf16.msra.mxu1 %v2252_v50 }
 0x29e   : > { %2353 = vmatmul.mubr.bf16.vlgmr.msra.gmra.mrb[128].mxu0 %v3769_v19 }
 0x29f   : > { %2435 = vmatmul.mubr.bf16.vlgmr.msra.gmra.mrb[128].mxu1 %v3769_v19 }
 0x371   : > { %v2354_v54 = vpop.f32.mrb[128].mxu0 }
 0x372   : > { %v2436_v57 = vpop.f32.mrb[128].mxu1  ;;  %v2356_v58 = vpop.f32.mrb[129].mxu0 }
 0x373   : > { %v2447_v59 = vcombine.low %v2354_v54, %v2356_v58  ;;  %v2438_v61 = vpop.f32.mrb[129].mxu1  ;;  %v2358_v62 = vpop.f32.mrb[130].mxu0 }
 0x374   : > { %v2448_v63 = vcombine.low %v2436_v57, %v2438_v61  ;;  %v2440_v0 = vpop.f32.mrb[130].mxu1  ;;  %v2359_v1 = vpop.f32.mrb[131].mxu0 }
 0x375   : > { %v2451_v2 = vadd.f32 %v2447_v59, %v2254_v55  ;;  %v2441_v3 = vpop.f32.mrb[131].mxu1 }
 0x376   : > { %v2452_v4 = vadd.f32 %v2448_v63, %v2255_v60 }
 0x377   : > { %2453 = vst [vmem:[%s3434_s24] sm:$0x77] %v2451_v2 }
 0x378   : > { %2454 = vst [vmem:[%s3434_s24 + $0x8] sm:$0x77] %v2452_v4 }
 0x379 PF: > { %s25_s28 = sadd.s32 1, %s3354_s28   ;;  %s3798_s1 = smov %s3350_s27 }
 0x37a   : > { %p22_p5 = scmp.ge.s32.totalorder %s25_s28, 4   ;;  %s3799_s27 = smov %s3801_s29 }
 0x37c   :  { %24 = sbr.rel (!%p22_p5) target bundleno = 27 (0x1b), region = 76 }

</bundles_post_ra>
